<compile_context>
chip_gen: v7x
topology: tpu7x:2x2x1
jax: 0.10.0
libtpu: 0.0.40
codegen_flags: <defaults>
</compile_context>

<pallas_src>
import functools

import jax
import jax.numpy as jnp
from jax.experimental import pallas as pl
from jax.experimental.pallas import tpu as pltpu


def _round_up(x, m):
    return (x + m - 1) // m * m


def _erf(x):
    # Abramowitz & Stegun 7.1.26 (abs err < 1.5e-7 in f32); avoids relying on
    # a lax.erf lowering inside Mosaic.  Runs in x.dtype (f32 or bf16).
    a1, a2, a3, a4, a5 = 0.254829592, -0.284496736, 1.421413741, -1.453152027, 1.061405429
    pc = 0.3275911
    one = jnp.ones((), x.dtype)
    s = jnp.where(x >= 0, one, -one)
    z = jnp.abs(x)
    # divide goes to the EUP slot via approximate reciprocal
    t = pl.reciprocal((1.0 + pc * z).astype(jnp.float32), approx=True).astype(x.dtype)
    poly = ((((a5 * t + a4) * t + a3) * t + a2) * t + a1) * t
    zf = z.astype(jnp.float32)
    e = jnp.exp(-zf * zf).astype(x.dtype)
    return s * (1.0 - poly * e)


def _gelu_exact(x):
    # matches torch F.gelu (erf form) used by diffusers GEGLU.
    return 0.5 * x * (1.0 + _erf(x * 0.7071067811865476))


def _block_kernel(x_ref, ts_ref, sst_ref, tpe_ref, vec_ref,
                  wqkv_ref, wo_ref, wgh_ref, wgg_ref, bg_ref, w2_ref,
                  o_ref, h_scr, nh2_scr, ff_scr,
                  *, heads, head_dim, hd_pad, gelu_dtype, eps):
    c_idx = pl.program_id(1)
    n_chunks = pl.num_programs(1)

    vec = vec_ref[...]                                     # (8, C) packed f32 vectors
    ln1w, ln1b = vec[0:1], vec[1:2]
    ln2w, ln2b = vec[2:3], vec[3:4]
    bo, b2 = vec[4:5], vec[5:6]

    # scale_shift_table[None] + timestep.reshape(B, 6, C)
    mod = ts_ref[...].astype(jnp.float32) + sst_ref[...].astype(jnp.float32)
    shift_msa, scale_msa, gate_msa = mod[:, 0:1, :], mod[:, 1:2, :], mod[:, 2:3, :]
    shift_mlp, scale_mlp, gate_mlp = mod[:, 3:4, :], mod[:, 4:5, :], mod[:, 5:6, :]

    def layer_norm(h, w, b):
        mu = jnp.mean(h, axis=-1, keepdims=True)
        var = jnp.mean(jnp.square(h - mu), axis=-1, keepdims=True)
        return (h - mu) * jax.lax.rsqrt(var + eps) * w + b

    # ---- attention + norm2 (once per batch tile, at the first FF chunk) ----
    @pl.when(c_idx == 0)
    def _attn_and_norm2():
        x = x_ref[...].astype(jnp.float32)                 # (TB, F, C)
        tb, fr, ch = x.shape
        inner_pad = heads * hd_pad

        nh = layer_norm(x + tpe_ref[...].astype(jnp.float32), ln1w, ln1b)
        nh = nh * (1.0 + scale_msa) + shift_msa
        nh2d = nh.reshape(tb * fr, ch).astype(jnp.bfloat16)

        # fused, head-padded QKV projection (bf16 MXU, f32 accumulation)
        qkv = jnp.dot(nh2d, wqkv_ref[...], preferred_element_type=jnp.float32)
        qb = qkv[:, 0:inner_pad].astype(jnp.bfloat16).reshape(tb, fr, inner_pad)
        kb = qkv[:, inner_pad:2 * inner_pad].astype(jnp.bfloat16).reshape(tb, fr, inner_pad)
        vb = qkv[:, 2 * inner_pad:3 * inner_pad].astype(jnp.bfloat16).reshape(tb, fr, inner_pad)

        # self-attention over frames: per-head 128-aligned lane slices, and
        # per-head out-projection accumulation (no heads-wide concat).
        scale = head_dim ** -0.5
        attn2d = jnp.zeros((tb * fr, ch), jnp.float32)
        for hh in range(heads):
            sl = slice(hh * hd_pad, (hh + 1) * hd_pad)
            qh, kh, vh = qb[..., sl], kb[..., sl], vb[..., sl]
            s = jnp.einsum('bqd,bkd->bqk', qh, kh,
                           preferred_element_type=jnp.float32) * scale
            s = s - jnp.max(s, axis=-1, keepdims=True)
            pr = jnp.exp(s)
            pr = pr * pl.reciprocal(jnp.sum(pr, axis=-1, keepdims=True), approx=True)
            ctx = jnp.einsum('bqk,bkd->bqd', pr.astype(jnp.bfloat16), vh,
                             preferred_element_type=jnp.float32)
            attn2d = attn2d + jnp.dot(
                ctx.reshape(tb * fr, hd_pad).astype(jnp.bfloat16),
                wo_ref[hh], preferred_element_type=jnp.float32)
        attn = attn2d.reshape(tb, fr, ch) + bo
        h = x + gate_msa * attn
        h_scr[...] = h

        nh2 = layer_norm(h, ln2w, ln2b)
        nh2 = nh2 * (1.0 + scale_mlp) + shift_mlp
        nh2_scr[...] = nh2.astype(jnp.bfloat16)
        ff_scr[...] = jnp.zeros_like(ff_scr)

    # ---- GEGLU feed-forward: one ff_inner chunk per grid step ----
    tb, fr, ch = h_scr.shape
    nh2b = nh2_scr[...].reshape(tb * fr, ch)
    hid = jnp.dot(nh2b, wgh_ref[...], preferred_element_type=jnp.float32) + bg_ref[0:1, :]
    gate = jnp.dot(nh2b, wgg_ref[...], preferred_element_type=jnp.float32) + bg_ref[1:2, :]
    g = _gelu_exact(gate.astype(gelu_dtype)).astype(jnp.float32)
    act = (hid * g).astype(jnp.bfloat16)
    ff_scr[...] += jnp.dot(act, w2_ref[...],
                           preferred_element_type=jnp.float32).reshape(tb, fr, ch)

    # ---- finalize at the last FF chunk ----
    @pl.when(c_idx == n_chunks - 1)
    def _finalize():
        ff = ff_scr[...] + b2
        o_ref[...] = (h_scr[...] + gate_mlp * ff).astype(o_ref.dtype)


def _vmem_capacity_bytes():
    try:
        return int(pltpu.get_tpu_info().vmem_capacity_bytes)
    except Exception:
        return 64 << 20          # conservative (v7x-sized) fallback


def _gelu_compute_dtype():
    # bf16 polynomial only on chips with a packed-bf16 VPU (v6e / v7x).
    try:
        kind = jax.devices()[0].device_kind.lower()
    except Exception:
        return jnp.float32
    for tag in ("v2", "v3", "v4", "v5"):
        if tag in kind:
            return jnp.float32
    return jnp.bfloat16


def _pick_tb(B, f, target_rows):
    tb = max(1, target_rows // max(f, 1))
    tb = min(tb, B)
    if tb >= B and B > 1:
        # keep grid length >= 2 so the batch axis can shard across TensorCores
        # (v7x megacore) via dimension_semantics="parallel".
        tb = (B + 1) // 2
    return tb


def _pick_ff_chunk(ff_inner, max_chunk=1536):
    # chunk must divide ff_inner; prefer 256-aligned (MXU N tile), then 128.
    if ff_inner <= max_chunk:
        return ff_inner
    for align in (256, 128):
        c = (max_chunk // align) * align
        while c >= align:
            if ff_inner % c == 0:
                return c
            c -= align
    return ff_inner


def temporal_transformer_block(hidden_states, timestep, temporal_pos_embed,
                               num_frame, params, *, heads, head_dim,
                               block_rows=None, ff_chunk=None):
    bf_, num_patch, dim = hidden_states.shape
    f = num_frame
    b = bf_ // f
    B = b * num_patch
    hd_pad = _round_up(head_dim, 128)
    inner_pad = heads * hd_pad

    # rearrange '(b f) p c -> (b p) f c' (wrapper-side, see TODO at top)
    x = hidden_states.reshape(b, f, num_patch, dim).transpose(0, 2, 1, 3).reshape(B, f, dim)
    ts = timestep.reshape(B, 6, dim).astype(jnp.float32)
    sst = params['scale_shift_table'].astype(jnp.float32)
    tpe = temporal_pos_embed.astype(jnp.float32)

    # pack the six small (1, dim) vectors into one (8, dim) operand
    vec = jnp.concatenate([
        params['ln1_w'], params['ln1_b'], params['ln2_w'], params['ln2_b'],
        params['bo'], params['b2'], jnp.zeros((2, dim), jnp.float32)],
        axis=0).astype(jnp.float32)
    bg2 = jnp.concatenate([params['bg_hid'], params['bg_gate']],
                          axis=0).astype(jnp.float32)      # (2, ff_inner)

    # fused + head-padded QKV weight (dim, 3*inner_pad); head-padded out-proj.
    def pad_head_cols(w):
        w3 = w.reshape(dim, heads, head_dim)
        w3 = jnp.pad(w3, ((0, 0), (0, 0), (0, hd_pad - head_dim)))
        return w3.reshape(dim, inner_pad)

    wqkv = jnp.concatenate([pad_head_cols(params['wq']),
                            pad_head_cols(params['wk']),
                            pad_head_cols(params['wv'])], axis=1).astype(jnp.bfloat16)
    wo_h = jnp.pad(params['wo'].reshape(heads, head_dim, dim),
                   ((0, 0), (0, hd_pad - head_dim), (0, 0))).astype(jnp.bfloat16)

    wgh = params['wg_hid'].astype(jnp.bfloat16)
    wgg = params['wg_gate'].astype(jnp.bfloat16)
    w2 = params['w2'].astype(jnp.bfloat16)
    ff_inner = w2.shape[0]
    if ff_chunk is None or ff_inner % ff_chunk != 0:
        ff_chunk = _pick_ff_chunk(ff_inner)
    n_chunks = ff_inner // ff_chunk

    cap = _vmem_capacity_bytes()
    if block_rows is None:
        block_rows = 512 if cap <= (64 << 20) else 1024
    TB = _pick_tb(B, f, block_rows)
    Bp = pl.cdiv(B, TB) * TB
    if Bp != B:
        x = jnp.pad(x, ((0, Bp - B), (0, 0), (0, 0)))
        ts = jnp.pad(ts, ((0, Bp - B), (0, 0), (0, 0)))
    grid = (Bp // TB, n_chunks)

    # explicit, generation-aware scoped-VMEM budget
    def _nbytes(a):
        return int(a.size) * jnp.dtype(a.dtype).itemsize

    rep_bytes = 2 * sum(_nbytes(a) for a in (sst, tpe, vec, wqkv, wo_h))
    chunk_bytes = 2 * (2 * dim * ff_chunk * 2 + 2 * ff_chunk * 4 + ff_chunk * dim * 2)
    io_bytes = 2 * (TB * f * dim * jnp.dtype(x.dtype).itemsize
                    + TB * 6 * dim * 4
                    + TB * f * dim * jnp.dtype(hidden_states.dtype).itemsize)
    scratch_bytes = TB * f * dim * (4 + 2 + 4)
    inter_bytes = 4 * TB * f * (8 * dim + 8 * inner_pad + 3 * ff_chunk)
    est = rep_bytes + chunk_bytes + io_bytes + scratch_bytes + inter_bytes + (8 << 20)
    vmem_limit = int(min(max(est, 32 << 20), cap - (4 << 20)))

    kernel = functools.partial(_block_kernel, heads=heads, head_dim=head_dim,
                               hd_pad=hd_pad, gelu_dtype=_gelu_compute_dtype(),
                               eps=1e-5)

    out = pl.pallas_call(
        kernel,
        out_shape=jax.ShapeDtypeStruct((Bp, f, dim), hidden_states.dtype),
        grid_spec=pltpu.PrefetchScalarGridSpec(
            num_scalar_prefetch=0,
            grid=grid,
            in_specs=[
                pl.BlockSpec((TB, f, dim), lambda i, c: (i, 0, 0)),    # x tile
                pl.BlockSpec((TB, 6, dim), lambda i, c: (i, 0, 0)),    # timestep tile
                pl.BlockSpec(sst.shape, lambda i, c: (0, 0)),          # scale_shift_table
                pl.BlockSpec(tpe.shape, lambda i, c: (0, 0)),          # temporal pos embed
                pl.BlockSpec(vec.shape, lambda i, c: (0, 0)),          # packed small vectors
                pl.BlockSpec(wqkv.shape, lambda i, c: (0, 0)),         # fused QKV weight
                pl.BlockSpec(wo_h.shape, lambda i, c: (0, 0, 0)),      # per-head out-proj
                pl.BlockSpec((dim, ff_chunk), lambda i, c: (0, c)),    # GEGLU hid weight chunk
                pl.BlockSpec((dim, ff_chunk), lambda i, c: (0, c)),    # GEGLU gate weight chunk
                pl.BlockSpec((2, ff_chunk), lambda i, c: (0, c)),      # GEGLU bias chunk
                pl.BlockSpec((ff_chunk, dim), lambda i, c: (c, 0)),    # FF out weight chunk
            ],
            out_specs=pl.BlockSpec((TB, f, dim), lambda i, c: (i, 0, 0)),
            scratch_shapes=[
                pltpu.VMEM((TB, f, dim), jnp.float32),    # h (post-attention residual)
                pltpu.VMEM((TB, f, dim), jnp.bfloat16),   # modulated norm2 activations
                pltpu.VMEM((TB, f, dim), jnp.float32),    # FF accumulator
            ]),
        compiler_params=pltpu.CompilerParams(
            dimension_semantics=("parallel", "arbitrary"),
            vmem_limit_bytes=vmem_limit),
    )(x, ts, sst, tpe, vec, wqkv, wo_h, wgh, wgg, bg2, w2)

    out = out[:B]
    # rearrange '(b p) f c -> (b f) p c'
    return out.reshape(b, num_patch, f, dim).transpose(0, 2, 1, 3).reshape(bf_, num_patch, dim)


def init_params(key, dim, heads, head_dim):
    inner = heads * head_dim
    ff_inner = 4 * dim
    ks = jax.random.split(key, 12)
    w = lambda k, shape, scale=0.02: jax.random.normal(k, shape, jnp.float32) * scale
    bf16 = lambda a: a.astype(jnp.bfloat16)
    return dict(
        scale_shift_table=jax.random.normal(ks[0], (6, dim), jnp.float32) / dim ** 0.5,
        ln1_w=jnp.ones((1, dim), jnp.float32),
        ln1_b=jnp.zeros((1, dim), jnp.float32),
        ln2_w=jnp.ones((1, dim), jnp.float32),
        ln2_b=jnp.zeros((1, dim), jnp.float32),
        wq=bf16(w(ks[1], (dim, inner))),
        wk=bf16(w(ks[2], (dim, inner))),
        wv=bf16(w(ks[3], (dim, inner))),
        wo=bf16(w(ks[4], (inner, dim))),
        bo=w(ks[5], (1, dim), 0.01),
        wg_hid=bf16(w(ks[6], (dim, ff_inner))),
        wg_gate=bf16(w(ks[7], (dim, ff_inner))),
        bg_hid=w(ks[8], (1, ff_inner), 0.01),
        bg_gate=w(ks[9], (1, ff_inner), 0.01),
        w2=bf16(w(ks[10], (ff_inner, dim))),
        b2=w(ks[11], (1, dim), 0.01),
    )


def reference_forward(hidden_states, timestep, temporal_pos_embed, num_frame,
                      params, *, heads, head_dim):
    bf_, num_patch, dim = hidden_states.shape
    f = num_frame
    b = bf_ // f
    B = b * num_patch
    f32 = lambda a: a.astype(jnp.float32)
    x = hidden_states.reshape(b, f, num_patch, dim).transpose(0, 2, 1, 3).reshape(B, f, dim)
    x = f32(x)
    mod = params['scale_shift_table'][None] + timestep.reshape(B, 6, dim)
    shift_msa, scale_msa, gate_msa = mod[:, 0:1], mod[:, 1:2], mod[:, 2:3]
    shift_mlp, scale_mlp, gate_mlp = mod[:, 3:4], mod[:, 4:5], mod[:, 5:6]

    def ln(h, w, bias):
        mu = h.mean(-1, keepdims=True)
        var = ((h - mu) ** 2).mean(-1, keepdims=True)
        return (h - mu) / jnp.sqrt(var + 1e-5) * w + bias

    nh = ln(x + temporal_pos_embed, params['ln1_w'], params['ln1_b'])
    nh = nh * (1 + scale_msa) + shift_msa
    q = nh @ f32(params['wq'])
    k = nh @ f32(params['wk'])
    v = nh @ f32(params['wv'])
    qh = q.reshape(B, f, heads, head_dim).transpose(0, 2, 1, 3)
    kh = k.reshape(B, f, heads, head_dim).transpose(0, 2, 1, 3)
    vh = v.reshape(B, f, heads, head_dim).transpose(0, 2, 1, 3)
    s = jnp.einsum('bhqd,bhkd->bhqk', qh, kh) * head_dim ** -0.5
    p = jax.nn.softmax(s, axis=-1)
    a = jnp.einsum('bhqk,bhkd->bhqd', p, vh).transpose(0, 2, 1, 3).reshape(B, f, heads * head_dim)
    attn = a @ f32(params['wo']) + params['bo']
    x = x + gate_msa * attn
    nh2 = ln(x, params['ln2_w'], params['ln2_b']) * (1 + scale_mlp) + shift_mlp
    hid = nh2 @ f32(params['wg_hid']) + params['bg_hid']
    gate = nh2 @ f32(params['wg_gate']) + params['bg_gate']
    ff = (hid * jax.nn.gelu(gate, approximate=False)) @ f32(params['w2']) + params['b2']
    x = x + gate_mlp * ff
    return x.reshape(b, num_patch, f, dim).transpose(0, 2, 1, 3).reshape(bf_, num_patch, dim)


if __name__ == "__main__":
    dim, heads, head_dim = 32, 2, 16
    b, f, p = 2, 8, 16

    key = jax.random.PRNGKey(0)
    kp, kx, kt, ke = jax.random.split(key, 4)
    params = init_params(kp, dim, heads, head_dim)

    hidden_states = jax.random.normal(kx, (b * f, p, dim), jnp.float32)
    timestep = jax.random.normal(kt, (b * p, 6 * dim), jnp.float32)
    temporal_pos_embed = jax.random.normal(ke, (f, dim), jnp.float32) * 0.02

    out = temporal_transformer_block(hidden_states, timestep, temporal_pos_embed, f,
                                     params, heads=heads, head_dim=head_dim)
    out = jax.block_until_ready(out)

    ref = reference_forward(hidden_states, timestep, temporal_pos_embed, f,
                            params, heads=heads, head_dim=head_dim)
    assert out.shape == hidden_states.shape
    err = float(jnp.max(jnp.abs(out - ref)))
    assert jnp.allclose(out, ref, atol=5e-3, rtol=5e-3), err
    print("KERNEL_OK")
</pallas_src>

<mosaic_0001>
module attributes {stable_mosaic.version = 11 : i64} {
  func.func @_block_kernel(%arg0: i32, %arg1: i32, %arg2: memref<16x8x32xf32, #tpu.memory_space<vmem>>, %arg3: memref<16x6x32xf32, #tpu.memory_space<vmem>>, %arg4: memref<6x32xf32, #tpu.memory_space<vmem>>, %arg5: memref<8x32xf32, #tpu.memory_space<vmem>>, %arg6: memref<8x32xf32, #tpu.memory_space<vmem>>, %arg7: memref<32x768xbf16, #tpu.memory_space<vmem>>, %arg8: memref<2x128x32xbf16, #tpu.memory_space<vmem>>, %arg9: memref<32x128xbf16, #tpu.memory_space<vmem>>, %arg10: memref<32x128xbf16, #tpu.memory_space<vmem>>, %arg11: memref<2x128xf32, #tpu.memory_space<vmem>>, %arg12: memref<128x32xbf16, #tpu.memory_space<vmem>>, %arg13: memref<16x8x32xf32, #tpu.memory_space<vmem>>, %arg14: memref<16x8x32xf32, #tpu.memory_space<vmem>>, %arg15: memref<16x8x32xbf16, #tpu.memory_space<vmem>>, %arg16: memref<16x8x32xf32, #tpu.memory_space<vmem>>) attributes {dimension_semantics = [#tpu.dimension_semantics<parallel>, #tpu.dimension_semantics<arbitrary>], iteration_bounds = array<i64: 2, 1>, scalar_prefetch = 0 : i64, scratch_operands = 3 : i64, tpu.core_type = #tpu.core_type<tc>, window_params = [{transform_indices = @transform_0, window_bounds = array<i64: 16, 8, 32>}, {transform_indices = @transform_1, window_bounds = array<i64: 16, 6, 32>}, {pipeline_mode = #tpu.pipeline_mode<synchronous>, transform_indices = @transform_2, window_bounds = array<i64: 6, 32>}, {pipeline_mode = #tpu.pipeline_mode<synchronous>, transform_indices = @transform_3, window_bounds = array<i64: 8, 32>}, {pipeline_mode = #tpu.pipeline_mode<synchronous>, transform_indices = @transform_4, window_bounds = array<i64: 8, 32>}, {pipeline_mode = #tpu.pipeline_mode<synchronous>, transform_indices = @transform_5, window_bounds = array<i64: 32, 768>}, {pipeline_mode = #tpu.pipeline_mode<synchronous>, transform_indices = @transform_6, window_bounds = array<i64: 2, 128, 32>}, {transform_indices = @transform_7, window_bounds = array<i64: 32, 128>}, {transform_indices = @transform_8, window_bounds = array<i64: 32, 128>}, {transform_indices = @transform_9, window_bounds = array<i64: 2, 128>}, {transform_indices = @transform_10, window_bounds = array<i64: 128, 32>}, {transform_indices = @transform_11, window_bounds = array<i64: 16, 8, 32>}]} {
    %c0 = arith.constant 0 : index
    %c0_0 = arith.constant 0 : index
    %0 = vector.load %arg6[%c0, %c0_0] : memref<8x32xf32, #tpu.memory_space<vmem>>, vector<8x32xf32>
    %1 = vector.extract_strided_slice %0 {offsets = [0, 0], sizes = [1, 32], strides = [1, 1]} : vector<8x32xf32> to vector<1x32xf32>
    %2 = vector.extract_strided_slice %0 {offsets = [1, 0], sizes = [1, 32], strides = [1, 1]} : vector<8x32xf32> to vector<1x32xf32>
    %3 = vector.extract_strided_slice %0 {offsets = [2, 0], sizes = [1, 32], strides = [1, 1]} : vector<8x32xf32> to vector<1x32xf32>
    %4 = vector.extract_strided_slice %0 {offsets = [3, 0], sizes = [1, 32], strides = [1, 1]} : vector<8x32xf32> to vector<1x32xf32>
    %5 = vector.extract_strided_slice %0 {offsets = [4, 0], sizes = [1, 32], strides = [1, 1]} : vector<8x32xf32> to vector<1x32xf32>
    %6 = vector.extract_strided_slice %0 {offsets = [5, 0], sizes = [1, 32], strides = [1, 1]} : vector<8x32xf32> to vector<1x32xf32>
    %c0_1 = arith.constant 0 : index
    %c0_2 = arith.constant 0 : index
    %c0_3 = arith.constant 0 : index
    %7 = vector.load %arg3[%c0_1, %c0_2, %c0_3] : memref<16x6x32xf32, #tpu.memory_space<vmem>>, vector<16x6x32xf32>
    %c0_4 = arith.constant 0 : index
    %c0_5 = arith.constant 0 : index
    %8 = vector.load %arg4[%c0_4, %c0_5] : memref<6x32xf32, #tpu.memory_space<vmem>>, vector<6x32xf32>
    %9 = vector.shape_cast %8 : vector<6x32xf32> to vector<1x6x32xf32>
    %10 = vector.broadcast %9 : vector<1x6x32xf32> to vector<16x6x32xf32>
    %11 = arith.addf %7, %10 : vector<16x6x32xf32>
    %12 = vector.extract_strided_slice %11 {offsets = [0, 0, 0], sizes = [16, 1, 32], strides = [1, 1, 1]} : vector<16x6x32xf32> to vector<16x1x32xf32>
    %13 = vector.extract_strided_slice %11 {offsets = [0, 1, 0], sizes = [16, 1, 32], strides = [1, 1, 1]} : vector<16x6x32xf32> to vector<16x1x32xf32>
    %14 = vector.extract_strided_slice %11 {offsets = [0, 2, 0], sizes = [16, 1, 32], strides = [1, 1, 1]} : vector<16x6x32xf32> to vector<16x1x32xf32>
    %15 = vector.extract_strided_slice %11 {offsets = [0, 3, 0], sizes = [16, 1, 32], strides = [1, 1, 1]} : vector<16x6x32xf32> to vector<16x1x32xf32>
    %16 = vector.extract_strided_slice %11 {offsets = [0, 4, 0], sizes = [16, 1, 32], strides = [1, 1, 1]} : vector<16x6x32xf32> to vector<16x1x32xf32>
    %17 = vector.extract_strided_slice %11 {offsets = [0, 5, 0], sizes = [16, 1, 32], strides = [1, 1, 1]} : vector<16x6x32xf32> to vector<16x1x32xf32>
    %c0_i32 = arith.constant 0 : i32
    %18 = arith.cmpi eq, %arg1, %c0_i32 : i32
    %19 = arith.extui %18 : i1 to i32
    %c0_i32_6 = arith.constant 0 : i32
    %20 = arith.cmpi ne, %19, %c0_i32_6 : i32
    scf.if %20 {
      %c0_45 = arith.constant 0 : index
      %c0_46 = arith.constant 0 : index
      %c0_47 = arith.constant 0 : index
      %91 = vector.load %arg2[%c0_45, %c0_46, %c0_47] : memref<16x8x32xf32, #tpu.memory_space<vmem>>, vector<16x8x32xf32>
      %c0_48 = arith.constant 0 : index
      %c0_49 = arith.constant 0 : index
      %92 = vector.load %arg5[%c0_48, %c0_49] : memref<8x32xf32, #tpu.memory_space<vmem>>, vector<8x32xf32>
      %93 = vector.shape_cast %92 : vector<8x32xf32> to vector<1x8x32xf32>
      %94 = vector.broadcast %93 : vector<1x8x32xf32> to vector<16x8x32xf32>
      %95 = arith.addf %91, %94 : vector<16x8x32xf32>
      %cst_50 = arith.constant dense<0.000000e+00> : vector<16x8xf32>
      %96 = vector.multi_reduction <add>, %95, %cst_50 [2] : vector<16x8x32xf32> to vector<16x8xf32>
      %97 = vector.shape_cast %96 : vector<16x8xf32> to vector<16x8x1xf32>
      %cst_51 = arith.constant 3.200000e+01 : f32
      %98 = vector.broadcast %cst_51 : f32 to vector<16x8x1xf32>
      %99 = arith.divf %97, %98 : vector<16x8x1xf32>
      %100 = vector.broadcast %99 : vector<16x8x1xf32> to vector<16x8x32xf32>
      %101 = arith.subf %95, %100 : vector<16x8x32xf32>
      %102 = arith.mulf %101, %101 : vector<16x8x32xf32>
      %cst_52 = arith.constant dense<0.000000e+00> : vector<16x8xf32>
      %103 = vector.multi_reduction <add>, %102, %cst_52 [2] : vector<16x8x32xf32> to vector<16x8xf32>
      %104 = vector.shape_cast %103 : vector<16x8xf32> to vector<16x8x1xf32>
      %cst_53 = arith.constant 3.200000e+01 : f32
      %105 = vector.broadcast %cst_53 : f32 to vector<16x8x1xf32>
      %106 = arith.divf %104, %105 : vector<16x8x1xf32>
      %107 = vector.broadcast %99 : vector<16x8x1xf32> to vector<16x8x32xf32>
      %108 = arith.subf %95, %107 : vector<16x8x32xf32>
      %cst_54 = arith.constant 9.99999974E-6 : f32
      %109 = vector.broadcast %cst_54 : f32 to vector<16x8x1xf32>
      %110 = arith.addf %106, %109 : vector<16x8x1xf32>
      %111 = math.rsqrt %110 : vector<16x8x1xf32>
      %112 = vector.broadcast %111 : vector<16x8x1xf32> to vector<16x8x32xf32>
      %113 = arith.mulf %108, %112 : vector<16x8x32xf32>
      %114 = vector.shape_cast %1 : vector<1x32xf32> to vector<1x1x32xf32>
      %115 = vector.broadcast %114 : vector<1x1x32xf32> to vector<16x8x32xf32>
      %116 = arith.mulf %113, %115 : vector<16x8x32xf32>
      %117 = vector.shape_cast %2 : vector<1x32xf32> to vector<1x1x32xf32>
      %118 = vector.broadcast %117 : vector<1x1x32xf32> to vector<16x8x32xf32>
      %119 = arith.addf %116, %118 : vector<16x8x32xf32>
      %cst_55 = arith.constant 1.000000e+00 : f32
      %120 = vector.broadcast %cst_55 : f32 to vector<16x1x32xf32>
      %121 = arith.addf %120, %13 : vector<16x1x32xf32>
      %122 = vector.broadcast %121 : vector<16x1x32xf32> to vector<16x8x32xf32>
      %123 = arith.mulf %119, %122 : vector<16x8x32xf32>
      %124 = vector.broadcast %12 : vector<16x1x32xf32> to vector<16x8x32xf32>
      %125 = arith.addf %123, %124 : vector<16x8x32xf32>
      %126 = vector.shape_cast %125 : vector<16x8x32xf32> to vector<128x32xf32>
      %127 = arith.truncf %126 : vector<128x32xf32> to vector<128x32xbf16>
      %c0_56 = arith.constant 0 : index
      %c0_57 = arith.constant 0 : index
      %128 = vector.load %arg7[%c0_56, %c0_57] : memref<32x768xbf16, #tpu.memory_space<vmem>>, vector<32x768xbf16>
      %cst_58 = arith.constant dense<0.000000e+00> : vector<128x768xf32>
      %129 = tpu.matmul %127, %128, %cst_58 {dimension_numbers = #tpu.dot_dimension_numbers<[1], [0], [0], [1], [0, 0, 1, 1], [], []>} : vector<128x32xbf16>, vector<32x768xbf16>, vector<128x768xf32> -> vector<128x768xf32>
      %130 = vector.extract_strided_slice %129 {offsets = [0, 0], sizes = [128, 256], strides = [1, 1]} : vector<128x768xf32> to vector<128x256xf32>
      %131 = arith.truncf %130 : vector<128x256xf32> to vector<128x256xbf16>
      %132 = vector.shape_cast %131 : vector<128x256xbf16> to vector<16x8x256xbf16>
      %133 = vector.extract_strided_slice %129 {offsets = [0, 256], sizes = [128, 256], strides = [1, 1]} : vector<128x768xf32> to vector<128x256xf32>
      %134 = arith.truncf %133 : vector<128x256xf32> to vector<128x256xbf16>
      %135 = vector.shape_cast %134 : vector<128x256xbf16> to vector<16x8x256xbf16>
      %136 = vector.extract_strided_slice %129 {offsets = [0, 512], sizes = [128, 256], strides = [1, 1]} : vector<128x768xf32> to vector<128x256xf32>
      %137 = arith.truncf %136 : vector<128x256xf32> to vector<128x256xbf16>
      %138 = vector.shape_cast %137 : vector<128x256xbf16> to vector<16x8x256xbf16>
      %cst_59 = arith.constant 0.000000e+00 : f32
      %139 = vector.broadcast %cst_59 : f32 to vector<128x32xf32>
      %140 = vector.extract_strided_slice %132 {offsets = [0, 0, 0], sizes = [16, 8, 128], strides = [1, 1, 1]} : vector<16x8x256xbf16> to vector<16x8x128xbf16>
      %141 = vector.extract_strided_slice %135 {offsets = [0, 0, 0], sizes = [16, 8, 128], strides = [1, 1, 1]} : vector<16x8x256xbf16> to vector<16x8x128xbf16>
      %142 = vector.extract_strided_slice %138 {offsets = [0, 0, 0], sizes = [16, 8, 128], strides = [1, 1, 1]} : vector<16x8x256xbf16> to vector<16x8x128xbf16>
      "tpu.trace_start"() <{level = 10 : i32, message = "bqd,bkd->bqk"}> : () -> ()
      %cst_60 = arith.constant dense<0.000000e+00> : vector<16x8x8xf32>
      %143 = tpu.matmul %140, %141, %cst_60 {dimension_numbers = #tpu.dot_dimension_numbers<[2], [2], [1], [1], [0, 0, 0, 1, 1, 1], [0], [0]>} : vector<16x8x128xbf16>, vector<16x8x128xbf16>, vector<16x8x8xf32> -> vector<16x8x8xf32>
      "tpu.trace_stop"() : () -> ()
      %cst_61 = arith.constant 2.500000e-01 : f32
      %144 = vector.broadcast %cst_61 : f32 to vector<16x8x8xf32>
      %145 = arith.mulf %143, %144 : vector<16x8x8xf32>
      %cst_62 = arith.constant dense<0xFF800000> : vector<16x8xf32>
      %146 = vector.multi_reduction <maximumf>, %145, %cst_62 [2] : vector<16x8x8xf32> to vector<16x8xf32>
      %147 = vector.shape_cast %146 : vector<16x8xf32> to vector<16x8x1xf32>
      %148 = vector.broadcast %147 : vector<16x8x1xf32> to vector<16x8x8xf32>
      %149 = arith.subf %145, %148 : vector<16x8x8xf32>
      %150 = math.exp %149 : vector<16x8x8xf32>
      %cst_63 = arith.constant dense<0.000000e+00> : vector<16x8xf32>
      %151 = vector.multi_reduction <add>, %150, %cst_63 [2] : vector<16x8x8xf32> to vector<16x8xf32>
      %152 = vector.shape_cast %151 : vector<16x8xf32> to vector<16x8x1xf32>
      %153 = tpu.reciprocal %152 {approx = true} : vector<16x8x1xf32> -> vector<16x8x1xf32>
      %154 = vector.broadcast %153 : vector<16x8x1xf32> to vector<16x8x8xf32>
      %155 = arith.mulf %150, %154 : vector<16x8x8xf32>
      %156 = arith.truncf %155 : vector<16x8x8xf32> to vector<16x8x8xbf16>
      "tpu.trace_start"() <{level = 10 : i32, message = "bqk,bkd->bqd"}> : () -> ()
      %cst_64 = arith.constant dense<0.000000e+00> : vector<16x8x128xf32>
      %157 = tpu.matmul %156, %142, %cst_64 {dimension_numbers = #tpu.dot_dimension_numbers<[2], [1], [1], [2], [0, 0, 0, 1, 1, 2], [0], [0]>} : vector<16x8x8xbf16>, vector<16x8x128xbf16>, vector<16x8x128xf32> -> vector<16x8x128xf32>
      "tpu.trace_stop"() : () -> ()
      %158 = vector.shape_cast %157 : vector<16x8x128xf32> to vector<128x128xf32>
      %159 = arith.truncf %158 : vector<128x128xf32> to vector<128x128xbf16>
      %c0_65 = arith.constant 0 : index
      %c0_66 = arith.constant 0 : index
      %c0_67 = arith.constant 0 : index
      %160 = vector.load %arg8[%c0_65, %c0_66, %c0_67] : memref<2x128x32xbf16, #tpu.memory_space<vmem>>, vector<1x128x32xbf16>
      %161 = vector.shape_cast %160 : vector<1x128x32xbf16> to vector<128x32xbf16>
      %cst_68 = arith.constant dense<0.000000e+00> : vector<128x32xf32>
      %162 = tpu.matmul %159, %161, %cst_68 {dimension_numbers = #tpu.dot_dimension_numbers<[1], [0], [0], [1], [0, 0, 1, 1], [], []>} : vector<128x128xbf16>, vector<128x32xbf16>, vector<128x32xf32> -> vector<128x32xf32>
      %163 = arith.addf %139, %162 : vector<128x32xf32>
      %164 = vector.extract_strided_slice %132 {offsets = [0, 0, 128], sizes = [16, 8, 128], strides = [1, 1, 1]} : vector<16x8x256xbf16> to vector<16x8x128xbf16>
      %165 = vector.extract_strided_slice %135 {offsets = [0, 0, 128], sizes = [16, 8, 128], strides = [1, 1, 1]} : vector<16x8x256xbf16> to vector<16x8x128xbf16>
      %166 = vector.extract_strided_slice %138 {offsets = [0, 0, 128], sizes = [16, 8, 128], strides = [1, 1, 1]} : vector<16x8x256xbf16> to vector<16x8x128xbf16>
      "tpu.trace_start"() <{level = 10 : i32, message = "bqd,bkd->bqk"}> : () -> ()
      %cst_69 = arith.constant dense<0.000000e+00> : vector<16x8x8xf32>
      %167 = tpu.matmul %164, %165, %cst_69 {dimension_numbers = #tpu.dot_dimension_numbers<[2], [2], [1], [1], [0, 0, 0, 1, 1, 1], [0], [0]>} : vector<16x8x128xbf16>, vector<16x8x128xbf16>, vector<16x8x8xf32> -> vector<16x8x8xf32>
      "tpu.trace_stop"() : () -> ()
      %cst_70 = arith.constant 2.500000e-01 : f32
      %168 = vector.broadcast %cst_70 : f32 to vector<16x8x8xf32>
      %169 = arith.mulf %167, %168 : vector<16x8x8xf32>
      %cst_71 = arith.constant dense<0xFF800000> : vector<16x8xf32>
      %170 = vector.multi_reduction <maximumf>, %169, %cst_71 [2] : vector<16x8x8xf32> to vector<16x8xf32>
      %171 = vector.shape_cast %170 : vector<16x8xf32> to vector<16x8x1xf32>
      %172 = vector.broadcast %171 : vector<16x8x1xf32> to vector<16x8x8xf32>
      %173 = arith.subf %169, %172 : vector<16x8x8xf32>
      %174 = math.exp %173 : vector<16x8x8xf32>
      %cst_72 = arith.constant dense<0.000000e+00> : vector<16x8xf32>
      %175 = vector.multi_reduction <add>, %174, %cst_72 [2] : vector<16x8x8xf32> to vector<16x8xf32>
      %176 = vector.shape_cast %175 : vector<16x8xf32> to vector<16x8x1xf32>
      %177 = tpu.reciprocal %176 {approx = true} : vector<16x8x1xf32> -> vector<16x8x1xf32>
      %178 = vector.broadcast %177 : vector<16x8x1xf32> to vector<16x8x8xf32>
      %179 = arith.mulf %174, %178 : vector<16x8x8xf32>
      %180 = arith.truncf %179 : vector<16x8x8xf32> to vector<16x8x8xbf16>
      "tpu.trace_start"() <{level = 10 : i32, message = "bqk,bkd->bqd"}> : () -> ()
      %cst_73 = arith.constant dense<0.000000e+00> : vector<16x8x128xf32>
      %181 = tpu.matmul %180, %166, %cst_73 {dimension_numbers = #tpu.dot_dimension_numbers<[2], [1], [1], [2], [0, 0, 0, 1, 1, 2], [0], [0]>} : vector<16x8x8xbf16>, vector<16x8x128xbf16>, vector<16x8x128xf32> -> vector<16x8x128xf32>
      "tpu.trace_stop"() : () -> ()
      %182 = vector.shape_cast %181 : vector<16x8x128xf32> to vector<128x128xf32>
      %183 = arith.truncf %182 : vector<128x128xf32> to vector<128x128xbf16>
      %c1_74 = arith.constant 1 : index
      %c0_75 = arith.constant 0 : index
      %c0_76 = arith.constant 0 : index
      %184 = vector.load %arg8[%c1_74, %c0_75, %c0_76] : memref<2x128x32xbf16, #tpu.memory_space<vmem>>, vector<1x128x32xbf16>
      %185 = vector.shape_cast %184 : vector<1x128x32xbf16> to vector<128x32xbf16>
      %cst_77 = arith.constant dense<0.000000e+00> : vector<128x32xf32>
      %186 = tpu.matmul %183, %185, %cst_77 {dimension_numbers = #tpu.dot_dimension_numbers<[1], [0], [0], [1], [0, 0, 1, 1], [], []>} : vector<128x128xbf16>, vector<128x32xbf16>, vector<128x32xf32> -> vector<128x32xf32>
      %187 = arith.addf %163, %186 : vector<128x32xf32>
      %188 = vector.shape_cast %187 : vector<128x32xf32> to vector<16x8x32xf32>
      %189 = vector.shape_cast %5 : vector<1x32xf32> to vector<1x1x32xf32>
      %190 = vector.broadcast %189 : vector<1x1x32xf32> to vector<16x8x32xf32>
      %191 = arith.addf %188, %190 : vector<16x8x32xf32>
      %192 = vector.broadcast %14 : vector<16x1x32xf32> to vector<16x8x32xf32>
      %193 = arith.mulf %192, %191 : vector<16x8x32xf32>
      %194 = arith.addf %91, %193 : vector<16x8x32xf32>
      %c0_78 = arith.constant 0 : index
      %c0_79 = arith.constant 0 : index
      %c0_80 = arith.constant 0 : index
      %195 = vector.load %arg14[%c0_78, %c0_79, %c0_80] : memref<16x8x32xf32, #tpu.memory_space<vmem>>, vector<16x8x32xf32>
      tpu.vector_store %arg14[%c0_78, %c0_79, %c0_80], %194 {strides = array<i32>} : memref<16x8x32xf32, #tpu.memory_space<vmem>>, vector<16x8x32xf32>,
      %cst_81 = arith.constant dense<0.000000e+00> : vector<16x8xf32>
      %196 = vector.multi_reduction <add>, %194, %cst_81 [2] : vector<16x8x32xf32> to vector<16x8xf32>
      %197 = vector.shape_cast %196 : vector<16x8xf32> to vector<16x8x1xf32>
      %cst_82 = arith.constant 3.200000e+01 : f32
      %198 = vector.broadcast %cst_82 : f32 to vector<16x8x1xf32>
      %199 = arith.divf %197, %198 : vector<16x8x1xf32>
      %200 = vector.broadcast %199 : vector<16x8x1xf32> to vector<16x8x32xf32>
      %201 = arith.subf %194, %200 : vector<16x8x32xf32>
      %202 = arith.mulf %201, %201 : vector<16x8x32xf32>
      %cst_83 = arith.constant dense<0.000000e+00> : vector<16x8xf32>
      %203 = vector.multi_reduction <add>, %202, %cst_83 [2] : vector<16x8x32xf32> to vector<16x8xf32>
      %204 = vector.shape_cast %203 : vector<16x8xf32> to vector<16x8x1xf32>
      %cst_84 = arith.constant 3.200000e+01 : f32
      %205 = vector.broadcast %cst_84 : f32 to vector<16x8x1xf32>
      %206 = arith.divf %204, %205 : vector<16x8x1xf32>
      %207 = vector.broadcast %199 : vector<16x8x1xf32> to vector<16x8x32xf32>
      %208 = arith.subf %194, %207 : vector<16x8x32xf32>
      %cst_85 = arith.constant 9.99999974E-6 : f32
      %209 = vector.broadcast %cst_85 : f32 to vector<16x8x1xf32>
      %210 = arith.addf %206, %209 : vector<16x8x1xf32>
      %211 = math.rsqrt %210 : vector<16x8x1xf32>
      %212 = vector.broadcast %211 : vector<16x8x1xf32> to vector<16x8x32xf32>
      %213 = arith.mulf %208, %212 : vector<16x8x32xf32>
      %214 = vector.shape_cast %3 : vector<1x32xf32> to vector<1x1x32xf32>
      %215 = vector.broadcast %214 : vector<1x1x32xf32> to vector<16x8x32xf32>
      %216 = arith.mulf %213, %215 : vector<16x8x32xf32>
      %217 = vector.shape_cast %4 : vector<1x32xf32> to vector<1x1x32xf32>
      %218 = vector.broadcast %217 : vector<1x1x32xf32> to vector<16x8x32xf32>
      %219 = arith.addf %216, %218 : vector<16x8x32xf32>
      %cst_86 = arith.constant 1.000000e+00 : f32
      %220 = vector.broadcast %cst_86 : f32 to vector<16x1x32xf32>
      %221 = arith.addf %220, %16 : vector<16x1x32xf32>
      %222 = vector.broadcast %221 : vector<16x1x32xf32> to vector<16x8x32xf32>
      %223 = arith.mulf %219, %222 : vector<16x8x32xf32>
      %224 = vector.broadcast %15 : vector<16x1x32xf32> to vector<16x8x32xf32>
      %225 = arith.addf %223, %224 : vector<16x8x32xf32>
      %226 = arith.truncf %225 : vector<16x8x32xf32> to vector<16x8x32xbf16>
      %c0_87 = arith.constant 0 : index
      %c0_88 = arith.constant 0 : index
      %c0_89 = arith.constant 0 : index
      %227 = vector.load %arg15[%c0_87, %c0_88, %c0_89] : memref<16x8x32xbf16, #tpu.memory_space<vmem>>, vector<16x8x32xbf16>
      tpu.vector_store %arg15[%c0_87, %c0_88, %c0_89], %226 {strides = array<i32>} : memref<16x8x32xbf16, #tpu.memory_space<vmem>>, vector<16x8x32xbf16>,
      %cst_90 = arith.constant 0.000000e+00 : f32
      %228 = vector.broadcast %cst_90 : f32 to vector<16x8x32xf32>
      %c0_91 = arith.constant 0 : index
      %c0_92 = arith.constant 0 : index
      %c0_93 = arith.constant 0 : index
      %229 = vector.load %arg16[%c0_91, %c0_92, %c0_93] : memref<16x8x32xf32, #tpu.memory_space<vmem>>, vector<16x8x32xf32>
      tpu.vector_store %arg16[%c0_91, %c0_92, %c0_93], %228 {strides = array<i32>} : memref<16x8x32xf32, #tpu.memory_space<vmem>>, vector<16x8x32xf32>,
    } else {
    }
    %c0_7 = arith.constant 0 : index
    %c0_8 = arith.constant 0 : index
    %c0_9 = arith.constant 0 : index
    %21 = vector.load %arg15[%c0_7, %c0_8, %c0_9] : memref<16x8x32xbf16, #tpu.memory_space<vmem>>, vector<16x8x32xbf16>
    %22 = vector.shape_cast %21 : vector<16x8x32xbf16> to vector<128x32xbf16>
    %c0_10 = arith.constant 0 : index
    %c0_11 = arith.constant 0 : index
    %23 = vector.load %arg9[%c0_10, %c0_11] : memref<32x128xbf16, #tpu.memory_space<vmem>>, vector<32x128xbf16>
    %cst = arith.constant dense<0.000000e+00> : vector<128x128xf32>
    %24 = tpu.matmul %22, %23, %cst {dimension_numbers = #tpu.dot_dimension_numbers<[1], [0], [0], [1], [0, 0, 1, 1], [], []>} : vector<128x32xbf16>, vector<32x128xbf16>, vector<128x128xf32> -> vector<128x128xf32>
    %c0_12 = arith.constant 0 : index
    %c0_13 = arith.constant 0 : index
    %25 = vector.load %arg11[%c0_12, %c0_13] : memref<2x128xf32, #tpu.memory_space<vmem>>, vector<1x128xf32>
    %26 = vector.broadcast %25 : vector<1x128xf32> to vector<128x128xf32>
    %27 = arith.addf %24, %26 : vector<128x128xf32>
    %c0_14 = arith.constant 0 : index
    %c0_15 = arith.constant 0 : index
    %28 = vector.load %arg10[%c0_14, %c0_15] : memref<32x128xbf16, #tpu.memory_space<vmem>>, vector<32x128xbf16>
    %cst_16 = arith.constant dense<0.000000e+00> : vector<128x128xf32>
    %29 = tpu.matmul %22, %28, %cst_16 {dimension_numbers = #tpu.dot_dimension_numbers<[1], [0], [0], [1], [0, 0, 1, 1], [], []>} : vector<128x32xbf16>, vector<32x128xbf16>, vector<128x128xf32> -> vector<128x128xf32>
    %c1 = arith.constant 1 : index
    %c0_17 = arith.constant 0 : index
    %30 = vector.load %arg11[%c1, %c0_17] : memref<2x128xf32, #tpu.memory_space<vmem>>, vector<1x128xf32>
    %31 = vector.broadcast %30 : vector<1x128xf32> to vector<128x128xf32>
    %32 = arith.addf %29, %31 : vector<128x128xf32>
    %33 = arith.truncf %32 : vector<128x128xf32> to vector<128x128xbf16>
    %cst_18 = arith.constant 5.000000e-01 : bf16
    %34 = vector.broadcast %cst_18 : bf16 to vector<128x128xbf16>
    %35 = arith.mulf %34, %33 : vector<128x128xbf16>
    %cst_19 = arith.constant 7.070310e-01 : bf16
    %36 = vector.broadcast %cst_19 : bf16 to vector<128x128xbf16>
    %37 = arith.mulf %33, %36 : vector<128x128xbf16>
    %cst_20 = arith.constant 0.000000e+00 : bf16
    %38 = vector.broadcast %cst_20 : bf16 to vector<128x128xbf16>
    %39 = arith.cmpf oge, %37, %38 : vector<128x128xbf16>
    %cst_21 = arith.constant 0.000000e+00 : bf16
    %cst_22 = arith.constant 1.000000e+00 : bf16
    %40 = arith.subf %cst_21, %cst_22 : bf16
    %cst_23 = arith.constant 1.000000e+00 : bf16
    %41 = vector.broadcast %cst_23 : bf16 to vector<128x128xbf16>
    %42 = vector.broadcast %40 : bf16 to vector<128x128xbf16>
    %43 = arith.select %39, %41, %42 : vector<128x128xi1>, vector<128x128xbf16>
    %44 = math.absf %37 : vector<128x128xbf16>
    %cst_24 = arith.constant 3.281250e-01 : bf16
    %45 = vector.broadcast %cst_24 : bf16 to vector<128x128xbf16>
    %46 = arith.mulf %45, %44 : vector<128x128xbf16>
    %cst_25 = arith.constant 1.000000e+00 : bf16
    %47 = vector.broadcast %cst_25 : bf16 to vector<128x128xbf16>
    %48 = arith.addf %47, %46 : vector<128x128xbf16>
    %49 = arith.extf %48 : vector<128x128xbf16> to vector<128x128xf32>
    %50 = tpu.reciprocal %49 {approx = true} : vector<128x128xf32> -> vector<128x128xf32>
    %51 = arith.truncf %50 : vector<128x128xf32> to vector<128x128xbf16>
    %cst_26 = arith.constant 1.062500e+00 : bf16
    %52 = vector.broadcast %cst_26 : bf16 to vector<128x128xbf16>
    %53 = arith.mulf %52, %51 : vector<128x128xbf16>
    %cst_27 = arith.constant -1.453130e+00 : bf16
    %54 = vector.broadcast %cst_27 : bf16 to vector<128x128xbf16>
    %55 = arith.addf %53, %54 : vector<128x128xbf16>
    %56 = arith.mulf %55, %51 : vector<128x128xbf16>
    %cst_28 = arith.constant 1.421880e+00 : bf16
    %57 = vector.broadcast %cst_28 : bf16 to vector<128x128xbf16>
    %58 = arith.addf %56, %57 : vector<128x128xbf16>
    %59 = arith.mulf %58, %51 : vector<128x128xbf16>
    %cst_29 = arith.constant -2.851560e-01 : bf16
    %60 = vector.broadcast %cst_29 : bf16 to vector<128x128xbf16>
    %61 = arith.addf %59, %60 : vector<128x128xbf16>
    %62 = arith.mulf %61, %51 : vector<128x128xbf16>
    %cst_30 = arith.constant 2.539060e-01 : bf16
    %63 = vector.broadcast %cst_30 : bf16 to vector<128x128xbf16>
    %64 = arith.addf %62, %63 : vector<128x128xbf16>
    %65 = arith.mulf %64, %51 : vector<128x128xbf16>
    %66 = arith.extf %44 : vector<128x128xbf16> to vector<128x128xf32>
    %cst_31 = arith.constant 0.000000e+00 : f32
    %67 = vector.broadcast %cst_31 : f32 to vector<128x128xf32>
    %68 = arith.subf %67, %66 : vector<128x128xf32>
    %69 = arith.mulf %68, %66 : vector<128x128xf32>
    %70 = math.exp %69 : vector<128x128xf32>
    %71 = arith.truncf %70 : vector<128x128xf32> to vector<128x128xbf16>
    %72 = arith.mulf %65, %71 : vector<128x128xbf16>
    %cst_32 = arith.constant 1.000000e+00 : bf16
    %73 = vector.broadcast %cst_32 : bf16 to vector<128x128xbf16>
    %74 = arith.subf %73, %72 : vector<128x128xbf16>
    %75 = arith.mulf %43, %74 : vector<128x128xbf16>
    %cst_33 = arith.constant 1.000000e+00 : bf16
    %76 = vector.broadcast %cst_33 : bf16 to vector<128x128xbf16>
    %77 = arith.addf %76, %75 : vector<128x128xbf16>
    %78 = arith.mulf %35, %77 : vector<128x128xbf16>
    %79 = arith.extf %78 : vector<128x128xbf16> to vector<128x128xf32>
    %80 = arith.mulf %27, %79 : vector<128x128xf32>
    %81 = arith.truncf %80 : vector<128x128xf32> to vector<128x128xbf16>
    %c0_34 = arith.constant 0 : index
    %c0_35 = arith.constant 0 : index
    %c0_36 = arith.constant 0 : index
    %82 = vector.load %arg16[%c0_34, %c0_35, %c0_36] : memref<16x8x32xf32, #tpu.memory_space<vmem>>, vector<16x8x32xf32>
    %c0_37 = arith.constant 0 : index
    %c0_38 = arith.constant 0 : index
    %83 = vector.load %arg12[%c0_37, %c0_38] : memref<128x32xbf16, #tpu.memory_space<vmem>>, vector<128x32xbf16>
    %cst_39 = arith.constant dense<0.000000e+00> : vector<128x32xf32>
    %84 = tpu.matmul %81, %83, %cst_39 {dimension_numbers = #tpu.dot_dimension_numbers<[1], [0], [0], [1], [0, 0, 1, 1], [], []>} : vector<128x128xbf16>, vector<128x32xbf16>, vector<128x32xf32> -> vector<128x32xf32>
    %85 = vector.shape_cast %84 : vector<128x32xf32> to vector<16x8x32xf32>
    %86 = arith.addf %82, %85 : vector<16x8x32xf32>
    %c0_40 = arith.constant 0 : index
    %c0_41 = arith.constant 0 : index
    %c0_42 = arith.constant 0 : index
    %87 = vector.load %arg16[%c0_40, %c0_41, %c0_42] : memref<16x8x32xf32, #tpu.memory_space<vmem>>, vector<16x8x32xf32>
    tpu.vector_store %arg16[%c0_40, %c0_41, %c0_42], %86 {strides = array<i32>} : memref<16x8x32xf32, #tpu.memory_space<vmem>>, vector<16x8x32xf32>,
    %c0_i32_43 = arith.constant 0 : i32
    %88 = arith.cmpi eq, %arg1, %c0_i32_43 : i32
    %89 = arith.extui %88 : i1 to i32
    %c0_i32_44 = arith.constant 0 : i32
    %90 = arith.cmpi ne, %89, %c0_i32_44 : i32
    scf.if %90 {
      %c0_45 = arith.constant 0 : index
      %c0_46 = arith.constant 0 : index
      %c0_47 = arith.constant 0 : index
      %91 = vector.load %arg16[%c0_45, %c0_46, %c0_47] : memref<16x8x32xf32, #tpu.memory_space<vmem>>, vector<16x8x32xf32>
      %92 = vector.shape_cast %6 : vector<1x32xf32> to vector<1x1x32xf32>
      %93 = vector.broadcast %92 : vector<1x1x32xf32> to vector<16x8x32xf32>
      %94 = arith.addf %91, %93 : vector<16x8x32xf32>
      %c0_48 = arith.constant 0 : index
      %c0_49 = arith.constant 0 : index
      %c0_50 = arith.constant 0 : index
      %95 = vector.load %arg14[%c0_48, %c0_49, %c0_50] : memref<16x8x32xf32, #tpu.memory_space<vmem>>, vector<16x8x32xf32>
      %96 = vector.broadcast %17 : vector<16x1x32xf32> to vector<16x8x32xf32>
      %97 = arith.mulf %96, %94 : vector<16x8x32xf32>
      %98 = arith.addf %95, %97 : vector<16x8x32xf32>
      %c0_51 = arith.constant 0 : index
      %c0_52 = arith.constant 0 : index
      %c0_53 = arith.constant 0 : index
      %99 = vector.load %arg13[%c0_51, %c0_52, %c0_53] : memref<16x8x32xf32, #tpu.memory_space<vmem>>, vector<16x8x32xf32>
      tpu.vector_store %arg13[%c0_51, %c0_52, %c0_53], %98 {strides = array<i32>} : memref<16x8x32xf32, #tpu.memory_space<vmem>>, vector<16x8x32xf32>,
    } else {
    }
    return
  }
  func.func @transform_0(%arg0: i32, %arg1: i32) -> (i32, i32, i32) {
    %c0_i32 = arith.constant 0 : i32
    %c0_i32_0 = arith.constant 0 : i32
    %c0_i32_1 = arith.constant 0 : i32
    return %arg0, %c0_i32, %c0_i32_0 : i32, i32, i32
  }
  func.func @transform_1(%arg0: i32, %arg1: i32) -> (i32, i32, i32) {
    %c0_i32 = arith.constant 0 : i32
    %c0_i32_0 = arith.constant 0 : i32
    %c0_i32_1 = arith.constant 0 : i32
    return %arg0, %c0_i32, %c0_i32_0 : i32, i32, i32
  }
  func.func @transform_2(%arg0: i32, %arg1: i32) -> (i32, i32) {
    %c0_i32 = arith.constant 0 : i32
    %c0_i32_0 = arith.constant 0 : i32
    %c0_i32_1 = arith.constant 0 : i32
    return %c0_i32, %c0_i32_0 : i32, i32
  }
  func.func @transform_3(%arg0: i32, %arg1: i32) -> (i32, i32) {
    %c0_i32 = arith.constant 0 : i32
    %c0_i32_0 = arith.constant 0 : i32
    %c0_i32_1 = arith.constant 0 : i32
    return %c0_i32, %c0_i32_0 : i32, i32
  }
  func.func @transform_4(%arg0: i32, %arg1: i32) -> (i32, i32) {
    %c0_i32 = arith.constant 0 : i32
    %c0_i32_0 = arith.constant 0 : i32
    %c0_i32_1 = arith.constant 0 : i32
    return %c0_i32, %c0_i32_0 : i32, i32
  }
  func.func @transform_5(%arg0: i32, %arg1: i32) -> (i32, i32) {
    %c0_i32 = arith.constant 0 : i32
    %c0_i32_0 = arith.constant 0 : i32
    %c0_i32_1 = arith.constant 0 : i32
    return %c0_i32, %c0_i32_0 : i32, i32
  }
  func.func @transform_6(%arg0: i32, %arg1: i32) -> (i32, i32, i32) {
    %c0_i32 = arith.constant 0 : i32
    %c0_i32_0 = arith.constant 0 : i32
    %c0_i32_1 = arith.constant 0 : i32
    %c0_i32_2 = arith.constant 0 : i32
    return %c0_i32, %c0_i32_0, %c0_i32_1 : i32, i32, i32
  }
  func.func @transform_7(%arg0: i32, %arg1: i32) -> (i32, i32) {
    %c0_i32 = arith.constant 0 : i32
    %c0_i32_0 = arith.constant 0 : i32
    return %c0_i32, %arg1 : i32, i32
  }
  func.func @transform_8(%arg0: i32, %arg1: i32) -> (i32, i32) {
    %c0_i32 = arith.constant 0 : i32
    %c0_i32_0 = arith.constant 0 : i32
    return %c0_i32, %arg1 : i32, i32
  }
  func.func @transform_9(%arg0: i32, %arg1: i32) -> (i32, i32) {
    %c0_i32 = arith.constant 0 : i32
    %c0_i32_0 = arith.constant 0 : i32
    return %c0_i32, %arg1 : i32, i32
  }
  func.func @transform_10(%arg0: i32, %arg1: i32) -> (i32, i32) {
    %c0_i32 = arith.constant 0 : i32
    %c0_i32_0 = arith.constant 0 : i32
    return %arg1, %c0_i32 : i32, i32
  }
  func.func @transform_11(%arg0: i32, %arg1: i32) -> (i32, i32, i32) {
    %c0_i32 = arith.constant 0 : i32
    %c0_i32_0 = arith.constant 0 : i32
    %c0_i32_1 = arith.constant 0 : i32
    return %arg0, %c0_i32, %c0_i32_0 : i32, i32, i32
  }
}

</mosaic_0001>

<bundles_post_ra>
// kernel: tpu_custom_call.1
= control target key start
LH: loop header
LB: loop body
LE: loop exit
PB: predicated region body
PF: predicated region fallthrough
CT: control target
= control target key end

     0   :  { %s11194_s0 = inlined_call_operand.vmem [shape: f32[32,8,32], index: 0, kind: input, shape index: {}]   ;;  %s11195_s1 = inlined_call_operand.vmem [shape: f32[32,6,32], index: 1, kind: input, shape index: {}]   ;;  %s11196_s2 = inlined_call_operand.vmem [shape: f32[6,32], index: 2, kind: input, shape index: {}]   ;;  %s11197_s3 = inlined_call_operand.vmem [shape: f32[8,32], index: 3, kind: input, shape index: {}]   ;;  %s11198_s4 = inlined_call_operand.vmem [shape: f32[8,32], index: 4, kind: input, shape index: {}]   ;;  %s11199_s5 = inlined_call_operand.vmem [shape: bf16[32,768], index: 5, kind: input, shape index: {}]   ;;  %s11200_s6 = inlined_call_operand.vmem [shape: bf16[2,128,32], index: 6, kind: input, shape index: {}]   ;;  %s11201_s7 = inlined_call_operand.vmem [shape: bf16[32,128], index: 7, kind: input, shape index: {}]   ;;  %s11202_s8 = inlined_call_operand.vmem [shape: bf16[32,128], index: 8, kind: input, shape index: {}]   ;;  %s11203_s9 = inlined_call_operand.vmem [shape: f32[2,128], index: 9, kind: input, shape index: {}]   ;;  %s11204_s10 = inlined_call_operand.vmem [shape: bf16[128,32], index: 10, kind: input, shape index: {}]   ;;  %s11205_s11 = inlined_call_operand.hbm [shape: f32[32,8,32], index: 11, kind: output, shape index: {}]  }
   0x1   :  { %11303 = sst [smem:[#allocation69_spill]] %s11194_s0 }
   0x2   :  { %11304 = sst [smem:[#allocation70_spill]] %s11197_s3 }
   0x3   :  { %16 = vsyncpa [#allocation6], 0 }
   0x4   :  { %18 = vsyncpa [#allocation6 + $0x1], 0  ;;  %s8611_s17 = smov 0   ;;  %s8613_s18 = smov 0  }
   0x5   :  { %s8615_s19 = smov 0   ;;  %s8617_s20 = smov 0  }
   0x6   :  { %s8619_s21 = smov 0   ;;  %s8621_s22 = smov 0  }
   0x7 LB: > { %s7089_s23 = sadd.s32 4294967295, %s8542_s22   ;;  %s7090_s24 = sadd.s32 4294967294, %s8542_s22   ;;  %s8542_s22 = sphi %s8621_s22, %s24_s22   ;;  %s8538_s21 = sphi %s8619_s21, %s11486_s21   ;;  %s8534_s20 = sphi %s8617_s20, %s11485_s20   ;;  %s8530_s19 = sphi %s8615_s19, %s11484_s19   ;;  %s8526_s18 = sphi %s8613_s18, %s11483_s18   ;;  %s8522_s17 = sphi %s8611_s17, %s11482_s17  }
   0x8   : > { %s36_s25 = sadd.s32 1, %s8538_s21  ;;  %s304_s26 = sadd.s32 1, %s8530_s19 }
   0x9   : > { %p38_p0 = scmp.ge.s32.totalorder %s36_s25, 2  ;;  %p314_p1 = scmp.ne.s32.totalorder %s8530_s19, %s8526_s18 }
   0xa   : > { %p315_p2 = scmp.eq.s32.totalorder %s7089_s23, 1  ;;  %p320_p3 = scmp.ne.s32.totalorder %s8526_s18, %s8522_s17 }
   0xb   : > { %s11488_s25 = smov (%p38_p0, %s36_s25), 0  ;;  %p321_p5 = scmp.eq.s32.totalorder %s7090_s24, 1 }
   0xc   : > { %11305 = sst [smem:[#allocation8_spill]] %s11488_s25  ;;  %p8651_p4 = por %p315_p2, %p314_p1 }
   0xd   : > { %s301_s28 = ssub.s32 %s8538_s21, %s11488_s25  ;;  %p7097_p6 = scmp.ge.s32.totalorder %s8542_s22, 1 }
   0xe   : > { %p302_p7 = scmp.eq.s32.totalorder %s301_s28, 0  ;;  %p8658_p8 = por %p321_p5, %p320_p3 }
   0xf   : > { %p402_p9 = scmp.lt.s32.totalorder %s8542_s22, 3 }
  0x10   : > { %s8664_s30 = scalar_select %p302_p7, %s8530_s19, %s304_s26  }
  0x11   : > { %p403_p10 = pnand %p7097_p6, %p402_p9 }
  0x13   : > { %406 = sbr.rel (%p403_p10) target bundleno = 3257 (0xcb9), region = 64 }
  0x1a   : > { %s7099_s12 = sshll.u32 %s8534_s20, 4  ;;  %s11308_s3 = sld [smem:[#allocation70_spill]]  ;;  %vm577_vm0 = vcmask 261120   ;;  %vm8546_vm1 = vmmov 0   ;;  %vm2570_vm2 = vcmask 1043456   ;;  %vm2374_vm3 = vcmask 64512  }
  0x1b   : > { %p465_p11 = scmp.lt.s32.totalorder %s7099_s12, 31  ;;  %s11309_s0 = sld [smem:[#allocation69_spill]]  ;;  %vm5863_vm4 = vcmask 257024  }
  0x1c   : > { %s8548_s15 = smov [#allocation5]  }
  0x1d   : > { %s11490_s12 = smov (!%p465_p11, %s7099_s12), 31  ;;  %s8468_s16 = sshll.u32 %s8548_s15, 4  ;;  %s8469_s16 = int_to_ptr.vmem [resolvable:$false] %s8468_s16 }
  0x1e   : > { %s11206_s13 = sshll.u32 %s11490_s12, 3  ;;  %s8470_s23 = scalar_lea.vmem %s8469_s16, 4096 }
  0x20   : > { %v8673_v0 = vld [vmem:[%s11308_s3] sm:$0xff] }
  0x21   : > { %s8680_s24 = scalar_lea.vmem %s11309_s0, %s11206_s13  ;;  %s11310_s0 = sshll.u32 %s11490_s12, 3 }
  0x22   : > { %v544_v1 = vld [vmem:[%s8680_s24] sm:$0xff]  ;;  %v545_v2 = vld [vmem:[%s8680_s24 + $0x8] sm:$0xff]  ;;  %v546_v3 = vld [vmem:[%s8680_s24 + $0x10] sm:$0xff]  ;;  %s8885_s13 = scalar_lea.vmem %s11195_s1, %s11310_s0  ;;  %s461_s0 = sand.u32 1, %s8526_s18  }
  0x23   : > { %v561_v4 = vadd.f32 %v8673_v0, %v544_v1  ;;  %v8687_v5 = vadd.f32 %v8673_v0, %v545_v2  ;;  %v563_v6 = vadd.f32 %v8673_v0, %v546_v3  ;;  %v547_v7 = vld [vmem:[%s8680_s24 + $0x18] sm:$0xff]  ;;  %v548_v8 = vld [vmem:[%s8680_s24 + $0x20] sm:$0xff]  ;;  %v549_v9 = vld [vmem:[%s8680_s24 + $0x28] sm:$0xff]  ;;  %s11046_s3 = sshll.u32 %s461_s0, 7  ;;  %s7342_s12 = sshll.u32 %s8534_s20, 11 }
  0x24   : > { %v8694_v10 = vadd.f32 %v8673_v0, %v547_v7  ;;  %v8697_v11 = vadd.f32 %v8673_v0, %v548_v8  ;;  %v550_v12 = vld [vmem:[%s8680_s24 + $0x30] sm:$0xff]  ;;  %v551_v13 = vld [vmem:[%s8680_s24 + $0x38] sm:$0xff]  ;;  %v552_v14 = vld [vmem:[%s8680_s24 + $0x40] sm:$0xff]  ;;  %v8705_v17 = vadd.f32 %v8673_v0, %v549_v9  ;;  %s11061_s25 = scalar_lea.vmem [#allocation5], %s11046_s3  ;;  %s11136_s28 = scalar_lea.hbm %s11205_s11, %s7342_s12 }
  0x25   : > { %v578_v15 = vsel %vm577_vm0, %v561_v4, 0.0  ;;  %v584_v16 = vsel %vm577_vm0, %v563_v6, 0.0  ;;  %v8708_v18 = vadd.f32 %v8673_v0, %v550_v12  ;;  %v553_v19 = vld [vmem:[%s8680_s24 + $0x48] sm:$0xff]  ;;  %v554_v20 = vld [vmem:[%s8680_s24 + $0x50] sm:$0xff]  ;;  %v555_v21 = vld [vmem:[%s8680_s24 + $0x58] sm:$0xff]  ;;  %v581_v22 = vsel %vm577_vm0, %v8687_v5, 0.0 }
  0x26   : > { %579 = vadd.xlane.f32.xlu0 %v578_v15  ;;  %585 = vadd.xlane.f32.xlu1 %v584_v16  ;;  %v8716_v23 = vadd.f32 %v8673_v0, %v551_v13  ;;  %v587_v24 = vsel %vm577_vm0, %v8694_v10, 0.0  ;;  %v8721_v25 = vadd.f32 %v8673_v0, %v552_v14  ;;  %v8724_v26 = vadd.f32 %v8673_v0, %v553_v19  ;;  %v556_v37 = vld [vmem:[%s8680_s24 + $0x60] sm:$0xff]  ;;  %v557_v38 = vld [vmem:[%s8680_s24 + $0x68] sm:$0xff]  ;;  %v558_v47 = vld [vmem:[%s8680_s24 + $0x70] sm:$0xff]  ;;  %s6947_s26 = sshll.u32 %s11061_s25, 4  ;;  %s11148_s20 = scalar_lea.sflag [#allocation6], %s461_s0  ;;  %s11138_s26 = int_to_ptr.vmem [resolvable:$true] %s6947_s26 }
  0x27   : > { %v8727_v27 = vadd.f32 %v8673_v0, %v554_v20  ;;  %v8730_v28 = vadd.f32 %v8673_v0, %v555_v21  ;;  %v590_v29 = vsel %vm577_vm0, %v8697_v11, 0.0  ;;  %v593_v30 = vsel %vm577_vm0, %v8705_v17, 0.0  ;;  %v559_v56 = vld [vmem:[%s8680_s24 + $0x78] sm:$0xff]  ;;  %s8464_s14 = scalar_lea.vmem %s11138_s26, 2048  ;;  %p8471_p1 = scmp.lt.s32.totalorder %s11138_s26, %s8469_s16 }
  0x28   : > { %v596_v31 = vsel %vm577_vm0, %v8708_v18, 0.0  ;;  %v599_v32 = vsel %vm577_vm0, %v8716_v23, 0.0  ;;  %v602_v33 = vsel %vm577_vm0, %v8721_v25, 0.0  ;;  %v605_v34 = vsel %vm577_vm0, %v8724_v26, 0.0  ;;  %p8465_p12 = scmp.ne.s32.totalorder %s11138_s26, %s8464_s14  ;;  %p8472_p2 = scmp.lt.s32.totalorder %s8470_s23, %s8464_s14 }
  0x29   : > { %v608_v35 = vsel %vm577_vm0, %v8727_v27, 0.0  ;;  %v611_v36 = vsel %vm577_vm0, %v8730_v28, 0.0  ;;  %v8751_v39 = vadd.f32 %v8673_v0, %v556_v37  ;;  %v8754_v40 = vadd.f32 %v8673_v0, %v557_v38 }
  0x2a   : > { %582 = vadd.xlane.f32.xlu0 %v581_v22  ;;  %588 = vadd.xlane.f32.xlu1 %v587_v24  ;;  %v8764_v51 = vadd.f32 %v8673_v0, %v558_v47  ;;  %v8781_v63 = vadd.f32 %v8673_v0, %v559_v56  ;;  %p8466_p13 = pnand %p8465_p12, %p8651_p4  ;;  %p8473_p3 = por %p8472_p2, %p8471_p1 }
  0x2b   : > { %v614_v41 = vsel %vm577_vm0, %v8751_v39, 0.0  ;;  %v617_v42 = vsel %vm577_vm0, %v8754_v40, 0.0 }
  0x2c   : > { %v620_v60 = vsel %vm577_vm0, %v8764_v51, 0.0  ;;  %v623_v0 = vsel %vm577_vm0, %v8781_v63, 0.0  ;;  %p8467_p0 = pneg %p8466_p13 }
  0x2e   : > { %591 = vadd.xlane.f32.xlu0 %v590_v29  ;;  %594 = vadd.xlane.f32.xlu1 %v593_v30  ;;  %p8474_p5 = pnand %p8473_p3, %p8467_p0 }
  0x32   : > { %597 = vadd.xlane.f32.xlu0 %v596_v31  ;;  %600 = vadd.xlane.f32.xlu1 %v599_v32 }
  0x36   : > { %603 = vadd.xlane.f32.xlu0 %v602_v33  ;;  %606 = vadd.xlane.f32.xlu1 %v605_v34 }
  0x3a   : > { %609 = vadd.xlane.f32.xlu0 %v608_v35  ;;  %612 = vadd.xlane.f32.xlu1 %v611_v36 }
  0x3e   : > { %615 = vadd.xlane.f32.xlu0 %v614_v41  ;;  %618 = vadd.xlane.f32.xlu1 %v617_v42 }
  0xb3   : > { %v580_v43 = vpop.xlane.xlu0 %579  ;;  %v586_v44 = vpop.xlane.xlu1 %585 }
  0xb4   : > { %v627_v45 = vmul.f32 0.03125, %v580_v43  ;;  %v629_v46 = vmul.f32 0.03125, %v586_v44 }
  0xb6   : > { %v8761_v48 = vsub.f32 %v561_v4, %v627_v45  ;;  %v8766_v53 = vsub.f32 %v563_v6, %v629_v46 }
  0xb7   : > { %v583_v49 = vpop.xlane.xlu0 %582  ;;  %v589_v50 = vpop.xlane.xlu1 %588 }
  0xb8   : > { %v628_v52 = vmul.f32 0.03125, %v583_v49  ;;  %v659_v54 = vmul.f32 %v8761_v48, %v8761_v48  ;;  %v630_v55 = vmul.f32 0.03125, %v589_v50  ;;  %v661_v4 = vmul.f32 %v8766_v53, %v8766_v53 }
  0xba   : > { %v8772_v57 = vsub.f32 %v8687_v5, %v628_v52  ;;  %v675_v58 = vsel %vm577_vm0, %v659_v54, 0.0  ;;  %v8776_v59 = vsub.f32 %v8694_v10, %v630_v55  ;;  %v681_v12 = vsel %vm577_vm0, %v661_v4, 0.0  ;;  %v8146_v4 = vld [vmem:[%s11199_s5 + $0x30] ss:$24 sps:$4 sm:$0xff]  }
  0xbb   : > { %676 = vadd.xlane.f32.xlu0 %v675_v58  ;;  %v592_v61 = vpop.xlane.xlu0 %591  ;;  %v595_v62 = vpop.xlane.xlu1 %594 }
  0xbc   : > { %v660_v1 = vmul.f32 %v8772_v57, %v8772_v57  ;;  %v631_v2 = vmul.f32 0.03125, %v592_v61  ;;  %v632_v3 = vmul.f32 0.03125, %v595_v62  ;;  %v662_v10 = vmul.f32 %v8776_v59, %v8776_v59  ;;  %v8138_v61 = vld [vmem:[%s11199_s5 + $0xc] ss:$24 sps:$4 sm:$0xff]   ;;  %v8140_v62 = vld [vmem:[%s11199_s5] ss:$24 sps:$4 sm:$0xff]  }
  0xbd   : > { %1220 = vmatprep.subr.bf16.mxu1 %v8138_v61  ;;  %v509_v61 = vld [vmem:[%s8885_s13 + $0x10] sm:$0x3f] }
  0xbe   : > { %v678_v5 = vsel %vm577_vm0, %v660_v1, 0.0  ;;  %v8789_v6 = vsub.f32 %v8697_v11, %v631_v2  ;;  %v8792_v7 = vsub.f32 %v8705_v17, %v632_v3  ;;  %v684_v17 = vsel %vm577_vm0, %v662_v10, 0.0  ;;  %v8141_v1 = vld [vmem:[%s11199_s5 + $0x8] ss:$24 sps:$4 sm:$0xff]   ;;  %v8142_v2 = vld [vmem:[%s11199_s5 + $0x34] ss:$24 sps:$4 sm:$0xff]  }
  0xbf   : > { %621 = vadd.xlane.f32.xlu0 %v620_v60  ;;  %679 = vadd.xlane.f32.xlu1 %v678_v5  ;;  %v598_v8 = vpop.xlane.xlu0 %597  ;;  %v601_v9 = vpop.xlane.xlu1 %600  ;;  %v8136_v60 = vld [vmem:[%s11199_s5 + $0x4] ss:$24 sps:$4 sm:$0xff]   ;;  %v8147_v5 = vld [vmem:[%s11199_s5 + $0x38] ss:$24 sps:$4 sm:$0xff]   ;;  %v787_v10 = vlaneseq }
  0xc0   : > { %v633_v13 = vmul.f32 0.03125, %v598_v8  ;;  %v634_v14 = vmul.f32 0.03125, %v601_v9  ;;  %v663_v11 = vmul.f32 %v8789_v6, %v8789_v6  ;;  %v664_v21 = vmul.f32 %v8792_v7, %v8792_v7  ;;  %1107 = vmatprep.subr.bf16.mxu0 %v8136_v60  ;;  %1221 = vmatpush1.bf16.msra.mxu1 %v8141_v1  ;;  %v8144_v3 = vld [vmem:[%s11199_s5 + $0x3c] ss:$24 sps:$4 sm:$0xff]  }
  0xc1   : > { %1108 = vmatpush1.bf16.msra.mxu0 %v8140_v62  ;;  %1222 = vmatprep.subr.bf16.mxu1 %v8144_v3 }
  0xc2   : > { %v8802_v15 = vsub.f32 %v8708_v18, %v633_v13  ;;  %v8805_v16 = vsub.f32 %v8716_v23, %v634_v14  ;;  %v687_v22 = vsel %vm577_vm0, %v663_v11, 0.0  ;;  %v690_v31 = vsel %vm577_vm0, %v664_v21, 0.0  ;;  %1109 = vmatprep.subr.bf16.mxu0 %v8142_v2 }
  0xc3   : > { %682 = vadd.xlane.f32.xlu0 %v681_v12  ;;  %624 = vadd.xlane.f32.xlu1 %v623_v0  ;;  %v604_v19 = vpop.xlane.xlu0 %603  ;;  %v607_v20 = vpop.xlane.xlu1 %606  ;;  %v8544_v0 = vmov 0  }
  0xc4   : > { %v635_v24 = vmul.f32 0.03125, %v604_v19  ;;  %v636_v29 = vmul.f32 0.03125, %v607_v20  ;;  %v665_v18 = vmul.f32 %v8802_v15, %v8802_v15  ;;  %v666_v34 = vmul.f32 %v8805_v16, %v8805_v16  ;;  %1223 = vmatpush1.bf16.msra.mxu1 %v8147_v5  ;;  %1139 = vmatprep.mubr.bf16.mxu0 %v8544_v0 }
  0xc5   : > { %1110 = vmatpush1.bf16.msra.mxu0 %v8146_v4  ;;  %1252 = vmatprep.mubr.bf16.mxu1 %v8544_v0  ;;  %v8887_v19 = vshrl.u32 %v787_v10, 7 }
  0xc6   : > { %v8814_v30 = vsub.f32 %v8721_v25, %v635_v24  ;;  %v8817_v23 = vsub.f32 %v8724_v26, %v636_v29  ;;  %v693_v35 = vsel %vm577_vm0, %v665_v18, 0.0  ;;  %v696_v41 = vsel %vm577_vm0, %v666_v34, 0.0 }
  0xc7   : > { %685 = vadd.xlane.f32.xlu1 %v684_v17  ;;  %688 = vadd.xlane.f32.xlu0 %v687_v22  ;;  %v610_v32 = vpop.xlane.xlu0 %609  ;;  %v613_v33 = vpop.xlane.xlu1 %612  ;;  %11311 = vst [vmem:[#allocation9_spill] sm:$0xff] %v8887_v19  ;;  %v8901_v34 = vsub.s32 0, %v8887_v19 }
  0xc8   : > { %v637_v36 = vmul.f32 0.03125, %v610_v32  ;;  %v638_v37 = vmul.f32 0.03125, %v613_v33  ;;  %v667_v25 = vmul.f32 %v8814_v30, %v8814_v30  ;;  %v668_v44 = vmul.f32 %v8817_v23, %v8817_v23  ;;  %v507_v32 = vld [vmem:[%s8885_s13] sm:$0x3f] }
  0xc9   : > { %v8898_v33 = vld [vmem:[%s11196_s2] sm:$0x3f] }
  0xca   : > { %v8826_v38 = vsub.f32 %v8727_v27, %v637_v36  ;;  %v8829_v26 = vsub.f32 %v8730_v28, %v638_v37  ;;  %v699_v45 = vsel %vm577_vm0, %v667_v25, 0.0  ;;  %v702_v28 = vsel %vm577_vm0, %v668_v44, 0.0  ;;  %v506_v37 = vld [vmem:[%s11198_s4] sm:$0xff]  ;;  %v508_v25 = vld [vmem:[%s8885_s13 + $0x8] sm:$0x3f] }
  0xcb   : > { %691 = vadd.xlane.f32.xlu1 %v690_v31  ;;  %694 = vadd.xlane.f32.xlu0 %v693_v35  ;;  %v616_v42 = vpop.xlane.xlu0 %615  ;;  %v619_v43 = vpop.xlane.xlu1 %618  ;;  %v8915_v44 = vsub.s32 1, %v8887_v19 }
  0xcc   : > { %v639_v46 = vmul.f32 0.03125, %v616_v42  ;;  %v640_v47 = vmul.f32 0.03125, %v619_v43  ;;  %v669_v27 = vmul.f32 %v8826_v38, %v8826_v38  ;;  %v670_v54 = vmul.f32 %v8829_v26, %v8829_v26 }
  0xcd   : > { %v8912_v43 = vadd.f32 %v8898_v33, %v507_v32 }
  0xce   : > { %v8838_v49 = vsub.f32 %v8751_v39, %v639_v46  ;;  %v8842_v50 = vsub.f32 %v8754_v40, %v640_v47  ;;  %v705_v52 = vsel %vm577_vm0, %v669_v27, 0.0  ;;  %v708_v39 = vsel %vm577_vm0, %v670_v54, 0.0 }
  0xcf   : > { %697 = vadd.xlane.f32.xlu1 %v696_v41  ;;  %700 = vadd.xlane.f32.xlu0 %v699_v45  ;;  %11312 = vst [vmem:[#allocation10_spill] sm:$0xff] %v8912_v43  ;;  %v8920_v47 = vadd.f32 %v8898_v33, %v508_v25  ;;  %v8923_v27 = vrot.slane %v506_v37, %v8901_v34  ;;  %v8931_v60 = vadd.f32 1.0, %v8912_v43 }
  0xd0   : > { %v671_v55 = vmul.f32 %v8838_v49, %v8838_v49  ;;  %v672_v58 = vmul.f32 %v8842_v50, %v8842_v50  ;;  %v926_v32 = vrot.slane %v8912_v43, %v8901_v34 }
  0xd1   : > { %11313 = vst [vmem:[#allocation11_spill] sm:$0xff] %v8920_v47  ;;  %11314 = vst [vmem:[#allocation12_spill] sm:$0xff] %v8931_v60  ;;  %v8936_v3 = vadd.f32 1.0, %v8920_v47 }
  0xd2   : > { %v711_v56 = vsel %vm577_vm0, %v671_v55, 0.0  ;;  %v714_v40 = vsel %vm577_vm0, %v672_v58, 0.0 }
  0xd3   : > { %703 = vadd.xlane.f32.xlu1 %v702_v28  ;;  %706 = vadd.xlane.f32.xlu0 %v705_v52  ;;  %11315 = vst [vmem:[#allocation13_spill] sm:$0xff] %v8936_v3 }
  0xd7   : > { %709 = vadd.xlane.f32.xlu1 %v708_v39  ;;  %712 = vadd.xlane.f32.xlu0 %v711_v56 }
  0xdb   : > { %715 = vadd.xlane.f32.xlu1 %v714_v40  ;;  %v8928_v40 = vrot.slane %v506_v37, %v8915_v44 }
 0x148   : > { %v677_v8 = vpop.xlane.xlu0 %676 }
 0x149   : > { %v723_v9 = vmul.f32 0.03125, %v677_v8  ;;  %v510_v8 = vld [vmem:[%s8885_s13 + $0x18] sm:$0x3f] }
 0x14b   : > { %v739_v12 = vadd.f32 1e-05, %v723_v9  ;;  %v8940_v9 = vadd.f32 %v8898_v33, %v509_v61 }
 0x14c   : > { %v680_v13 = vpop.xlane.xlu1 %679  ;;  %v622_v14 = vpop.xlane.xlu0 %621 }
 0x14d   : > { %8190 = vrsqrt.f32 %v739_v12  ;;  %v724_v11 = vmul.f32 0.03125, %v680_v13  ;;  %v641_v17 = vmul.f32 0.03125, %v622_v14  ;;  %11316 = vst [vmem:[#allocation14_spill] sm:$0xff] %v8940_v9  ;;  %v934_v61 = vrot.slane %v8940_v9, %v8901_v34 }
 0x14f   : > { %v740_v20 = vadd.f32 1e-05, %v724_v11  ;;  %v8890_v21 = vsub.f32 %v8764_v51, %v641_v17  ;;  %v846_v11 = vrot.slane %v8931_v60, %v8915_v44 }
 0x150   : > { %v625_v22 = vpop.xlane.xlu1 %624  ;;  %v683_v24 = vpop.xlane.xlu0 %682 }
 0x151   : > { %8192 = vrsqrt.f32 %v740_v20  ;;  %v642_v29 = vmul.f32 0.03125, %v625_v22  ;;  %v725_v18 = vmul.f32 0.03125, %v683_v24  ;;  %v673_v31 = vmul.f32 %v8890_v21, %v8890_v21 }
 0x152   : > { %v850_v22 = vrot.slane %v8936_v3, %v8915_v44  ;;  %v8950_v24 = vadd.f32 %v8898_v33, %v510_v8 }
 0x153   : > { %v8904_v51 = vsub.f32 %v8781_v63, %v642_v29  ;;  %v741_v35 = vadd.f32 1e-05, %v725_v18  ;;  %v717_v36 = vsel %vm577_vm0, %v673_v31, 0.0 }
 0x154   : > { %v686_v41 = vpop.xlane.xlu1 %685  ;;  %718 = vadd.xlane.f32.xlu0 %v717_v36  ;;  %v689_v42 = vpop.xlane.xlu0 %688  ;;  %11317 = vst [vmem:[#allocation15_spill] sm:$0xff] %v8950_v24  ;;  %v512_v36 = vld [vmem:[%s8885_s13 + $0x28] sm:$0x3f] }
 0x155   : > { %8194 = vrsqrt.f32 %v741_v35  ;;  %v726_v63 = vmul.f32 0.03125, %v686_v41  ;;  %v727_v45 = vmul.f32 0.03125, %v689_v42  ;;  %v674_v46 = vmul.f32 %v8904_v51, %v8904_v51 }
 0x156   : > { %v8956_v35 = vadd.f32 1.0, %v8940_v9 }
 0x157   : > { %v8191_v28 = vpop.eup %8190  ;;  %v742_v52 = vadd.f32 1e-05, %v726_v63  ;;  %v743_v54 = vadd.f32 1e-05, %v727_v45  ;;  %v720_v55 = vsel %vm577_vm0, %v674_v46, 0.0  ;;  %v930_v63 = vrot.slane %v8920_v47, %v8901_v34 }
 0x158   : > { %v771_v39 = vmul.f32 %v8191_v28, %v8761_v48  ;;  %721 = vadd.xlane.f32.xlu1 %v720_v55  ;;  %v692_v56 = vpop.xlane.xlu1 %691  ;;  %v695_v58 = vpop.xlane.xlu0 %694  ;;  %11318 = vst [vmem:[#allocation16_spill] sm:$0xff] %v8956_v35 }
 0x159   : > { %8196 = vrsqrt.f32 %v742_v52  ;;  %v728_v62 = vmul.f32 0.03125, %v692_v56  ;;  %v729_v1 = vmul.f32 0.03125, %v695_v58  ;;  %v854_v58 = vrot.slane %v8956_v35, %v8915_v44 }
 0x15a   : > { %8198 = vrsqrt.f32 %v743_v54  ;;  %v791_v2 = vmul.f32 %v8923_v27, %v771_v39  ;;  %v8968_v54 = vadd.f32 1.0, %v8950_v24 }
 0x15b   : > { %v8193_v48 = vpop.eup %8192  ;;  %v744_v4 = vadd.f32 1e-05, %v728_v62  ;;  %v745_v5 = vadd.f32 1e-05, %v729_v1 }
 0x15c   : > { %v772_v10 = vmul.f32 %v8193_v48, %v8772_v57  ;;  %v698_v12 = vpop.xlane.xlu1 %697  ;;  %v701_v13 = vpop.xlane.xlu0 %700  ;;  %v811_v14 = vadd.f32 %v8928_v40, %v791_v2  ;;  %v511_v57 = vld [vmem:[%s8885_s13 + $0x20] sm:$0x3f]  ;;  %11320 = vst [vmem:[#allocation18_spill] sm:$0xff] %v8968_v54 }
 0x15d   : > { %8200 = vrsqrt.f32 %v744_v4  ;;  %v730_v17 = vmul.f32 0.03125, %v698_v12  ;;  %v731_v31 = vmul.f32 0.03125, %v701_v13  ;;  %v8964_v46 = vadd.f32 %v8898_v33, %v511_v57 }
 0x15e   : > { %8202 = vrsqrt.f32 %v745_v5  ;;  %v792_v20 = vmul.f32 %v8923_v27, %v772_v10  ;;  %v907_v42 = vmul.f32 %v846_v11, %v811_v14 }
 0x15f   : > { %v8195_v29 = vpop.eup %8194  ;;  %v746_v18 = vadd.f32 1e-05, %v730_v17  ;;  %11319 = vst [vmem:[#allocation17_spill] sm:$0xff] %v8964_v46  ;;  %v747_v39 = vadd.f32 1e-05, %v731_v31  ;;  %v8981_v13 = vadd.f32 1.0, %v8964_v46 }
 0x160   : > { %v773_v37 = vmul.f32 %v8195_v29, %v8766_v53  ;;  %v704_v25 = vpop.xlane.xlu1 %703  ;;  %v812_v41 = vadd.f32 %v8928_v40, %v792_v20  ;;  %v8971_v53 = vadd.f32 %v8898_v33, %v512_v36  ;;  %v707_v2 = vpop.xlane.xlu0 %706  ;;  %v987_v4 = vadd.f32 %v926_v32, %v907_v42  ;;  %v514_v20 = vld [vmem:[%s8885_s13 + $0x38] sm:$0x3f] }
 0x161   : > { %8204 = vrsqrt.f32 %v746_v18  ;;  %v732_v45 = vmul.f32 0.03125, %v704_v25  ;;  %11322 = vst [vmem:[#allocation20_spill] sm:$0xff] %v8981_v13  ;;  %v733_v57 = vmul.f32 0.03125, %v707_v2  ;;  %v938_v29 = vrot.slane %v8950_v24, %v8901_v34  ;;  %v513_v18 = vld [vmem:[%s8885_s13 + $0x30] sm:$0x3f] }
 0x162   : > { %v908_v28 = vmul.f32 %v850_v22, %v812_v41  ;;  %v793_v52 = vmul.f32 %v8923_v27, %v773_v37  ;;  %11321 = vst [vmem:[#allocation19_spill] sm:$0xff] %v8971_v53  ;;  %v8989_v17 = vadd.f32 1.0, %v8971_v53  ;;  %v9005_v41 = vadd.f32 %v8898_v33, %v514_v20  ;;  %v516_v20 = vld [vmem:[%s8885_s13 + $0x48] sm:$0x3f] }
 0x163   : > { %v8197_v55 = vpop.eup %8196  ;;  %v748_v56 = vadd.f32 1e-05, %v732_v45 }
 0x164   : > { %v8199_v62 = vpop.eup %8198  ;;  %v774_v1 = vmul.f32 %v8197_v55, %v8776_v59  ;;  %v710_v48 = vpop.xlane.xlu1 %709  ;;  %v988_v5 = vadd.f32 %v930_v63, %v908_v28  ;;  %v813_v8 = vadd.f32 %v8928_v40, %v793_v52  ;;  %v858_v59 = vrot.slane %v8968_v54, %v8915_v44  ;;  %11323 = vst [vmem:[#allocation21_spill] sm:$0xff] %v8989_v17 }
 0x165   : > { %v775_v10 = vmul.f32 %v8199_v62, %v8789_v6  ;;  %8206 = vrsqrt.f32 %v748_v56  ;;  %v734_v12 = vmul.f32 0.03125, %v710_v48  ;;  %11324 = vst [vmem:[#allocation22_spill] sm:$0xff] %v9005_v41  ;;  %v866_v45 = vrot.slane %v8989_v17, %v8915_v44 }
 0x166   : > { %v8983_v14 = vpack.c.bf16 %v988_v5, %v987_v4  ;;  %v794_v11 = vmul.f32 %v8923_v27, %v774_v1  ;;  %8208 = vrsqrt.f32 %v747_v39  ;;  %v909_v6 = vmul.f32 %v854_v58, %v813_v8  ;;  %v713_v1 = vpop.xlane.xlu0 %712 }
 0x167   : > { %v8201_v22 = vpop.eup %8200  ;;  %v795_v37 = vmul.f32 %v8923_v27, %v775_v10  ;;  %v750_v25 = vadd.f32 1e-05, %v734_v12  ;;  %v9011_v28 = vadd.f32 %v8898_v33, %v513_v18  ;;  %v749_v39 = vadd.f32 1e-05, %v733_v57 }
 0x168   : > { %v8203_v31 = vpop.eup %8202  ;;  %v776_v32 = vmul.f32 %v8201_v22, %v8792_v7  ;;  %7115 = vmatmul.mubr.msk.bf16.vlgmr.msra.gmra.mrb[0].mxu0 %vm577_vm0, %v8983_v14  ;;  %7123 = vmatmul.mubr.msk.bf16.vlgmr.msra.gmra.mrb[0].mxu1 %vm577_vm0, %v8983_v14  ;;  %v814_v36 = vadd.f32 %v8928_v40, %v794_v11  ;;  %v716_v42 = vpop.xlane.xlu1 %715  ;;  %v989_v56 = vadd.f32 %v934_v61, %v909_v6  ;;  %v9020_v8 = vadd.f32 1.0, %v9005_v41 }
 0x169   : > { %1149 = vmatprep.mubr.bf16.mxu0 %v8544_v0  ;;  %1262 = vmatprep.mubr.bf16.mxu1 %v8544_v0  ;;  %11325 = vst [vmem:[#allocation23_spill] sm:$0xff] %v9011_v28  ;;  %v777_v55 = vmul.f32 %v8203_v31, %v8802_v15  ;;  %v862_v58 = vrot.slane %v8981_v13, %v8915_v44  ;;  %8210 = vrsqrt.f32 %v750_v25  ;;  %v736_v5 = vmul.f32 0.03125, %v716_v42 }
 0x16a   : > { %v910_v7 = vmul.f32 %v858_v59, %v814_v36  ;;  %v796_v63 = vmul.f32 %v8923_v27, %v776_v32  ;;  %v815_v48 = vadd.f32 %v8928_v40, %v795_v37  ;;  %11326 = vst [vmem:[#allocation24_spill] sm:$0xff] %v9020_v8  ;;  %v946_v10 = vrot.slane %v8971_v53, %v8901_v34  ;;  %v515_v32 = vld [vmem:[%s8885_s13 + $0x40] sm:$0x3f] }
 0x16b   : > { %v8205_v52 = vpop.eup %8204  ;;  %8212 = vrsqrt.f32 %v749_v39  ;;  %v735_v11 = vmul.f32 0.03125, %v713_v1  ;;  %v9028_v59 = vadd.f32 1.0, %v9011_v28  ;;  %v942_v57 = vrot.slane %v8964_v46, %v8901_v34 }
 0x16c   : > { %v778_v62 = vmul.f32 %v8205_v52, %v8805_v16  ;;  %v990_v2 = vadd.f32 %v938_v29, %v910_v7  ;;  %v816_v4 = vadd.f32 %v8928_v40, %v796_v63  ;;  %v911_v22 = vmul.f32 %v862_v58, %v815_v48 }
 0x16d   : > { %11327 = vst [vmem:[#allocation25_spill] sm:$0xff] %v9028_v59  ;;  %v797_v6 = vmul.f32 %v8923_v27, %v777_v55  ;;  %v752_v18 = vadd.f32 1e-05, %v736_v5  ;;  %v874_v31 = vrot.slane %v9020_v8, %v8915_v44  ;;  %v9046_v42 = vadd.f32 %v8898_v33, %v516_v20 }
 0x16e   : > { %v9022_v15 = vpack.c.bf16 %v990_v2, %v989_v56  ;;  %v912_v61 = vmul.f32 %v866_v45, %v816_v4  ;;  %v798_v16 = vmul.f32 %v8923_v27, %v778_v62  ;;  %v751_v7 = vadd.f32 1e-05, %v735_v11 }
 0x16f   : > { %v8207_v12 = vpop.eup %8206  ;;  %11328 = vst [vmem:[#allocation26_spill] sm:$0xff] %v9046_v42  ;;  %v870_v63 = vrot.slane %v9028_v59, %v8915_v44  ;;  %v991_v52 = vadd.f32 %v942_v57, %v911_v22  ;;  %v817_v55 = vadd.f32 %v8928_v40, %v797_v6  ;;  %v9053_v39 = vadd.f32 %v8898_v33, %v515_v32 }
 0x170   : > { %7116 = vmatmul.mubr.msk.bf16.gmra.mrb[4].mxu0 %vm577_vm0, %v9022_v15  ;;  %7124 = vmatmul.mubr.msk.bf16.gmra.mrb[4].mxu1 %vm577_vm0, %v9022_v15  ;;  %v8209_v29 = vpop.eup %8208  ;;  %v780_v36 = vmul.f32 %v8207_v12, %v8817_v23  ;;  %v992_v37 = vadd.f32 %v946_v10, %v912_v61  ;;  %v818_v25 = vadd.f32 %v8928_v40, %v798_v16  ;;  %8214 = vrsqrt.f32 %v752_v18  ;;  %v517_v10 = vld [vmem:[%s8885_s13 + $0x50] sm:$0x3f] }
 0x171   : > { %1159 = vmatprep.mubr.bf16.mxu0 %v8544_v0  ;;  %1272 = vmatprep.mubr.bf16.mxu1 %v8544_v0  ;;  %v779_v45 = vmul.f32 %v8209_v29, %v8814_v30  ;;  %11329 = vst [vmem:[#allocation27_spill] sm:$0xff] %v9053_v39  ;;  %v954_v23 = vrot.slane %v9005_v41, %v8901_v34  ;;  %v9061_v1 = vadd.f32 1.0, %v9046_v42  ;;  %v518_v30 = vld [vmem:[%s8885_s13 + $0x58] sm:$0x3f]  ;;  %8216 = vrsqrt.f32 %v751_v7 }
 0x172   : > { %v9057_v56 = vpack.c.bf16 %v992_v37, %v991_v52  ;;  %v914_v58 = vmul.f32 %v874_v31, %v818_v25  ;;  %v800_v62 = vmul.f32 %v8923_v27, %v780_v36  ;;  %v913_v48 = vmul.f32 %v870_v63, %v817_v55 }
 0x173   : > { %11330 = vst [vmem:[#allocation28_spill] sm:$0xff] %v9061_v1  ;;  %v8211_v2 = vpop.eup %8210  ;;  %v950_v4 = vrot.slane %v9011_v28, %v8901_v34  ;;  %v799_v5 = vmul.f32 %v8923_v27, %v779_v45  ;;  %v9072_v61 = vadd.f32 1.0, %v9053_v39  ;;  %v9078_v12 = vadd.f32 %v8898_v33, %v518_v30  ;;  %v520_v45 = vld [vmem:[%s8885_s13 + $0x68] sm:$0x3f] }
 0x174   : > { %v782_v11 = vmul.f32 %v8211_v2, %v8829_v26  ;;  %v994_v20 = vadd.f32 %v954_v23, %v914_v58  ;;  %v820_v22 = vadd.f32 %v8928_v40, %v800_v62  ;;  %v882_v57 = vrot.slane %v9061_v1, %v8915_v44  ;;  %v8150_v58 = vld [vmem:[%s11199_s5 + $0x14] ss:$24 sps:$4 sm:$0xff]   ;;  %v519_v2 = vld [vmem:[%s8885_s13 + $0x60] sm:$0x3f] }
 0x175   : > { %11331 = vst [vmem:[#allocation29_spill] sm:$0xff] %v9072_v61  ;;  %v8213_v16 = vpop.eup %8212  ;;  %11332 = vst [vmem:[#allocation30_spill] sm:$0xff] %v9078_v12  ;;  %v9085_v6 = vadd.f32 %v8898_v33, %v517_v10  ;;  %v993_v18 = vadd.f32 %v950_v4, %v913_v48  ;;  %v819_v31 = vadd.f32 %v8928_v40, %v799_v5  ;;  %v9092_v26 = vadd.f32 1.0, %v9078_v12  ;;  %v8148_v48 = vld [vmem:[%s11199_s5 + $0x10] ss:$24 sps:$4 sm:$0xff]  }
 0x176   : > { %v781_v29 = vmul.f32 %v8213_v16, %v8826_v38  ;;  %v878_v32 = vrot.slane %v9072_v61, %v8915_v44  ;;  %v916_v37 = vmul.f32 %v882_v57, %v820_v22  ;;  %v962_v25 = vrot.slane %v9046_v42, %v8901_v34  ;;  %v8153_v4 = vld [vmem:[%s11199_s5 + $0x44] ss:$24 sps:$4 sm:$0xff]   ;;  %1333 = vmatprep.subr.bf16.mxu0 %v8150_v58  ;;  %v8151_v22 = vld [vmem:[%s11199_s5 + $0x40] ss:$24 sps:$4 sm:$0xff]  }
 0x177   : > { %11333 = vst [vmem:[#allocation31_spill] sm:$0xff] %v9085_v6  ;;  %11334 = vst [vmem:[#allocation32_spill] sm:$0xff] %v9092_v26  ;;  %v9094_v36 = vpack.c.bf16 %v994_v20, %v993_v18  ;;  %v802_v7 = vmul.f32 %v8923_v27, %v782_v11  ;;  %v9100_v38 = vadd.f32 1.0, %v9085_v6  ;;  %v958_v55 = vrot.slane %v9053_v39, %v8901_v34 }
 0x178   : > { %7117 = vmatmul.mubr.msk.bf16.gmra.mrb[8].mxu0 %vm577_vm0, %v9057_v56  ;;  %7125 = vmatmul.mubr.msk.bf16.gmra.mrb[8].mxu1 %vm577_vm0, %v9057_v56  ;;  %v915_v52 = vmul.f32 %v878_v32, %v819_v31  ;;  %v801_v23 = vmul.f32 %v8923_v27, %v781_v29  ;;  %v890_v30 = vrot.slane %v9092_v26, %v8915_v44 }
 0x179   : > { %1169 = vmatprep.mubr.bf16.mxu0 %v8544_v0  ;;  %1282 = vmatprep.mubr.bf16.mxu1 %v8544_v0  ;;  %11335 = vst [vmem:[#allocation33_spill] sm:$0xff] %v9100_v38  ;;  %v996_v10 = vadd.f32 %v962_v25, %v916_v37  ;;  %v822_v16 = vadd.f32 %v8928_v40, %v802_v7 }
 0x17a   : > { %v8215_v63 = vpop.eup %8214  ;;  %v9127_v11 = vadd.f32 %v8898_v33, %v520_v45  ;;  %v886_v20 = vrot.slane %v9100_v38, %v8915_v44  ;;  %1334 = vmatpush1.bf16.msra.mxu0 %v8148_v48  ;;  %v995_v29 = vadd.f32 %v958_v55, %v915_v52  ;;  %v9137_v18 = vadd.f32 %v8898_v33, %v519_v2 }
 0x17b   : > { %v8217_v62 = vpop.eup %8216  ;;  %v784_v5 = vmul.f32 %v8215_v63, %v8842_v50  ;;  %v821_v50 = vadd.f32 %v8928_v40, %v801_v23  ;;  %1335 = vmatprep.subr.bf16.mxu0 %v8153_v4  ;;  %v970_v31 = vrot.slane %v9078_v12, %v8901_v34  ;;  %v918_v37 = vmul.f32 %v890_v30, %v822_v16 }
 0x17c   : > { %11336 = vst [vmem:[#allocation34_spill] sm:$0xff] %v9127_v11  ;;  %v783_v57 = vmul.f32 %v8217_v62, %v8838_v49  ;;  %11337 = vst [vmem:[#allocation35_spill] sm:$0xff] %v9137_v18  ;;  %v9141_v32 = vpack.c.bf16 %v996_v10, %v995_v29  ;;  %v9145_v7 = vadd.f32 1.0, %v9127_v11  ;;  %v966_v63 = vrot.slane %v9085_v6, %v8901_v34 }
 0x17d   : > { %v804_v25 = vmul.f32 %v8923_v27, %v784_v5  ;;  %v917_v49 = vmul.f32 %v886_v20, %v821_v50  ;;  %v9155_v52 = vadd.f32 1.0, %v9137_v18  ;;  %v998_v55 = vadd.f32 %v970_v31, %v918_v37 }
 0x17e   : > { %11338 = vst [vmem:[#allocation36_spill] sm:$0xff] %v9145_v7  ;;  %1336 = vmatpush1.bf16.msra.mxu0 %v8151_v22  ;;  %v803_v45 = vmul.f32 %v8923_v27, %v783_v57  ;;  %v898_v58 = vrot.slane %v9145_v7, %v8915_v44  ;;  %v978_v5 = vrot.slane %v9127_v11, %v8901_v34  ;;  %v11233_v29 = vmov 0.0  }
 0x17f   : > { %11339 = vst [vmem:[#allocation37_spill] sm:$0xff] %v9155_v52  ;;  %v824_v23 = vadd.f32 %v8928_v40, %v804_v25  ;;  %v997_v62 = vadd.f32 %v966_v63, %v917_v49  ;;  %v894_v2 = vrot.slane %v9155_v52, %v8915_v44  ;;  %v974_v16 = vrot.slane %v9137_v18, %v8901_v34 }
 0x180   : > { %7118 = vmatmul.mubr.msk.bf16.gmra.mrb[12].mxu0 %vm577_vm0, %v9094_v36  ;;  %7126 = vmatmul.mubr.msk.bf16.gmra.mrb[12].mxu1 %vm577_vm0, %v9094_v36  ;;  %v823_v30 = vadd.f32 %v8928_v40, %v803_v45  ;;  %5880 = vst.msk [vmem:[#allocation4] sm:$0xff] %vm577_vm0, %v11233_v29  ;;  %5881 = vst.msk [vmem:[#allocation4 + $0x8] sm:$0xff] %vm577_vm0, %v11233_v29  ;;  %v521_v45 = vld [vmem:[%s8885_s13 + $0x70] sm:$0x3f] }
 0x181   : > { %1179 = vmatprep.mubr.bf16.mxu0 %v8544_v0  ;;  %1292 = vmatprep.mubr.bf16.mxu1 %v8544_v0  ;;  %v9165_v48 = vpack.c.bf16 %v998_v55, %v997_v62  ;;  %v920_v4 = vmul.f32 %v898_v58, %v824_v23  ;;  %5882 = vst.msk [vmem:[#allocation4 + $0x10] sm:$0xff] %vm577_vm0, %v11233_v29  ;;  %5883 = vst.msk [vmem:[#allocation4 + $0x18] sm:$0xff] %vm577_vm0, %v11233_v29  ;;  %v522_v55 = vld [vmem:[%s8885_s13 + $0x78] sm:$0x3f] }
 0x182   : > { %v919_v10 = vmul.f32 %v894_v2, %v823_v30  ;;  %7539 = vmatprep.subr.bf16.mxu1 %v11233_v29  ;;  %5884 = vst.msk [vmem:[#allocation4 + $0x20] sm:$0xff] %vm577_vm0, %v11233_v29  ;;  %5885 = vst.msk [vmem:[#allocation4 + $0x28] sm:$0xff] %vm577_vm0, %v11233_v29  ;;  %7587 = vmatprep.subr.bf16.mxu0 %v11233_v29  ;;  %v9222_v23 = vadd.f32 %v8898_v33, %v521_v45 }
 0x183   : > { %v1000_v20 = vadd.f32 %v978_v5, %v920_v4  ;;  %5886 = vst.msk [vmem:[#allocation4 + $0x30] sm:$0xff] %vm577_vm0, %v11233_v29  ;;  %5887 = vst.msk [vmem:[#allocation4 + $0x38] sm:$0xff] %vm577_vm0, %v11233_v29  ;;  %v9225_v58 = vadd.f32 %v8898_v33, %v522_v55 }
 0x184   : > { %v999_v22 = vadd.f32 %v974_v16, %v919_v10  ;;  %5888 = vst.msk [vmem:[#allocation4 + $0x40] sm:$0xff] %vm577_vm0, %v11233_v29  ;;  %5889 = vst.msk [vmem:[#allocation4 + $0x48] sm:$0xff] %vm577_vm0, %v11233_v29  ;;  %v9229_v2 = vadd.f32 1.0, %v9222_v23 }
 0x185   : > { %5890 = vst.msk [vmem:[#allocation4 + $0x50] sm:$0xff] %vm577_vm0, %v11233_v29  ;;  %5891 = vst.msk [vmem:[#allocation4 + $0x58] sm:$0xff] %vm577_vm0, %v11233_v29  ;;  %v9233_v5 = vadd.f32 1.0, %v9225_v58 }
 0x186   : > { %v9177_v57 = vpack.c.bf16 %v1000_v20, %v999_v22  ;;  %5892 = vst.msk [vmem:[#allocation4 + $0x60] sm:$0xff] %vm577_vm0, %v11233_v29  ;;  %5893 = vst.msk [vmem:[#allocation4 + $0x68] sm:$0xff] %vm577_vm0, %v11233_v29  ;;  %v902_v33 = vrot.slane %v9229_v2, %v8915_v44 }
 0x187   : > { %5894 = vst.msk [vmem:[#allocation4 + $0x70] sm:$0xff] %vm577_vm0, %v11233_v29  ;;  %5895 = vst.msk [vmem:[#allocation4 + $0x78] sm:$0xff] %vm577_vm0, %v11233_v29 }
 0x188   : > { %7119 = vmatmul.mubr.msk.bf16.gmra.mrb[16].mxu0 %vm577_vm0, %v9141_v32  ;;  %7127 = vmatmul.mubr.msk.bf16.gmra.mrb[16].mxu1 %vm577_vm0, %v9141_v32  ;;  %11340 = vst [vmem:[#allocation38_spill] sm:$0xff] %v9222_v23  ;;  %11341 = vst [vmem:[#allocation39_spill] sm:$0xff] %v9225_v58 }
 0x189   : > { %1189 = vmatprep.mubr.bf16.mxu0 %v8544_v0  ;;  %1302 = vmatprep.mubr.bf16.mxu1 %v8544_v0  ;;  %11342 = vst [vmem:[#allocation40_spill] sm:$0xff] %v9229_v2  ;;  %11343 = vst [vmem:[#allocation41_spill] sm:$0xff] %v9233_v5 }
 0x190   : > { %7120 = vmatmul.mubr.msk.bf16.gmra.mrb[20].mxu0 %vm577_vm0, %v9165_v48  ;;  %7128 = vmatmul.mubr.msk.bf16.gmra.mrb[20].mxu1 %vm577_vm0, %v9165_v48 }
 0x191   : > { %1199 = vmatprep.mubr.bf16.mxu0 %v8544_v0  ;;  %1312 = vmatprep.mubr.bf16.mxu1 %v8544_v0 }
 0x198   : > { %7121 = vmatmul.mubr.msk.bf16.gmra.mrb[24].mxu0 %vm577_vm0, %v9177_v57  ;;  %7129 = vmatmul.mubr.msk.bf16.gmra.mrb[24].mxu1 %vm577_vm0, %v9177_v57 }
 0x199   : > { %1209 = vmatprep.mubr.bf16.mxu0 %v8544_v0  ;;  %1322 = vmatprep.mubr.bf16.mxu1 %v8544_v0 }
 0x1e1   : > { %v719_v50 = vpop.xlane.xlu0 %718 }
 0x1e2   : > { %v737_v31 = vmul.f32 0.03125, %v719_v50 }
 0x1e4   : > { %v753_v37 = vadd.f32 1e-05, %v737_v31 }
 0x1e5   : > { %v722_v25 = vpop.xlane.xlu1 %721 }
 0x1e6   : > { %8218 = vrsqrt.f32 %v753_v37  ;;  %v738_v49 = vmul.f32 0.03125, %v722_v25  ;;  %v982_v37 = vrot.slane %v9222_v23, %v8901_v34  ;;  %v986_v25 = vrot.slane %v9225_v58, %v8901_v34 }
 0x1e8   : > { %v754_v63 = vadd.f32 1e-05, %v738_v49 }
 0x1ea   : > { %8220 = vrsqrt.f32 %v754_v63 }
 0x1f0   : > { %v8219_v62 = vpop.eup %8218 }
 0x1f1   : > { %v785_v30 = vmul.f32 %v8219_v62, %v8890_v21  ;;  %v906_v21 = vrot.slane %v9233_v5, %v8915_v44 }
 0x1f3   : > { %v805_v4 = vmul.f32 %v8923_v27, %v785_v30 }
 0x1f4   : > { %v8221_v10 = vpop.eup %8220 }
 0x1f5   : > { %v786_v16 = vmul.f32 %v8221_v10, %v8904_v51  ;;  %v825_v20 = vadd.f32 %v8928_v40, %v805_v4 }
 0x1f7   : > { %v806_v22 = vmul.f32 %v8923_v27, %v786_v16  ;;  %v921_v31 = vmul.f32 %v902_v33, %v825_v20 }
 0x1f9   : > { %v826_v50 = vadd.f32 %v8928_v40, %v806_v22  ;;  %v1001_v49 = vadd.f32 %v982_v37, %v921_v31 }
 0x1fb   : > { %v922_v51 = vmul.f32 %v906_v21, %v826_v50 }
 0x1fd   : > { %v1002_v63 = vadd.f32 %v986_v25, %v922_v51 }
 0x1ff   : > { %v1010_v45 = vpack.c.bf16 %v1002_v63, %v1001_v49 }
 0x201   : > { %7122 = vmatmul.mubr.msk.bf16.gmra.mrb[28].mxu0 %vm577_vm0, %v1010_v45  ;;  %7130 = vmatmul.mubr.msk.bf16.gmra.mrb[28].mxu1 %vm577_vm0, %v1010_v45 }
 0x202   : > { %1365 = vmatprep.mubr.bf16.mxu0 %v8544_v0  ;;  %7541 = vmatprep.mubr.msk.bf16.mxu1 %vm8546_vm1, %v11233_v29 }
 0x209   : > { %7131 = vmatmul.mubr.msk.bf16.vlgmr.msra.gmra.mrb[32].mxu0 %vm577_vm0, %v8983_v14 }
 0x20a   : > { %1375 = vmatprep.mubr.bf16.mxu0 %v8544_v0 }
 0x211   : > { %7132 = vmatmul.mubr.msk.bf16.gmra.mrb[36].mxu0 %vm577_vm0, %v9022_v15 }
 0x212   : > { %1385 = vmatprep.mubr.bf16.mxu0 %v8544_v0 }
 0x219   : > { %7133 = vmatmul.mubr.msk.bf16.gmra.mrb[40].mxu0 %vm577_vm0, %v9057_v56 }
 0x21a   : > { %1395 = vmatprep.mubr.bf16.mxu0 %v8544_v0 }
 0x221   : > { %7134 = vmatmul.mubr.msk.bf16.gmra.mrb[44].mxu0 %vm577_vm0, %v9094_v36 }
 0x222   : > { %1405 = vmatprep.mubr.bf16.mxu0 %v8544_v0 }
 0x229   : > { %7135 = vmatmul.mubr.msk.bf16.gmra.mrb[48].mxu0 %vm577_vm0, %v9141_v32 }
 0x22a   : > { %1415 = vmatprep.mubr.bf16.mxu0 %v8544_v0 }
 0x231   : > { %7136 = vmatmul.mubr.msk.bf16.gmra.mrb[52].mxu0 %vm577_vm0, %v9165_v48 }
 0x232   : > { %1425 = vmatprep.mubr.bf16.mxu0 %v8544_v0 }
 0x239   : > { %7137 = vmatmul.mubr.msk.bf16.gmra.mrb[56].mxu0 %vm577_vm0, %v9177_v57 }
 0x23a   : > { %1435 = vmatprep.mubr.bf16.mxu0 %v8544_v0 }
 0x23b   : > { %v1141_v34 = vpop.f32.mrb[0].mxu0  ;;  %v1254_v44 = vpop.f32.mrb[0].mxu1 }
 0x23c   : > { %v1143_v27 = vpop.f32.mrb[1].mxu0  ;;  %v1256_v40 = vpop.f32.mrb[1].mxu1 }
 0x23d   : > { %v9273_v14 = vpack.c.bf16 %v1143_v27, %v1141_v34  ;;  %v9275_v15 = vpack.c.bf16 %v1256_v40, %v1254_v44  ;;  %v1145_v56 = vpop.f32.mrb[2].mxu0  ;;  %v1258_v36 = vpop.f32.mrb[2].mxu1 }
 0x23e   : > { %v1147_v32 = vpop.f32.mrb[3].mxu0  ;;  %v1260_v55 = vpop.f32.mrb[3].mxu1 }
 0x23f   : > { %v9277_v48 = vpack.c.bf16 %v1147_v32, %v1145_v56  ;;  %v9279_v62 = vpack.c.bf16 %v1260_v55, %v1258_v36  ;;  %7540 = vmatpush3.bf16.xpose.msra.mxu1 %v9275_v15 }
 0x240   : > { %7545 = vmatprep.subr.bf16.mxu1 %v11233_v29 }
 0x241   : > { %7138 = vmatmul.mubr.msk.bf16.gmra.mrb[60].mxu0 %vm577_vm0, %v1010_v45 }
 0x242   : > { %7589 = vmatprep.mubr.msk.bf16.mxu0 %vm8546_vm1, %v11233_v29 }
 0x243   : > { %v1151_v0 = vpop.f32.mrb[4].mxu0  ;;  %v1264_v57 = vpop.f32.mrb[4].mxu1 }
 0x244   : > { %v1153_v30 = vpop.f32.mrb[5].mxu0  ;;  %v1266_v4 = vpop.f32.mrb[5].mxu1 }
 0x245   : > { %v9286_v10 = vpack.c.bf16 %v1153_v30, %v1151_v0  ;;  %v9288_v16 = vpack.c.bf16 %v1266_v4, %v1264_v57  ;;  %v1155_v20 = vpop.f32.mrb[6].mxu0  ;;  %v1268_v33 = vpop.f32.mrb[6].mxu1 }
 0x246   : > { %v1157_v22 = vpop.f32.mrb[7].mxu0  ;;  %v1270_v21 = vpop.f32.mrb[7].mxu1  ;;  %7542 = vmatmul.mubr.bf16.vlgmr.msra.gmra.mrb[32].mxu1 %v9273_v14 }
 0x247   : > { %v9291_v50 = vpack.c.bf16 %v1157_v22, %v1155_v20  ;;  %v9293_v31 = vpack.c.bf16 %v1270_v21, %v1268_v33  ;;  %7546 = vmatpush3.bf16.xpose.msra.mxu1 %v9279_v62  ;;  %7547 = vmatprep.mubr.msk.bf16.mxu1 %vm8546_vm1, %v11233_v29 }
 0x248   : > { %7551 = vmatprep.subr.bf16.mxu1 %v11233_v29 }
 0x24b   : > { %v1161_v37 = vpop.f32.mrb[8].mxu0  ;;  %v1274_v25 = vpop.f32.mrb[8].mxu1 }
 0x24c   : > { %v1163_v51 = vpop.f32.mrb[9].mxu0  ;;  %v1276_v49 = vpop.f32.mrb[9].mxu1 }
 0x24d   : > { %v9299_v63 = vpack.c.bf16 %v1163_v51, %v1161_v37  ;;  %v9301_v45 = vpack.c.bf16 %v1276_v49, %v1274_v25  ;;  %v1165_v34 = vpop.f32.mrb[10].mxu0  ;;  %v1278_v44 = vpop.f32.mrb[10].mxu1 }
 0x24e   : > { %v1167_v27 = vpop.f32.mrb[11].mxu0  ;;  %v1280_v40 = vpop.f32.mrb[11].mxu1  ;;  %7548 = vmatmul.mubr.bf16.vlgmr.msra.gmra.mrb[36].mxu1 %v9277_v48 }
 0x24f   : > { %v9304_v56 = vpack.c.bf16 %v1167_v27, %v1165_v34  ;;  %v9306_v36 = vpack.c.bf16 %v1280_v40, %v1278_v44  ;;  %7552 = vmatpush3.bf16.xpose.msra.mxu1 %v9288_v16  ;;  %7553 = vmatprep.mubr.msk.bf16.mxu1 %vm8546_vm1, %v11233_v29 }
 0x250   : > { %7557 = vmatprep.subr.bf16.mxu1 %v11233_v29 }
 0x253   : > { %v1171_v32 = vpop.f32.mrb[12].mxu0  ;;  %v1284_v55 = vpop.f32.mrb[12].mxu1 }
 0x254   : > { %v1173_v0 = vpop.f32.mrb[13].mxu0  ;;  %v1286_v57 = vpop.f32.mrb[13].mxu1 }
 0x255   : > { %v9312_v30 = vpack.c.bf16 %v1173_v0, %v1171_v32  ;;  %v9314_v4 = vpack.c.bf16 %v1286_v57, %v1284_v55  ;;  %v1175_v20 = vpop.f32.mrb[14].mxu0  ;;  %v1288_v33 = vpop.f32.mrb[14].mxu1 }
 0x256   : > { %v1177_v22 = vpop.f32.mrb[15].mxu0  ;;  %v1290_v21 = vpop.f32.mrb[15].mxu1  ;;  %7554 = vmatmul.mubr.bf16.vlgmr.msra.gmra.mrb[40].mxu1 %v9286_v10 }
 0x257   : > { %v9317_v37 = vpack.c.bf16 %v1177_v22, %v1175_v20  ;;  %v9319_v25 = vpack.c.bf16 %v1290_v21, %v1288_v33  ;;  %7558 = vmatpush3.bf16.xpose.msra.mxu1 %v9293_v31  ;;  %7559 = vmatprep.mubr.msk.bf16.mxu1 %vm8546_vm1, %v11233_v29 }
 0x258   : > { %7563 = vmatprep.subr.bf16.mxu1 %v11233_v29 }
 0x25b   : > { %v1181_v51 = vpop.f32.mrb[16].mxu0  ;;  %v1294_v49 = vpop.f32.mrb[16].mxu1 }
 0x25c   : > { %v1183_v34 = vpop.f32.mrb[17].mxu0  ;;  %v1296_v44 = vpop.f32.mrb[17].mxu1 }
 0x25d   : > { %v9325_v27 = vpack.c.bf16 %v1183_v34, %v1181_v51  ;;  %v9327_v40 = vpack.c.bf16 %v1296_v44, %v1294_v49  ;;  %v1185_v32 = vpop.f32.mrb[18].mxu0  ;;  %v1298_v55 = vpop.f32.mrb[18].mxu1 }
 0x25e   : > { %v1187_v0 = vpop.f32.mrb[19].mxu0  ;;  %v1300_v57 = vpop.f32.mrb[19].mxu1  ;;  %7560 = vmatmul.mubr.bf16.vlgmr.msra.gmra.mrb[44].mxu1 %v9291_v50 }
 0x25f   : > { %v9330_v20 = vpack.c.bf16 %v1187_v0, %v1185_v32  ;;  %v9332_v33 = vpack.c.bf16 %v1300_v57, %v1298_v55  ;;  %7564 = vmatpush3.bf16.xpose.msra.mxu1 %v9301_v45  ;;  %7588 = vmatpush3.bf16.xpose.msra.mxu0 %v9327_v40 }
 0x260   : > { %7565 = vmatprep.mubr.msk.bf16.mxu1 %vm8546_vm1, %v11233_v29  ;;  %7569 = vmatprep.subr.bf16.mxu1 %v11233_v29 }
 0x261   : > { %7599 = vmatprep.subr.bf16.mxu0 %v11233_v29 }
 0x263   : > { %v1191_v22 = vpop.f32.mrb[20].mxu0  ;;  %v1304_v21 = vpop.f32.mrb[20].mxu1 }
 0x264   : > { %v1193_v51 = vpop.f32.mrb[21].mxu0  ;;  %v1306_v49 = vpop.f32.mrb[21].mxu1 }
 0x265   : > { %v9340_v34 = vpack.c.bf16 %v1193_v51, %v1191_v22  ;;  %v9342_v44 = vpack.c.bf16 %v1306_v49, %v1304_v21  ;;  %v1195_v32 = vpop.f32.mrb[22].mxu0  ;;  %v1308_v55 = vpop.f32.mrb[22].mxu1 }
 0x266   : > { %v1197_v0 = vpop.f32.mrb[23].mxu0  ;;  %v1310_v57 = vpop.f32.mrb[23].mxu1  ;;  %7566 = vmatmul.mubr.bf16.vlgmr.msra.gmra.mrb[48].mxu1 %v9299_v63  ;;  %7590 = vmatmul.mubr.bf16.vlgmr.msra.gmra.mrb[64].mxu0 %v9325_v27 }
 0x267   : > { %11344 = vst [vmem:[#allocation42_spill] sm:$0xff] %v9340_v34  ;;  %v9346_v5 = vpack.c.bf16 %v1197_v0, %v1195_v32  ;;  %v9348_v2 = vpack.c.bf16 %v1310_v57, %v1308_v55  ;;  %7570 = vmatpush3.bf16.xpose.msra.mxu1 %v9306_v36  ;;  %7600 = vmatpush3.bf16.xpose.msra.mxu0 %v9342_v44 }
 0x268   : > { %7571 = vmatprep.mubr.msk.bf16.mxu1 %vm8546_vm1, %v11233_v29  ;;  %7601 = vmatprep.mubr.msk.bf16.mxu0 %vm8546_vm1, %v11233_v29 }
 0x269   : > { %11345 = vst [vmem:[#allocation43_spill] sm:$0xff] %v9346_v5  ;;  %11346 = vst [vmem:[#allocation44_spill] sm:$0xff] %v9348_v2  ;;  %7575 = vmatprep.subr.bf16.mxu1 %v11233_v29  ;;  %7611 = vmatprep.subr.bf16.mxu0 %v11233_v29 }
 0x26b   : > { %v1201_v22 = vpop.f32.mrb[24].mxu0  ;;  %v1314_v21 = vpop.f32.mrb[24].mxu1 }
 0x26c   : > { %v1203_v51 = vpop.f32.mrb[25].mxu0  ;;  %v1316_v49 = vpop.f32.mrb[25].mxu1 }
 0x26d   : > { %v9358_v32 = vpack.c.bf16 %v1203_v51, %v1201_v22  ;;  %v9360_v55 = vpack.c.bf16 %v1316_v49, %v1314_v21  ;;  %v1205_v0 = vpop.f32.mrb[26].mxu0  ;;  %v1318_v57 = vpop.f32.mrb[26].mxu1 }
 0x26e   : > { %v1207_v7 = vpop.f32.mrb[27].mxu0  ;;  %v1320_v52 = vpop.f32.mrb[27].mxu1  ;;  %7572 = vmatmul.mubr.bf16.vlgmr.msra.gmra.mrb[52].mxu1 %v9304_v56  ;;  %7602 = vmatmul.mubr.bf16.vlgmr.msra.gmra.mrb[68].mxu0 %v9340_v34 }
 0x26f   : > { %11347 = vst [vmem:[#allocation45_spill] sm:$0xff] %v9358_v32  ;;  %11348 = vst [vmem:[#allocation46_spill] sm:$0xff] %v9360_v55  ;;  %v9364_v26 = vpack.c.bf16 %v1207_v7, %v1205_v0  ;;  %v9366_v38 = vpack.c.bf16 %v1320_v52, %v1318_v57  ;;  %7576 = vmatpush3.bf16.xpose.msra.mxu1 %v9314_v4  ;;  %7612 = vmatpush3.bf16.xpose.msra.mxu0 %v9360_v55 }
 0x270   : > { %7577 = vmatprep.mubr.msk.bf16.mxu1 %vm8546_vm1, %v11233_v29  ;;  %7613 = vmatprep.mubr.msk.bf16.mxu0 %vm8546_vm1, %v11233_v29 }
 0x271   : > { %11349 = vst [vmem:[#allocation47_spill] sm:$0xff] %v9364_v26  ;;  %11350 = vst [vmem:[#allocation48_spill] sm:$0xff] %v9366_v38  ;;  %7581 = vmatprep.subr.bf16.mxu1 %v11233_v29  ;;  %7623 = vmatprep.subr.bf16.mxu0 %v11233_v29 }
 0x276   : > { %7578 = vmatmul.mubr.bf16.vlgmr.msra.gmra.mrb[56].mxu1 %v9312_v30  ;;  %7614 = vmatmul.mubr.bf16.vlgmr.msra.gmra.mrb[72].mxu0 %v9358_v32 }
 0x277   : > { %7582 = vmatpush3.bf16.xpose.msra.mxu1 %v9319_v25  ;;  %7583 = vmatprep.mubr.msk.bf16.mxu1 %vm8546_vm1, %v11233_v29 }
 0x278   : > { %7593 = vmatprep.subr.bf16.mxu1 %v11233_v29  ;;  %7625 = vmatprep.mubr.msk.bf16.mxu0 %vm8546_vm1, %v11233_v29 }
 0x27e   : > { %7584 = vmatmul.mubr.bf16.vlgmr.msra.gmra.mrb[60].mxu1 %v9317_v37 }
 0x27f   : > { %7594 = vmatpush3.bf16.xpose.msra.mxu1 %v9332_v33  ;;  %7595 = vmatprep.mubr.msk.bf16.mxu1 %vm8546_vm1, %v11233_v29 }
 0x280   : > { %7605 = vmatprep.subr.bf16.mxu1 %v11233_v29 }
 0x286   : > { %7596 = vmatmul.mubr.bf16.vlgmr.msra.gmra.mrb[64].mxu1 %v9330_v20 }
 0x287   : > { %7606 = vmatpush3.bf16.xpose.msra.mxu1 %v9348_v2  ;;  %7607 = vmatprep.mubr.msk.bf16.mxu1 %vm8546_vm1, %v11233_v29 }
 0x288   : > { %7617 = vmatprep.subr.bf16.mxu1 %v11233_v29 }
 0x28e   : > { %7608 = vmatmul.mubr.bf16.vlgmr.msra.gmra.mrb[68].mxu1 %v9346_v5 }
 0x28f   : > { %7618 = vmatpush3.bf16.xpose.msra.mxu1 %v9366_v38  ;;  %7619 = vmatprep.mubr.msk.bf16.mxu1 %vm8546_vm1, %v11233_v29 }
 0x290   : > { %7629 = vmatprep.subr.bf16.mxu1 %v11233_v29 }
 0x296   : > { %7620 = vmatmul.mubr.bf16.vlgmr.msra.gmra.mrb[72].mxu1 %v9364_v26 }
 0x297   : > { %7631 = vmatprep.mubr.msk.bf16.mxu1 %vm8546_vm1, %v11233_v29 }
 0x2d4   : > { %v1211_v7 = vpop.f32.mrb[28].mxu0  ;;  %v1324_v52 = vpop.f32.mrb[28].mxu1 }
 0x2d5   : > { %v1213_v22 = vpop.f32.mrb[29].mxu0  ;;  %v1326_v21 = vpop.f32.mrb[29].mxu1 }
 0x2d6   : > { %v9402_v51 = vpack.c.bf16 %v1213_v22, %v1211_v7  ;;  %v9404_v49 = vpack.c.bf16 %v1326_v21, %v1324_v52  ;;  %v1215_v0 = vpop.f32.mrb[30].mxu0  ;;  %v1328_v57 = vpop.f32.mrb[30].mxu1 }
 0x2d7   : > { %v1217_v1 = vpop.f32.mrb[31].mxu0  ;;  %v1330_v61 = vpop.f32.mrb[31].mxu1 }
 0x2d8   : > { %11351 = vst [vmem:[#allocation49_spill] sm:$0xff] %v9402_v51  ;;  %11352 = vst [vmem:[#allocation50_spill] sm:$0xff] %v9404_v49  ;;  %v9406_v8 = vpack.c.bf16 %v1217_v1, %v1215_v0  ;;  %v9408_v59 = vpack.c.bf16 %v1330_v61, %v1328_v57  ;;  %7624 = vmatpush3.bf16.xpose.msra.mxu0 %v9404_v49 }
 0x2d9   : > { %7635 = vmatprep.subr.bf16.mxu0 %v11233_v29 }
 0x2da   : > { %11353 = vst [vmem:[#allocation51_spill] sm:$0xff] %v9406_v8  ;;  %11354 = vst [vmem:[#allocation52_spill] sm:$0xff] %v9408_v59  ;;  %7630 = vmatpush3.bf16.xpose.msra.mxu1 %v9408_v59 }
 0x2db   : > { %7641 = vmatprep.subr.bf16.mxu1 %v11233_v29 }
 0x2dc   : > { %v1367_v7 = vpop.f32.mrb[32].mxu0 }
 0x2dd   : > { %v1369_v22 = vpop.f32.mrb[33].mxu0 }
 0x2de   : > { %v7326_v52 = vpack.c.bf16 %v1369_v22, %v1367_v7  ;;  %v1371_v21 = vpop.f32.mrb[34].mxu0 }
 0x2df   : > { %v1373_v17 = vpop.f32.mrb[35].mxu0  ;;  %7626 = vmatmul.mubr.bf16.vlgmr.msra.gmra.mrb[76].mxu0 %v9402_v51 }
 0x2e0   : > { %v2572_v1 = vsel %vm2570_vm2, %v7326_v52, 0  ;;  %v4240_v61 = vrot.slane %v7326_v52, 4  ;;  %v7327_v0 = vpack.c.bf16 %v1373_v17, %v1371_v21  ;;  %7637 = vmatprep.mubr.msk.bf16.mxu0 %vm8546_vm1, %v11233_v29 }
 0x2e1   : > { %7632 = vmatmul.mubr.bf16.vlgmr.msra.gmra.mrb[76].mxu1 %v9406_v8  ;;  %7636 = vmatpush3.bf16.msra.mxu0 %v2572_v1 }
 0x2e2   : > { %v2618_v57 = vsel %vm2570_vm2, %v7327_v0, 0  ;;  %v4287_v13 = vrot.slane %v7327_v0, 4  ;;  %7647 = vmatprep.subr.bf16.mxu0 %v11233_v29  ;;  %7643 = vmatprep.mubr.msk.bf16.mxu1 %vm8546_vm1, %v11233_v29  ;;  %v9424_v7 = vsel %vm2570_vm2, %v4240_v61, 0 }
 0x2e3   : > { %11355 = vst [vmem:[#allocation53_spill] sm:$0xff] %v9424_v7  ;;  %7642 = vmatpush3.bf16.msra.mxu1 %v2618_v57 }
 0x2e4   : > { %v1377_v22 = vpop.f32.mrb[36].mxu0  ;;  %7653 = vmatprep.subr.bf16.mxu1 %v11233_v29  ;;  %v9428_v17 = vsel %vm2570_vm2, %v4287_v13, 0 }
 0x2e5   : > { %11356 = vst [vmem:[#allocation54_spill] sm:$0xff] %v9428_v17  ;;  %v1379_v52 = vpop.f32.mrb[37].mxu0 }
 0x2e6   : > { %v7328_v21 = vpack.c.bf16 %v1379_v52, %v1377_v22  ;;  %v1381_v1 = vpop.f32.mrb[38].mxu0 }
 0x2e7   : > { %v1383_v54 = vpop.f32.mrb[39].mxu0 }
 0x2e8   : > { %v9431_v0 = vsel %vm2570_vm2, %v7328_v21, 0  ;;  %v4334_v35 = vrot.slane %v7328_v21, 4  ;;  %v7329_v3 = vpack.c.bf16 %v1383_v54, %v1381_v1 }
 0x2ea   : > { %v9434_v60 = vsel %vm2570_vm2, %v7329_v3, 0  ;;  %v4381_v61 = vrot.slane %v7329_v3, 4  ;;  %v9437_v57 = vsel %vm2570_vm2, %v4334_v35, 0 }
 0x2eb   : > { %11357 = vst [vmem:[#allocation55_spill] sm:$0xff] %v9437_v57 }
 0x2ec   : > { %v1387_v29 = vpop.f32.mrb[40].mxu0  ;;  %v9440_v13 = vsel %vm2570_vm2, %v4381_v61, 0 }
 0x2ed   : > { %11358 = vst [vmem:[#allocation56_spill] sm:$0xff] %v9440_v13  ;;  %v1389_v11 = vpop.f32.mrb[41].mxu0 }
 0x2ee   : > { %v7330_v22 = vpack.c.bf16 %v1389_v11, %v1387_v29  ;;  %v1391_v52 = vpop.f32.mrb[42].mxu0 }
 0x2ef   : > { %v1393_v58 = vpop.f32.mrb[43].mxu0 }
 0x2f0   : > { %v9443_v18 = vsel %vm2570_vm2, %v7330_v22, 0  ;;  %v4428_v21 = vrot.slane %v7330_v22, 4  ;;  %v7331_v54 = vpack.c.bf16 %v1393_v58, %v1391_v52 }
 0x2f2   : > { %v9446_v1 = vsel %vm2570_vm2, %v7331_v54, 0  ;;  %v4475_v3 = vrot.slane %v7331_v54, 4  ;;  %v9449_v35 = vsel %vm2570_vm2, %v4428_v21, 0 }
 0x2f3   : > { %11359 = vst [vmem:[#allocation57_spill] sm:$0xff] %v9449_v35 }
 0x2f4   : > { %v1397_v23 = vpop.f32.mrb[44].mxu0  ;;  %v9452_v61 = vsel %vm2570_vm2, %v4475_v3, 0 }
 0x2f5   : > { %11360 = vst [vmem:[#allocation58_spill] sm:$0xff] %v9452_v61  ;;  %v1399_v42 = vpop.f32.mrb[45].mxu0 }
 0x2f6   : > { %v7332_v11 = vpack.c.bf16 %v1399_v42, %v1397_v23  ;;  %v1401_v29 = vpop.f32.mrb[46].mxu0 }
 0x2f7   : > { %v1403_v12 = vpop.f32.mrb[47].mxu0 }
 0x2f8   : > { %v9455_v39 = vsel %vm2570_vm2, %v7332_v11, 0  ;;  %v4522_v22 = vrot.slane %v7332_v11, 4  ;;  %v7333_v58 = vpack.c.bf16 %v1403_v12, %v1401_v29 }
 0x2fa   : > { %v9458_v52 = vsel %vm2570_vm2, %v7333_v58, 0  ;;  %v4569_v54 = vrot.slane %v7333_v58, 4  ;;  %v9461_v21 = vsel %vm2570_vm2, %v4522_v22, 0 }
 0x2fb   : > { %11361 = vst [vmem:[#allocation59_spill] sm:$0xff] %v9461_v21 }
 0x2fc   : > { %v1407_v6 = vpop.f32.mrb[48].mxu0  ;;  %v9464_v3 = vsel %vm2570_vm2, %v4569_v54, 0 }
 0x2fd   : > { %11362 = vst [vmem:[#allocation60_spill] sm:$0xff] %v9464_v3  ;;  %v1409_v53 = vpop.f32.mrb[49].mxu0 }
 0x2fe   : > { %v7334_v42 = vpack.c.bf16 %v1409_v53, %v1407_v6  ;;  %v1411_v23 = vpop.f32.mrb[50].mxu0 }
 0x2ff   : > { %v1413_v41 = vpop.f32.mrb[51].mxu0 }
 0x300   : > { %v9467_v46 = vsel %vm2570_vm2, %v7334_v42, 0  ;;  %v4616_v11 = vrot.slane %v7334_v42, 4  ;;  %v7335_v12 = vpack.c.bf16 %v1413_v41, %v1411_v23 }
 0x302   : > { %v9470_v29 = vsel %vm2570_vm2, %v7335_v12, 0  ;;  %v4663_v58 = vrot.slane %v7335_v12, 4  ;;  %v9473_v22 = vsel %vm2570_vm2, %v4616_v11, 0 }
 0x303   : > { %11363 = vst [vmem:[#allocation61_spill] sm:$0xff] %v9473_v22 }
 0x304   : > { %v1417_v28 = vpop.f32.mrb[52].mxu0  ;;  %v9476_v54 = vsel %vm2570_vm2, %v4663_v58, 0 }
 0x305   : > { %11364 = vst [vmem:[#allocation62_spill] sm:$0xff] %v9476_v54  ;;  %v1419_v47 = vpop.f32.mrb[53].mxu0 }
 0x306   : > { %v7336_v53 = vpack.c.bf16 %v1419_v47, %v1417_v28  ;;  %v1421_v6 = vpop.f32.mrb[54].mxu0 }
 0x307   : > { %v1423_v24 = vpop.f32.mrb[55].mxu0 }
 0x308   : > { %v9479_v43 = vsel %vm2570_vm2, %v7336_v53, 0  ;;  %v4710_v42 = vrot.slane %v7336_v53, 4  ;;  %v7337_v41 = vpack.c.bf16 %v1423_v24, %v1421_v6 }
 0x30a   : > { %v9482_v23 = vsel %vm2570_vm2, %v7337_v41, 0  ;;  %v4757_v12 = vrot.slane %v7337_v41, 4  ;;  %v9485_v11 = vsel %vm2570_vm2, %v4710_v42, 0 }
 0x30b   : > { %11365 = vst [vmem:[#allocation63_spill] sm:$0xff] %v9485_v11 }
 0x30c   : > { %v1427_v9 = vpop.f32.mrb[56].mxu0  ;;  %v9488_v58 = vsel %vm2570_vm2, %v4757_v12, 0 }
 0x30d   : > { %11366 = vst [vmem:[#allocation64_spill] sm:$0xff] %v9488_v58  ;;  %v1429_v19 = vpop.f32.mrb[57].mxu0 }
 0x30e   : > { %v7338_v47 = vpack.c.bf16 %v1429_v19, %v1427_v9  ;;  %v1431_v28 = vpop.f32.mrb[58].mxu0 }
 0x30f   : > { %v1433_v54 = vpop.f32.mrb[59].mxu0 }
 0x310   : > { %v9491_v22 = vsel %vm2570_vm2, %v7338_v47, 0  ;;  %v4804_v53 = vrot.slane %v7338_v47, 4  ;;  %v7339_v24 = vpack.c.bf16 %v1433_v54, %v1431_v28 }
 0x312   : > { %v9494_v6 = vsel %vm2570_vm2, %v7339_v24, 0  ;;  %v4851_v41 = vrot.slane %v7339_v24, 4  ;;  %v9497_v42 = vsel %vm2570_vm2, %v4804_v53, 0 }
 0x313   : > { %11367 = vst [vmem:[#allocation65_spill] sm:$0xff] %v9497_v42 }
 0x314   : > { %v1437_v11 = vpop.f32.mrb[60].mxu0  ;;  %v9500_v12 = vsel %vm2570_vm2, %v4851_v41, 0 }
 0x315   : > { %11368 = vst [vmem:[#allocation66_spill] sm:$0xff] %v9500_v12  ;;  %v1439_v58 = vpop.f32.mrb[61].mxu0 }
 0x316   : > { %v7340_v19 = vpack.c.bf16 %v1439_v58, %v1437_v11  ;;  %v1441_v9 = vpop.f32.mrb[62].mxu0 }
 0x317   : > { %v1443_v3 = vpop.f32.mrb[63].mxu0 }
 0x318   : > { %v9503_v21 = vsel %vm2570_vm2, %v7340_v19, 0  ;;  %v4898_v47 = vrot.slane %v7340_v19, 4  ;;  %v7341_v54 = vpack.c.bf16 %v1443_v3, %v1441_v9 }
 0x319   : > { %v1752_v28 = vpop.f32.mrb[32].mxu1 }
 0x31a   : > { %v9506_v24 = vsel %vm2570_vm2, %v7341_v54, 0  ;;  %v4945_v53 = vrot.slane %v7341_v54, 4  ;;  %v9508_v42 = vmul.f32 0.25, %v1752_v28  ;;  %v7543_v61 = vpop.f32.mrb[33].mxu1  ;;  %v9511_v41 = vsel %vm2570_vm2, %v4898_v47, 0 }
 0x31b   : > { %11369 = vst [vmem:[#allocation67_spill] sm:$0xff] %v9511_v41  ;;  %v1755_v11 = vpop.f32.mrb[34].mxu1 }
 0x31c   : > { %v7544_v58 = vpop.f32.mrb[35].mxu1  ;;  %v2375_v12 = vsel %vm2374_vm3, %v9508_v42, -inf  ;;  %v9516_v19 = vsel %vm2570_vm2, %v4945_v53, 0 }
 0x31d   : > { %11370 = vst [vmem:[#allocation68_spill] sm:$0xff] %v9516_v19  ;;  %2376 = vmax.xlane.f32.xlu0 %v2375_v12 }
 0x321   : > { %v1792_v3 = vpop.f32.mrb[36].mxu1 }
 0x322   : > { %v9518_v9 = vmul.f32 0.25, %v1792_v3  ;;  %v7549_v35 = vpop.f32.mrb[37].mxu1 }
 0x323   : > { %v1795_v54 = vpop.f32.mrb[38].mxu1 }
 0x324   : > { %v7550_v28 = vpop.f32.mrb[39].mxu1  ;;  %v2378_v61 = vsel %vm2374_vm3, %v9518_v9, -inf }
 0x325   : > { %2379 = vmax.xlane.f32.xlu1 %v2378_v61 }
 0x329   : > { %v1832_v47 = vpop.f32.mrb[40].mxu1 }
 0x32a   : > { %v9522_v11 = vmul.f32 0.25, %v1832_v47  ;;  %v7555_v58 = vpop.f32.mrb[41].mxu1 }
 0x32b   : > { %v1835_v41 = vpop.f32.mrb[42].mxu1 }
 0x32c   : > { %v7556_v13 = vpop.f32.mrb[43].mxu1  ;;  %v2381_v53 = vsel %vm2374_vm3, %v9522_v11, -inf }
 0x32d   : > { %2382 = vmax.xlane.f32.xlu0 %v2381_v53 }
 0x331   : > { %v1872_v12 = vpop.f32.mrb[44].mxu1 }
 0x332   : > { %v9526_v3 = vmul.f32 0.25, %v1872_v12  ;;  %v7561_v35 = vpop.f32.mrb[45].mxu1 }
 0x333   : > { %v1875_v54 = vpop.f32.mrb[46].mxu1 }
 0x334   : > { %v7562_v28 = vpop.f32.mrb[47].mxu1  ;;  %v2384_v19 = vsel %vm2374_vm3, %v9526_v3, -inf }
 0x335   : > { %2385 = vmax.xlane.f32.xlu1 %v2384_v19 }
 0x339   : > { %v1912_v61 = vpop.f32.mrb[48].mxu1  ;;  %v2072_v47 = vpop.f32.mrb[64].mxu0 }
 0x33a   : > { %v9530_v57 = vmul.f32 0.25, %v1912_v61  ;;  %v7567_v41 = vpop.f32.mrb[49].mxu1  ;;  %v7591_v13 = vpop.f32.mrb[65].mxu0 }
 0x33b   : > { %v1915_v58 = vpop.f32.mrb[50].mxu1  ;;  %v2075_v17 = vpop.f32.mrb[66].mxu0 }
 0x33c   : > { %v7568_v7 = vpop.f32.mrb[51].mxu1  ;;  %v7592_v53 = vpop.f32.mrb[67].mxu0  ;;  %v2387_v12 = vsel %vm2374_vm3, %v9530_v57, -inf }
 0x33d   : > { %2388 = vmax.xlane.f32.xlu0 %v2387_v12 }
 0x341   : > { %v1952_v35 = vpop.f32.mrb[52].mxu1  ;;  %v2152_v54 = vpop.f32.mrb[68].mxu0 }
 0x342   : > { %v9534_v28 = vmul.f32 0.25, %v1952_v35  ;;  %v7573_v8 = vpop.f32.mrb[53].mxu1  ;;  %v7603_v19 = vpop.f32.mrb[69].mxu0  ;;  %v9540_v35 = vmul.f32 0.25, %v2072_v47 }
 0x343   : > { %v1955_v51 = vpop.f32.mrb[54].mxu1  ;;  %v2155_v59 = vpop.f32.mrb[70].mxu0 }
 0x344   : > { %v7574_v61 = vpop.f32.mrb[55].mxu1  ;;  %v7604_v26 = vpop.f32.mrb[71].mxu0  ;;  %v2390_v41 = vsel %vm2374_vm3, %v9534_v28, -inf  ;;  %v2399_v51 = vsel %vm2374_vm3, %v9540_v35, -inf }
 0x345   : > { %2391 = vmax.xlane.f32.xlu1 %v2390_v41  ;;  %v9544_v26 = vmul.f32 0.25, %v2152_v54 }
 0x349   : > { %v1992_v7 = vpop.f32.mrb[56].mxu1  ;;  %v2232_v17 = vpop.f32.mrb[72].mxu0 }
 0x34a   : > { %v9538_v13 = vmul.f32 0.25, %v1992_v7  ;;  %v7579_v58 = vpop.f32.mrb[57].mxu1  ;;  %v7615_v53 = vpop.f32.mrb[73].mxu0 }
 0x34b   : > { %v1995_v12 = vpop.f32.mrb[58].mxu1  ;;  %v2235_v49 = vpop.f32.mrb[74].mxu0 }
 0x34c   : > { %v7580_v8 = vpop.f32.mrb[59].mxu1  ;;  %v7616_v19 = vpop.f32.mrb[75].mxu0  ;;  %v2393_v59 = vsel %vm2374_vm3, %v9538_v13, -inf  ;;  %v9550_v49 = vmul.f32 0.25, %v2232_v17  ;;  %v2405_v12 = vsel %vm2374_vm3, %v9544_v26, -inf }
 0x34d   : > { %2394 = vmax.xlane.f32.xlu0 %v2393_v59 }
 0x34e   : > { %v2411_v54 = vsel %vm2374_vm3, %v9550_v49, -inf }
 0x351   : > { %v2032_v61 = vpop.f32.mrb[60].mxu1  ;;  %2400 = vmax.xlane.f32.xlu0 %v2399_v51 }
 0x352   : > { %v9548_v41 = vmul.f32 0.25, %v2032_v61  ;;  %v7585_v7 = vpop.f32.mrb[61].mxu1 }
 0x353   : > { %v2035_v58 = vpop.f32.mrb[62].mxu1 }
 0x354   : > { %v7586_v47 = vpop.f32.mrb[63].mxu1  ;;  %v2396_v53 = vsel %vm2374_vm3, %v9548_v41, -inf }
 0x355   : > { %2397 = vmax.xlane.f32.xlu1 %v2396_v53  ;;  %2406 = vmax.xlane.f32.xlu0 %v2405_v12 }
 0x359   : > { %v2112_v8 = vpop.f32.mrb[64].mxu1  ;;  %2412 = vmax.xlane.f32.xlu0 %v2411_v54 }
 0x35a   : > { %v9558_v19 = vmul.f32 0.25, %v2112_v8  ;;  %v7597_v59 = vpop.f32.mrb[65].mxu1 }
 0x35b   : > { %v2115_v51 = vpop.f32.mrb[66].mxu1 }
 0x35c   : > { %v7598_v17 = vpop.f32.mrb[67].mxu1  ;;  %v2402_v61 = vsel %vm2374_vm3, %v9558_v19, -inf }
 0x35d   : > { %2403 = vmax.xlane.f32.xlu1 %v2402_v61 }
 0x361   : > { %v2192_v7 = vpop.f32.mrb[68].mxu1 }
 0x362   : > { %v9562_v58 = vmul.f32 0.25, %v2192_v7  ;;  %v7609_v47 = vpop.f32.mrb[69].mxu1 }
 0x363   : > { %v2195_v53 = vpop.f32.mrb[70].mxu1 }
 0x364   : > { %v7610_v12 = vpop.f32.mrb[71].mxu1  ;;  %v2408_v32 = vsel %vm2374_vm3, %v9562_v58, -inf }
 0x365   : > { %2409 = vmax.xlane.f32.xlu1 %v2408_v32 }
 0x369   : > { %v2272_v54 = vpop.f32.mrb[72].mxu1 }
 0x36a   : > { %v9566_v8 = vmul.f32 0.25, %v2272_v54  ;;  %v7621_v59 = vpop.f32.mrb[73].mxu1 }
 0x36b   : > { %v2275_v51 = vpop.f32.mrb[74].mxu1 }
 0x36c   : > { %v7622_v17 = vpop.f32.mrb[75].mxu1  ;;  %v2414_v38 = vsel %vm2374_vm3, %v9566_v8, -inf }
 0x36d   : > { %2415 = vmax.xlane.f32.xlu1 %v2414_v38 }
 0x3aa   : > { %v2377_v61 = vpop.xlane.xlu0 %2376 }
 0x3ab   : > { %v2423_v7 = vsub.f32 %v9508_v42, %v2377_v61 }
 0x3ad   : > { %v2439_v47 = vmul.f32 1.442695, %v2423_v7 }
 0x3af   : > { %8222 = vpow2.f32 %v2439_v47 }
 0x3b2   : > { %v2380_v53 = vpop.xlane.xlu1 %2379  ;;  %v2312_v12 = vpop.f32.mrb[76].mxu0 }
 0x3b3   : > { %v2424_v5 = vsub.f32 %v9518_v9, %v2380_v53  ;;  %v9572_v32 = vmul.f32 0.25, %v2312_v12  ;;  %v7627_v54 = vpop.f32.mrb[77].mxu0 }
 0x3b4   : > { %v2315_v55 = vpop.f32.mrb[78].mxu0  ;;  %v2352_v59 = vpop.f32.mrb[76].mxu1 }
 0x3b5   : > { %v2441_v51 = vmul.f32 1.442695, %v2424_v5  ;;  %v9574_v17 = vmul.f32 0.25, %v2352_v59  ;;  %v7628_v34 = vpop.f32.mrb[79].mxu0  ;;  %v7633_v2 = vpop.f32.mrb[77].mxu1  ;;  %v2417_v38 = vsel %vm2374_vm3, %v9572_v32, -inf }
 0x3b6   : > { %v2355_v42 = vpop.f32.mrb[78].mxu1  ;;  %2418 = vmax.xlane.f32.xlu0 %v2417_v38 }
 0x3b7   : > { %8224 = vpow2.f32 %v2441_v51  ;;  %v7634_v61 = vpop.f32.mrb[79].mxu1  ;;  %v2420_v9 = vsel %vm2374_vm3, %v9574_v17, -inf }
 0x3b8   : > { %2421 = vmax.xlane.f32.xlu1 %v2420_v9 }
 0x3b9   : > { %v9580_v7 = vpop.eup %8222 }
 0x3ba   : > { %v2383_v55 = vpop.xlane.xlu0 %2382  ;;  %v2471_v5 = vsel %vm2374_vm3, %v9580_v7, 0.0 }
 0x3bb   : > { %v2425_v34 = vsub.f32 %v9522_v11, %v2383_v55  ;;  %2472 = vadd.xlane.f32.xlu0 %v2471_v5 }
 0x3bd   : > { %v2443_v2 = vmul.f32 1.442695, %v2425_v34 }
 0x3bf   : > { %8226 = vpow2.f32 %v2443_v2 }
 0x3c1   : > { %v9585_v47 = vpop.eup %8224 }
 0x3c2   : > { %v2386_v53 = vpop.xlane.xlu1 %2385  ;;  %v2474_v12 = vsel %vm2374_vm3, %v9585_v47, 0.0 }
 0x3c3   : > { %v2426_v54 = vsub.f32 %v9526_v3, %v2386_v53  ;;  %2475 = vadd.xlane.f32.xlu1 %v2474_v12 }
 0x3c5   : > { %v2445_v59 = vmul.f32 1.442695, %v2426_v54 }
 0x3c7   : > { %8228 = vpow2.f32 %v2445_v59 }
 0x3c9   : > { %v9590_v51 = vpop.eup %8226 }
 0x3ca   : > { %v2389_v38 = vpop.xlane.xlu0 %2388  ;;  %v2477_v11 = vsel %vm2374_vm3, %v9590_v51, 0.0 }
 0x3cb   : > { %v2427_v42 = vsub.f32 %v9530_v57, %v2389_v38  ;;  %2478 = vadd.xlane.f32.xlu0 %v2477_v11 }
 0x3cd   : > { %v2447_v61 = vmul.f32 1.442695, %v2427_v42 }
 0x3cf   : > { %8230 = vpow2.f32 %v2447_v61 }
 0x3d1   : > { %v9595_v9 = vpop.eup %8228 }
 0x3d2   : > { %v2392_v55 = vpop.xlane.xlu1 %2391  ;;  %v2480_v3 = vsel %vm2374_vm3, %v9595_v9, 0.0 }
 0x3d3   : > { %v2428_v5 = vsub.f32 %v9534_v28, %v2392_v55  ;;  %2481 = vadd.xlane.f32.xlu1 %v2480_v3 }
 0x3d5   : > { %v2449_v34 = vmul.f32 1.442695, %v2428_v5 }
 0x3d7   : > { %8232 = vpow2.f32 %v2449_v34 }
 0x3d9   : > { %v9600_v2 = vpop.eup %8230 }
 0x3da   : > { %v2395_v53 = vpop.xlane.xlu0 %2394  ;;  %v2483_v57 = vsel %vm2374_vm3, %v9600_v2, 0.0 }
 0x3db   : > { %v2429_v12 = vsub.f32 %v9538_v13, %v2395_v53  ;;  %2484 = vadd.xlane.f32.xlu0 %v2483_v57 }
 0x3dd   : > { %v2451_v54 = vmul.f32 1.442695, %v2429_v12 }
 0x3de   : > { %v2401_v59 = vpop.xlane.xlu0 %2400 }
 0x3df   : > { %8234 = vpow2.f32 %v2451_v54  ;;  %v2431_v38 = vsub.f32 %v9540_v35, %v2401_v59 }
 0x3e1   : > { %v9606_v11 = vpop.eup %8232  ;;  %v2455_v28 = vmul.f32 1.442695, %v2431_v38 }
 0x3e2   : > { %v2398_v42 = vpop.xlane.xlu1 %2397  ;;  %v2407_v61 = vpop.xlane.xlu0 %2406  ;;  %v2486_v55 = vsel %vm2374_vm3, %v9606_v11, 0.0 }
 0x3e3   : > { %8236 = vpow2.f32 %v2455_v28  ;;  %v2430_v3 = vsub.f32 %v9548_v41, %v2398_v42  ;;  %v2433_v5 = vsub.f32 %v9544_v26, %v2407_v61  ;;  %2487 = vadd.xlane.f32.xlu1 %v2486_v55 }
 0x3e5   : > { %v2453_v13 = vmul.f32 1.442695, %v2430_v3  ;;  %v2459_v34 = vmul.f32 1.442695, %v2433_v5 }
 0x3e6   : > { %v2413_v53 = vpop.xlane.xlu0 %2412 }
 0x3e7   : > { %8238 = vpow2.f32 %v2453_v13  ;;  %v2435_v35 = vsub.f32 %v9550_v49, %v2413_v53 }
 0x3e8   : > { %8240 = vpow2.f32 %v2459_v34 }
 0x3e9   : > { %v9613_v57 = vpop.eup %8234  ;;  %v2463_v12 = vmul.f32 1.442695, %v2435_v35 }
 0x3ea   : > { %v2404_v54 = vpop.xlane.xlu1 %2403  ;;  %v2489_v59 = vsel %vm2374_vm3, %v9613_v57, 0.0 }
 0x3eb   : > { %8242 = vpow2.f32 %v2463_v12  ;;  %v2432_v41 = vsub.f32 %v9558_v19, %v2404_v54  ;;  %2490 = vadd.xlane.f32.xlu0 %v2489_v59 }
 0x3ed   : > { %v9618_v26 = vpop.eup %8236  ;;  %v2457_v38 = vmul.f32 1.442695, %v2432_v41 }
 0x3ee   : > { %v2495_v28 = vsel %vm2374_vm3, %v9618_v26, 0.0 }
 0x3ef   : > { %8244 = vpow2.f32 %v2457_v38  ;;  %2496 = vadd.xlane.f32.xlu0 %v2495_v28 }
 0x3f1   : > { %v9622_v49 = vpop.eup %8238 }
 0x3f2   : > { %v9624_v42 = vpop.eup %8240  ;;  %v2410_v61 = vpop.xlane.xlu1 %2409  ;;  %v2492_v55 = vsel %vm2374_vm3, %v9622_v49, 0.0 }
 0x3f3   : > { %v2434_v3 = vsub.f32 %v9562_v58, %v2410_v61  ;;  %2493 = vadd.xlane.f32.xlu1 %v2492_v55  ;;  %v2501_v19 = vsel %vm2374_vm3, %v9624_v42, 0.0 }
 0x3f4   : > { %2502 = vadd.xlane.f32.xlu0 %v2501_v19 }
 0x3f5   : > { %v9631_v5 = vpop.eup %8242  ;;  %v2461_v13 = vmul.f32 1.442695, %v2434_v3 }
 0x3f6   : > { %v2507_v34 = vsel %vm2374_vm3, %v9631_v5, 0.0 }
 0x3f7   : > { %8246 = vpow2.f32 %v2461_v13 }
 0x3f8   : > { %2508 = vadd.xlane.f32.xlu0 %v2507_v34 }
 0x3f9   : > { %v9635_v53 = vpop.eup %8244 }
 0x3fa   : > { %v2416_v35 = vpop.xlane.xlu1 %2415  ;;  %v2498_v12 = vsel %vm2374_vm3, %v9635_v53, 0.0 }
 0x3fb   : > { %v2436_v58 = vsub.f32 %v9566_v8, %v2416_v35  ;;  %2499 = vadd.xlane.f32.xlu1 %v2498_v12 }
 0x3fd   : > { %v2465_v54 = vmul.f32 1.442695, %v2436_v58 }
 0x3ff   : > { %8248 = vpow2.f32 %v2465_v54 }
 0x401   : > { %v9640_v59 = vpop.eup %8246 }
 0x402   : > { %v2504_v41 = vsel %vm2374_vm3, %v9640_v59, 0.0 }
 0x403   : > { %2505 = vadd.xlane.f32.xlu1 %v2504_v41 }
 0x409   : > { %v9644_v38 = vpop.eup %8248 }
 0x40a   : > { %v2510_v28 = vsel %vm2374_vm3, %v9644_v38, 0.0 }
 0x40b   : > { %2511 = vadd.xlane.f32.xlu1 %v2510_v28 }
 0x443   : > { %v2419_v61 = vpop.xlane.xlu0 %2418 }
 0x444   : > { %v2437_v55 = vsub.f32 %v9572_v32, %v2419_v61 }
 0x445   : > { %v2422_v3 = vpop.xlane.xlu1 %2421 }
 0x446   : > { %v2467_v8 = vmul.f32 1.442695, %v2437_v55  ;;  %v2438_v19 = vsub.f32 %v9574_v17, %v2422_v3  ;;  %v11371_v55 = vmov 0.0  }
 0x448   : > { %8250 = vpow2.f32 %v2467_v8  ;;  %v2469_v13 = vmul.f32 1.442695, %v2438_v19  ;;  %v2473_v34 = vpop.xlane.xlu0 %2472 }
 0x449   : > { %8252 = vrcp.f32 %v2473_v34 }
 0x44a   : > { %8254 = vpow2.f32 %v2469_v13 }
 0x450   : > { %v2476_v35 = vpop.xlane.xlu1 %2475 }
 0x451   : > { %8256 = vrcp.f32 %v2476_v35 }
 0x452   : > { %v9650_v12 = vpop.eup %8250 }
 0x453   : > { %v8253_v58 = vpop.eup %8252  ;;  %v2513_v54 = vsel %vm2374_vm3, %v9650_v12, 0.0 }
 0x454   : > { %v9654_v41 = vpop.eup %8254  ;;  %v2535_v32 = vmul.f32 %v8253_v58, %v9580_v7  ;;  %2514 = vadd.xlane.f32.xlu0 %v2513_v54 }
 0x455   : > { %v2516_v17 = vsel %vm2374_vm3, %v9654_v41, 0.0 }
 0x456   : > { %2517 = vadd.xlane.f32.xlu1 %v2516_v17  ;;  %v2551_v28 = vpack.c.bf16 %v2535_v32, %v2535_v32 }
 0x458   : > { %7638 = vmatmul.mubr.msk.bf16.vlgmr.msra.gmra.mrb[80].mxu0 %vm2374_vm3, %v2551_v28  ;;  %v2479_v61 = vpop.xlane.xlu0 %2478 }
 0x459   : > { %7648 = vmatpush3.bf16.msra.mxu0 %v9431_v0  ;;  %8258 = vrcp.f32 %v2479_v61  ;;  %7649 = vmatprep.mubr.msk.bf16.mxu0 %vm8546_vm1, %v11371_v55 }
 0x45a   : > { %7659 = vmatprep.subr.bf16.mxu0 %v11371_v55 }
 0x45b   : > { %v8257_v3 = vpop.eup %8256 }
 0x45c   : > { %v2536_v7 = vmul.f32 %v8257_v3, %v9585_v47 }
 0x45e   : > { %v2552_v8 = vpack.c.bf16 %v2536_v7, %v2536_v7 }
 0x460   : > { %v2482_v19 = vpop.xlane.xlu1 %2481  ;;  %7644 = vmatmul.mubr.msk.bf16.vlgmr.msra.gmra.mrb[80].mxu1 %vm2374_vm3, %v2552_v8 }
 0x461   : > { %8260 = vrcp.f32 %v2482_v19  ;;  %7654 = vmatpush3.bf16.msra.mxu1 %v9434_v60  ;;  %7655 = vmatprep.mubr.msk.bf16.mxu1 %vm8546_vm1, %v11371_v55 }
 0x462   : > { %7665 = vmatprep.subr.bf16.mxu1 %v11371_v55 }
 0x463   : > { %v8259_v0 = vpop.eup %8258 }
 0x464   : > { %v2537_v13 = vmul.f32 %v8259_v0, %v9590_v51 }
 0x466   : > { %v2553_v34 = vpack.c.bf16 %v2537_v13, %v2537_v13 }
 0x468   : > { %7650 = vmatmul.mubr.msk.bf16.vlgmr.msra.gmra.mrb[84].mxu0 %vm2374_vm3, %v2553_v34  ;;  %v2485_v35 = vpop.xlane.xlu0 %2484 }
 0x469   : > { %7660 = vmatpush3.bf16.msra.mxu0 %v9443_v18  ;;  %8262 = vrcp.f32 %v2485_v35  ;;  %7661 = vmatprep.mubr.msk.bf16.mxu0 %vm8546_vm1, %v11371_v55 }
 0x46a   : > { %7671 = vmatprep.subr.bf16.mxu0 %v11371_v55 }
 0x46b   : > { %v8261_v60 = vpop.eup %8260 }
 0x46c   : > { %v2538_v47 = vmul.f32 %v8261_v60, %v9595_v9 }
 0x46e   : > { %v2554_v58 = vpack.c.bf16 %v2538_v47, %v2538_v47 }
 0x470   : > { %v2488_v54 = vpop.xlane.xlu1 %2487  ;;  %7656 = vmatmul.mubr.msk.bf16.vlgmr.msra.gmra.mrb[84].mxu1 %vm2374_vm3, %v2554_v58 }
 0x471   : > { %8264 = vrcp.f32 %v2488_v54  ;;  %7666 = vmatpush3.bf16.msra.mxu1 %v9446_v1  ;;  %7667 = vmatprep.mubr.msk.bf16.mxu1 %vm8546_vm1, %v11371_v55 }
 0x472   : > { %7677 = vmatprep.subr.bf16.mxu1 %v11371_v55 }
 0x473   : > { %v8263_v18 = vpop.eup %8262 }
 0x474   : > { %v2539_v51 = vmul.f32 %v8263_v18, %v9600_v2 }
 0x476   : > { %v2555_v32 = vpack.c.bf16 %v2539_v51, %v2539_v51 }
 0x478   : > { %7662 = vmatmul.mubr.msk.bf16.vlgmr.msra.gmra.mrb[88].mxu0 %vm2374_vm3, %v2555_v32  ;;  %v2491_v17 = vpop.xlane.xlu0 %2490 }
 0x479   : > { %7672 = vmatpush3.bf16.msra.mxu0 %v9455_v39  ;;  %8266 = vrcp.f32 %v2491_v17  ;;  %7673 = vmatprep.mubr.msk.bf16.mxu0 %vm8546_vm1, %v11371_v55 }
 0x47a   : > { %7683 = vmatprep.subr.bf16.mxu0 %v11371_v55 }
 0x47b   : > { %v8265_v1 = vpop.eup %8264 }
 0x47c   : > { %v2540_v9 = vmul.f32 %v8265_v1, %v9606_v11  ;;  %v2497_v28 = vpop.xlane.xlu0 %2496 }
 0x47d   : > { %8268 = vrcp.f32 %v2497_v28  ;;  %v3330_v28 = vrot.slane %v9275_v15, 4  ;;  %v3328_v15 = vrot.slane %v9273_v14, 4  ;;  %v3416_v14 = vrot.slane %v9286_v10, 4 }
 0x47e   : > { %v2556_v61 = vpack.c.bf16 %v2540_v9, %v2540_v9  ;;  %v3504_v10 = vrot.slane %v9299_v63, 4  ;;  %v3592_v63 = vrot.slane %v9312_v30, 4  ;;  %v3680_v30 = vrot.slane %v9325_v27, 4  ;;  %v11373_v27 = vld [vmem:[#allocation42_spill] sm:$0xff] }
 0x480   : > { %v2494_v3 = vpop.xlane.xlu1 %2493  ;;  %7668 = vmatmul.mubr.msk.bf16.vlgmr.msra.gmra.mrb[88].mxu1 %vm2374_vm3, %v2556_v61  ;;  %v3374_v61 = vrot.slane %v9279_v62, 4  ;;  %v3372_v62 = vrot.slane %v9277_v48, 4  ;;  %v3506_v48 = vrot.slane %v9301_v45, 4  ;;  %v3548_v45 = vrot.slane %v9304_v56, 4 }
 0x481   : > { %8270 = vrcp.f32 %v2494_v3  ;;  %7678 = vmatpush3.bf16.msra.mxu1 %v9458_v52  ;;  %7679 = vmatprep.mubr.msk.bf16.mxu1 %vm8546_vm1, %v11371_v55  ;;  %v2503_v39 = vpop.xlane.xlu0 %2502  ;;  %v3682_v56 = vrot.slane %v9327_v40, 4  ;;  %v3724_v40 = vrot.slane %v9330_v20, 4 }
 0x482   : > { %7689 = vmatprep.subr.bf16.mxu1 %v11371_v55  ;;  %8272 = vrcp.f32 %v2503_v39  ;;  %v11374_v39 = vld [vmem:[#allocation46_spill] sm:$0xff] }
 0x483   : > { %v8267_v2 = vpop.eup %8266  ;;  %v3858_v20 = vrot.slane %v11374_v39, 4 }
 0x484   : > { %v2541_v7 = vmul.f32 %v8267_v2, %v9613_v57  ;;  %v11375_v2 = vld [vmem:[#allocation43_spill] sm:$0xff] }
 0x485   : > { %v2509_v0 = vpop.xlane.xlu0 %2508 }
 0x486   : > { %v2557_v11 = vpack.c.bf16 %v2541_v7, %v2541_v7  ;;  %v3812_v7 = vrot.slane %v11375_v2, 4 }
 0x487   : > { %v8269_v8 = vpop.eup %8268 }
 0x488   : > { %v2500_v19 = vpop.xlane.xlu1 %2499  ;;  %7674 = vmatmul.mubr.msk.bf16.vlgmr.msra.gmra.mrb[92].mxu0 %vm2374_vm3, %v2557_v11  ;;  %v2543_v52 = vmul.f32 %v8269_v8, %v9618_v26  ;;  %v11376_v11 = vld [vmem:[#allocation48_spill] sm:$0xff] }
 0x489   : > { %8274 = vrcp.f32 %v2500_v19  ;;  %7684 = vmatpush3.bf16.msra.mxu0 %v9467_v46  ;;  %7685 = vmatprep.mubr.msk.bf16.mxu0 %vm8546_vm1, %v11371_v55  ;;  %v3902_v8 = vrot.slane %v11376_v11, 4  ;;  %v11377_v19 = vld [vmem:[#allocation45_spill] sm:$0xff] }
 0x48a   : > { %7695 = vmatprep.subr.bf16.mxu0 %v11371_v55  ;;  %8276 = vrcp.f32 %v2509_v0  ;;  %v2559_v35 = vpack.c.bf16 %v2543_v52, %v2543_v52  ;;  %v3856_v52 = vrot.slane %v11377_v19, 4  ;;  %v11378_v0 = vld [vmem:[#allocation50_spill] sm:$0xff] }
 0x48b   : > { %v8271_v13 = vpop.eup %8270 }
 0x48c   : > { %v2542_v57 = vmul.f32 %v8271_v13, %v9622_v49  ;;  %v8273_v60 = vpop.eup %8272  ;;  %v3946_v13 = vrot.slane %v11378_v0, 4 }
 0x48d   : > { %v2545_v46 = vmul.f32 %v8273_v60, %v9624_v42 }
 0x48e   : > { %v2558_v34 = vpack.c.bf16 %v2542_v57, %v2542_v57  ;;  %v11379_v57 = vld [vmem:[#allocation47_spill] sm:$0xff] }
 0x48f   : > { %v2561_v54 = vpack.c.bf16 %v2545_v46, %v2545_v46 }
 0x490   : > { %v2506_v47 = vpop.xlane.xlu1 %2505  ;;  %7680 = vmatmul.mubr.msk.bf16.vlgmr.msra.gmra.mrb[92].mxu1 %vm2374_vm3, %v2558_v34  ;;  %7686 = vmatmul.mubr.msk.bf16.vlgmr.msra.gmra.mrb[96].mxu0 %vm2374_vm3, %v2559_v35  ;;  %v3900_v34 = vrot.slane %v11379_v57, 4  ;;  %v11380_v35 = vld [vmem:[#allocation52_spill] sm:$0xff] }
 0x491   : > { %8278 = vrcp.f32 %v2506_v47  ;;  %7690 = vmatpush3.bf16.msra.mxu1 %v9470_v29  ;;  %7696 = vmatpush3.bf16.msra.mxu0 %v9479_v43  ;;  %v3990_v60 = vrot.slane %v11380_v35, 4 }
 0x492   : > { %7691 = vmatprep.mubr.msk.bf16.mxu1 %vm8546_vm1, %v11371_v55  ;;  %7697 = vmatprep.mubr.msk.bf16.mxu0 %vm8546_vm1, %v11371_v55 }
 0x493   : > { %v8275_v26 = vpop.eup %8274  ;;  %7701 = vmatprep.subr.bf16.mxu1 %v11371_v55  ;;  %7707 = vmatprep.subr.bf16.mxu0 %v11371_v55 }
 0x494   : > { %v2544_v49 = vmul.f32 %v8275_v26, %v9635_v53  ;;  %v8277_v29 = vpop.eup %8276 }
 0x495   : > { %v2547_v43 = vmul.f32 %v8277_v29, %v9631_v5  ;;  %v11382_v29 = vld [vmem:[#allocation51_spill] sm:$0xff] }
 0x496   : > { %v2560_v58 = vpack.c.bf16 %v2544_v49, %v2544_v49 }
 0x497   : > { %v2563_v32 = vpack.c.bf16 %v2547_v43, %v2547_v43  ;;  %v11383_v43 = vld [vmem:[#allocation53_spill] sm:$0xff] }
 0x498   : > { %v2512_v18 = vpop.xlane.xlu1 %2511  ;;  %7692 = vmatmul.mubr.msk.bf16.vlgmr.msra.gmra.mrb[96].mxu1 %vm2374_vm3, %v2560_v58  ;;  %7698 = vmatmul.mubr.msk.bf16.vlgmr.msra.gmra.mrb[100].mxu0 %vm2374_vm3, %v2561_v54  ;;  %v11381_v58 = vld [vmem:[#allocation49_spill] sm:$0xff] }
 0x499   : > { %8280 = vrcp.f32 %v2512_v18  ;;  %7702 = vmatpush3.bf16.msra.mxu1 %v9482_v23  ;;  %7708 = vmatpush3.bf16.msra.mxu0 %v9491_v22  ;;  %v3944_v54 = vrot.slane %v11381_v58, 4  ;;  %v3988_v18 = vrot.slane %v11382_v29, 4 }
 0x49a   : > { %7703 = vmatprep.mubr.msk.bf16.mxu1 %vm8546_vm1, %v11371_v55  ;;  %7709 = vmatprep.mubr.msk.bf16.mxu0 %vm8546_vm1, %v11371_v55 }
 0x49b   : > { %v8279_v42 = vpop.eup %8278  ;;  %7713 = vmatprep.subr.bf16.mxu1 %v11371_v55  ;;  %7719 = vmatprep.subr.bf16.mxu0 %v11371_v55 }
 0x49c   : > { %v2546_v53 = vmul.f32 %v8279_v42, %v9640_v59 }
 0x49e   : > { %v2562_v51 = vpack.c.bf16 %v2546_v53, %v2546_v53 }
 0x4a0   : > { %7704 = vmatmul.mubr.msk.bf16.vlgmr.msra.gmra.mrb[100].mxu1 %vm2374_vm3, %v2562_v51  ;;  %7710 = vmatmul.mubr.msk.bf16.vlgmr.msra.gmra.mrb[104].mxu0 %vm2374_vm3, %v2563_v32  ;;  %v11384_v51 = vld [vmem:[#allocation54_spill] sm:$0xff] }
 0x4a1   : > { %7714 = vmatpush3.bf16.msra.mxu1 %v9494_v6  ;;  %7720 = vmatpush3.bf16.msra.mxu0 %v9503_v21 }
 0x4a2   : > { %7715 = vmatprep.mubr.msk.bf16.mxu1 %vm8546_vm1, %v11371_v55  ;;  %7725 = vmatprep.subr.bf16.mxu1 %v11371_v55 }
 0x4a3   : > { %v8281_v22 = vpop.eup %8280  ;;  %7721 = vmatprep.mubr.msk.bf16.mxu0 %vm8546_vm1, %v11371_v55  ;;  %7731 = vmatprep.subr.bf16.mxu0 %v11371_v55 }
 0x4a4   : > { %v2548_v23 = vmul.f32 %v8281_v22, %v9644_v38 }
 0x4a6   : > { %v2564_v5 = vpack.c.bf16 %v2548_v23, %v2548_v23 }
 0x4a8   : > { %7716 = vmatmul.mubr.msk.bf16.vlgmr.msra.gmra.mrb[104].mxu1 %vm2374_vm3, %v2564_v5 }
 0x4a9   : > { %7726 = vmatpush3.bf16.msra.mxu1 %v9506_v24  ;;  %7727 = vmatprep.mubr.msk.bf16.mxu1 %vm8546_vm1, %v11371_v55 }
 0x4aa   : > { %7737 = vmatprep.subr.bf16.mxu1 %v11371_v55 }
 0x4e1   : > { %v2515_v21 = vpop.xlane.xlu0 %2514 }
 0x4e2   : > { %8282 = vrcp.f32 %v2515_v21 }
 0x4e3   : > { %v2518_v6 = vpop.xlane.xlu1 %2517 }
 0x4e4   : > { %8284 = vrcp.f32 %v2518_v6 }
 0x4ec   : > { %v8283_v59 = vpop.eup %8282 }
 0x4ed   : > { %v2549_v17 = vmul.f32 %v8283_v59, %v9650_v12  ;;  %v3418_v12 = vrot.slane %v9288_v16, 4  ;;  %v3460_v16 = vrot.slane %v9291_v50, 4  ;;  %v3594_v50 = vrot.slane %v9314_v4, 4 }
 0x4ee   : > { %v8285_v1 = vpop.eup %8284  ;;  %v3636_v4 = vrot.slane %v9317_v37, 4  ;;  %v3770_v37 = vrot.slane %v9342_v44, 4  ;;  %v3768_v44 = vrot.slane %v11373_v27, 4 }
 0x4ef   : > { %v2550_v38 = vmul.f32 %v8285_v1, %v9654_v41  ;;  %v2565_v9 = vpack.c.bf16 %v2549_v17, %v2549_v17  ;;  %v3462_v41 = vrot.slane %v9293_v31, 4  ;;  %v3550_v31 = vrot.slane %v9306_v36, 4 }
 0x4f0   : > { %v3638_v36 = vrot.slane %v9319_v25, 4  ;;  %v3726_v25 = vrot.slane %v9332_v33, 4  ;;  %v11372_v33 = vld [vmem:[#allocation44_spill] sm:$0xff] }
 0x4f1   : > { %7722 = vmatmul.mubr.msk.bf16.vlgmr.msra.gmra.mrb[108].mxu0 %vm2374_vm3, %v2565_v9  ;;  %v2566_v24 = vpack.c.bf16 %v2550_v38, %v2550_v38  ;;  %v3814_v3 = vrot.slane %v11372_v33, 4 }
 0x4f2   : > { %7732 = vmatpush3.bf16.xpose.msra.mxu0 %v3330_v28  ;;  %7733 = vmatprep.mubr.msk.bf16.mxu0 %vm8546_vm1, %v11371_v55 }
 0x4f3   : > { %7728 = vmatmul.mubr.msk.bf16.vlgmr.msra.gmra.mrb[108].mxu1 %vm2374_vm3, %v2566_v24  ;;  %7743 = vmatprep.subr.bf16.mxu0 %v11371_v55 }
 0x4f4   : > { %7738 = vmatpush3.bf16.xpose.msra.mxu1 %v3374_v61  ;;  %7739 = vmatprep.mubr.msk.bf16.mxu1 %vm8546_vm1, %v11371_v55 }
 0x4f5   : > { %7749 = vmatprep.subr.bf16.mxu1 %v11371_v55 }
 0x4f9   : > { %7734 = vmatmul.mubr.bf16.vlgmr.msra.gmra.mrb[112].mxu0 %v3328_v15 }
 0x4fa   : > { %7744 = vmatpush3.bf16.xpose.msra.mxu0 %v3418_v12  ;;  %7745 = vmatprep.mubr.msk.bf16.mxu0 %vm8546_vm1, %v11371_v55 }
 0x4fb   : > { %7740 = vmatmul.mubr.bf16.vlgmr.msra.gmra.mrb[112].mxu1 %v3372_v62  ;;  %7755 = vmatprep.subr.bf16.mxu0 %v11371_v55 }
 0x4fc   : > { %7750 = vmatpush3.bf16.xpose.msra.mxu1 %v3462_v41  ;;  %7751 = vmatprep.mubr.msk.bf16.mxu1 %vm8546_vm1, %v11371_v55 }
 0x4fd   : > { %7761 = vmatprep.subr.bf16.mxu1 %v11371_v55 }
 0x501   : > { %7746 = vmatmul.mubr.bf16.vlgmr.msra.gmra.mrb[116].mxu0 %v3416_v14 }
 0x502   : > { %7756 = vmatpush3.bf16.xpose.msra.mxu0 %v3506_v48  ;;  %7757 = vmatprep.mubr.msk.bf16.mxu0 %vm8546_vm1, %v11371_v55 }
 0x503   : > { %7752 = vmatmul.mubr.bf16.vlgmr.msra.gmra.mrb[116].mxu1 %v3460_v16  ;;  %7767 = vmatprep.subr.bf16.mxu0 %v11371_v55 }
 0x504   : > { %7762 = vmatpush3.bf16.xpose.msra.mxu1 %v3550_v31  ;;  %7763 = vmatprep.mubr.msk.bf16.mxu1 %vm8546_vm1, %v11371_v55 }
 0x505   : > { %7773 = vmatprep.subr.bf16.mxu1 %v11371_v55 }
 0x509   : > { %7758 = vmatmul.mubr.bf16.vlgmr.msra.gmra.mrb[120].mxu0 %v3504_v10 }
 0x50a   : > { %7768 = vmatpush3.bf16.xpose.msra.mxu0 %v3594_v50  ;;  %7769 = vmatprep.mubr.msk.bf16.mxu0 %vm8546_vm1, %v11371_v55 }
 0x50b   : > { %7764 = vmatmul.mubr.bf16.vlgmr.msra.gmra.mrb[120].mxu1 %v3548_v45  ;;  %7779 = vmatprep.subr.bf16.mxu0 %v11371_v55 }
 0x50c   : > { %7774 = vmatpush3.bf16.xpose.msra.mxu1 %v3638_v36  ;;  %7775 = vmatprep.mubr.msk.bf16.mxu1 %vm8546_vm1, %v11371_v55 }
 0x50d   : > { %7785 = vmatprep.subr.bf16.mxu1 %v11371_v55 }
 0x511   : > { %7770 = vmatmul.mubr.bf16.vlgmr.msra.gmra.mrb[124].mxu0 %v3592_v63 }
 0x512   : > { %7780 = vmatpush3.bf16.xpose.msra.mxu0 %v3682_v56  ;;  %7781 = vmatprep.mubr.msk.bf16.mxu0 %vm8546_vm1, %v11371_v55 }
 0x513   : > { %7776 = vmatmul.mubr.bf16.vlgmr.msra.gmra.mrb[124].mxu1 %v3636_v4  ;;  %7791 = vmatprep.subr.bf16.mxu0 %v11371_v55 }
 0x514   : > { %7786 = vmatpush3.bf16.xpose.msra.mxu1 %v3726_v25  ;;  %7787 = vmatprep.mubr.msk.bf16.mxu1 %vm8546_vm1, %v11371_v55 }
 0x515   : > { %7797 = vmatprep.subr.bf16.mxu1 %v11371_v55 }
 0x519   : > { %7782 = vmatmul.mubr.bf16.vlgmr.msra.gmra.mrb[128].mxu0 %v3680_v30 }
 0x51a   : > { %7792 = vmatpush3.bf16.xpose.msra.mxu0 %v3770_v37  ;;  %7793 = vmatprep.mubr.msk.bf16.mxu0 %vm8546_vm1, %v11371_v55 }
 0x51b   : > { %7788 = vmatmul.mubr.bf16.vlgmr.msra.gmra.mrb[128].mxu1 %v3724_v40  ;;  %7803 = vmatprep.subr.bf16.mxu0 %v11371_v55 }
 0x51c   : > { %7798 = vmatpush3.bf16.xpose.msra.mxu1 %v3814_v3  ;;  %7799 = vmatprep.mubr.msk.bf16.mxu1 %vm8546_vm1, %v11371_v55 }
 0x51d   : > { %7809 = vmatprep.subr.bf16.mxu1 %v11371_v55 }
 0x521   : > { %7794 = vmatmul.mubr.bf16.vlgmr.msra.gmra.mrb[132].mxu0 %v3768_v44 }
 0x522   : > { %7804 = vmatpush3.bf16.xpose.msra.mxu0 %v3858_v20  ;;  %7805 = vmatprep.mubr.msk.bf16.mxu0 %vm8546_vm1, %v11371_v55 }
 0x523   : > { %7800 = vmatmul.mubr.bf16.vlgmr.msra.gmra.mrb[132].mxu1 %v3812_v7  ;;  %7815 = vmatprep.subr.bf16.mxu0 %v11371_v55 }
 0x524   : > { %7810 = vmatpush3.bf16.xpose.msra.mxu1 %v3902_v8  ;;  %7811 = vmatprep.mubr.msk.bf16.mxu1 %vm8546_vm1, %v11371_v55 }
 0x525   : > { %7821 = vmatprep.subr.bf16.mxu1 %v11371_v55 }
 0x529   : > { %7806 = vmatmul.mubr.bf16.vlgmr.msra.gmra.mrb[136].mxu0 %v3856_v52 }
 0x52a   : > { %7816 = vmatpush3.bf16.xpose.msra.mxu0 %v3946_v13  ;;  %7817 = vmatprep.mubr.msk.bf16.mxu0 %vm8546_vm1, %v11371_v55 }
 0x52b   : > { %v9820_v47 = vpop.f32.mrb[80].mxu0  ;;  %7812 = vmatmul.mubr.bf16.vlgmr.msra.gmra.mrb[136].mxu1 %v3900_v34  ;;  %7827 = vmatprep.subr.bf16.mxu0 %v11371_v55 }
 0x52c   : > { %7822 = vmatpush3.bf16.xpose.msra.mxu1 %v3990_v60  ;;  %v7639_v46 = vpop.f32.mrb[81].mxu0  ;;  %7823 = vmatprep.mubr.msk.bf16.mxu1 %vm8546_vm1, %v11371_v55 }
 0x52d   : > { %v2611_v26 = vpop.f32.mrb[82].mxu0  ;;  %7833 = vmatprep.subr.bf16.mxu1 %v11371_v55 }
 0x52e   : > { %v7640_v49 = vpop.f32.mrb[83].mxu0 }
 0x531   : > { %7818 = vmatmul.mubr.bf16.vlgmr.msra.gmra.mrb[140].mxu0 %v3944_v54 }
 0x532   : > { %7828 = vmatpush3.bf16.msra.mxu0 %v11383_v43  ;;  %7829 = vmatprep.mubr.msk.bf16.mxu0 %vm8546_vm1, %v11371_v55 }
 0x533   : > { %v9831_v42 = vpop.f32.mrb[80].mxu1  ;;  %7824 = vmatmul.mubr.bf16.vlgmr.msra.gmra.mrb[140].mxu1 %v3988_v18  ;;  %7839 = vmatprep.subr.bf16.mxu0 %v11371_v55 }
 0x534   : > { %v3304_v53 = vpack.c.bf16 %v9831_v42, %v9820_v47  ;;  %7834 = vmatpush3.bf16.msra.mxu1 %v11384_v51  ;;  %v7645_v32 = vpop.f32.mrb[81].mxu1  ;;  %7835 = vmatprep.mubr.msk.bf16.mxu1 %vm8546_vm1, %v11371_v55  ;;  %v11399_v47 = vld [vmem:[#allocation9_spill] sm:$0xff] }
 0x535   : > { %v2657_v22 = vpop.f32.mrb[82].mxu1  ;;  %7845 = vmatprep.subr.bf16.mxu1 %v11371_v55  ;;  %v10185_v42 = vsub.s32 4, %v11399_v47 }
 0x536   : > { %v7646_v23 = vpop.f32.mrb[83].mxu1 }
 0x53b   : > { %v9840_v5 = vpop.f32.mrb[84].mxu0 }
 0x53c   : > { %v7651_v21 = vpop.f32.mrb[85].mxu0 }
 0x53d   : > { %v2703_v6 = vpop.f32.mrb[86].mxu0 }
 0x53e   : > { %v7652_v59 = vpop.f32.mrb[87].mxu0 }
 0x543   : > { %v9842_v17 = vpop.f32.mrb[84].mxu1 }
 0x544   : > { %v3305_v1 = vpack.c.bf16 %v9842_v17, %v9840_v5  ;;  %v7657_v38 = vpop.f32.mrb[85].mxu1  ;;  %v10193_v5 = vld [vmem:[%s11198_s4] sm:$0xff] }
 0x545   : > { %v2749_v9 = vpop.f32.mrb[86].mxu1  ;;  %v10197_v17 = vrot.slane %v10193_v5, %v10185_v42 }
 0x546   : > { %v7658_v28 = vpop.f32.mrb[87].mxu1 }
 0x54b   : > { %v9846_v24 = vpop.f32.mrb[88].mxu0 }
 0x54c   : > { %v7663_v61 = vpop.f32.mrb[89].mxu0 }
 0x54d   : > { %v2795_v15 = vpop.f32.mrb[90].mxu0 }
 0x54e   : > { %v7664_v12 = vpop.f32.mrb[91].mxu0 }
 0x553   : > { %v9848_v62 = vpop.f32.mrb[88].mxu1 }
 0x554   : > { %v3306_v41 = vpack.c.bf16 %v9848_v62, %v9846_v24  ;;  %v7669_v14 = vpop.f32.mrb[89].mxu1 }
 0x555   : > { %v2841_v48 = vpop.f32.mrb[90].mxu1 }
 0x556   : > { %v7670_v16 = vpop.f32.mrb[91].mxu1 }
 0x55b   : > { %v9852_v31 = vpop.f32.mrb[92].mxu0 }
 0x55c   : > { %v7675_v10 = vpop.f32.mrb[93].mxu0 }
 0x55d   : > { %v2887_v50 = vpop.f32.mrb[94].mxu0 }
 0x55e   : > { %v7676_v45 = vpop.f32.mrb[95].mxu0 }
 0x563   : > { %v9854_v36 = vpop.f32.mrb[92].mxu1  ;;  %v9856_v63 = vpop.f32.mrb[96].mxu0 }
 0x564   : > { %v3307_v56 = vpack.c.bf16 %v9854_v36, %v9852_v31  ;;  %v7681_v4 = vpop.f32.mrb[93].mxu1  ;;  %v7687_v25 = vpop.f32.mrb[97].mxu0 }
 0x565   : > { %v2933_v30 = vpop.f32.mrb[94].mxu1  ;;  %v2979_v37 = vpop.f32.mrb[98].mxu0 }
 0x566   : > { %v7682_v40 = vpop.f32.mrb[95].mxu1  ;;  %v7688_v33 = vpop.f32.mrb[99].mxu0 }
 0x56b   : > { %v9860_v3 = vpop.f32.mrb[96].mxu1  ;;  %v9862_v27 = vpop.f32.mrb[100].mxu0 }
 0x56c   : > { %v3308_v44 = vpack.c.bf16 %v9860_v3, %v9856_v63  ;;  %v7693_v39 = vpop.f32.mrb[97].mxu1  ;;  %v7699_v20 = vpop.f32.mrb[101].mxu0 }
 0x56d   : > { %v3025_v2 = vpop.f32.mrb[98].mxu1  ;;  %v3071_v7 = vpop.f32.mrb[102].mxu0 }
 0x56e   : > { %v7694_v11 = vpop.f32.mrb[99].mxu1  ;;  %v7700_v8 = vpop.f32.mrb[103].mxu0 }
 0x573   : > { %v9866_v19 = vpop.f32.mrb[100].mxu1  ;;  %v9868_v52 = vpop.f32.mrb[104].mxu0 }
 0x574   : > { %v3309_v0 = vpack.c.bf16 %v9866_v19, %v9862_v27  ;;  %v7705_v13 = vpop.f32.mrb[101].mxu1  ;;  %v7711_v57 = vpop.f32.mrb[105].mxu0  ;;  %v11403_v19 = vld [vmem:[#allocation11_spill] sm:$0xff] }
 0x575   : > { %v3117_v34 = vpop.f32.mrb[102].mxu1  ;;  %v3163_v35 = vpop.f32.mrb[106].mxu0 }
 0x576   : > { %v7706_v60 = vpop.f32.mrb[103].mxu1  ;;  %v7712_v46 = vpop.f32.mrb[107].mxu0 }
 0x57b   : > { %v9872_v26 = vpop.f32.mrb[104].mxu1 }
 0x57c   : > { %v3310_v49 = vpack.c.bf16 %v9872_v26, %v9868_v52  ;;  %v7717_v58 = vpop.f32.mrb[105].mxu1 }
 0x57d   : > { %v3209_v54 = vpop.f32.mrb[106].mxu1 }
 0x57e   : > { %v7718_v29 = vpop.f32.mrb[107].mxu1 }
 0x5c4   : > { %v9876_v18 = vpop.f32.mrb[108].mxu0 }
 0x5c5   : > { %v7723_v43 = vpop.f32.mrb[109].mxu0 }
 0x5c6   : > { %v3255_v51 = vpop.f32.mrb[110].mxu0  ;;  %v9878_v32 = vpop.f32.mrb[108].mxu1 }
 0x5c7   : > { %v3311_v22 = vpack.c.bf16 %v9878_v32, %v9876_v18  ;;  %v7724_v23 = vpop.f32.mrb[111].mxu0  ;;  %v7729_v21 = vpop.f32.mrb[109].mxu1 }
 0x5c8   : > { %v3301_v6 = vpop.f32.mrb[110].mxu1 }
 0x5c9   : > { %v7730_v59 = vpop.f32.mrb[111].mxu1 }
 0x5cc   : > { %v3366_v38 = vpop.f32.mrb[112].mxu0 }
 0x5cd   : > { %v9882_v9 = vmul.f32 0.25, %v3366_v38  ;;  %v7735_v28 = vpop.f32.mrb[113].mxu0 }
 0x5ce   : > { %v3369_v61 = vpop.f32.mrb[114].mxu0  ;;  %v3410_v15 = vpop.f32.mrb[112].mxu1 }
 0x5cf   : > { %v9884_v12 = vmul.f32 0.25, %v3410_v15  ;;  %v7736_v14 = vpop.f32.mrb[115].mxu0  ;;  %v7741_v48 = vpop.f32.mrb[113].mxu1  ;;  %v4048_v16 = vsel %vm2374_vm3, %v9882_v9, -inf }
 0x5d0   : > { %4049 = vmax.xlane.f32.xlu0 %v4048_v16  ;;  %v3413_v10 = vpop.f32.mrb[114].mxu1 }
 0x5d1   : > { %v7742_v50 = vpop.f32.mrb[115].mxu1  ;;  %v4051_v45 = vsel %vm2374_vm3, %v9884_v12, -inf }
 0x5d2   : > { %4052 = vmax.xlane.f32.xlu1 %v4051_v45 }
 0x5d4   : > { %v3454_v4 = vpop.f32.mrb[116].mxu0 }
 0x5d5   : > { %v9890_v25 = vmul.f32 0.25, %v3454_v4  ;;  %v7747_v30 = vpop.f32.mrb[117].mxu0 }
 0x5d6   : > { %v3457_v37 = vpop.f32.mrb[118].mxu0  ;;  %v3498_v40 = vpop.f32.mrb[116].mxu1 }
 0x5d7   : > { %v9892_v33 = vmul.f32 0.25, %v3498_v40  ;;  %v7748_v39 = vpop.f32.mrb[119].mxu0  ;;  %v7753_v20 = vpop.f32.mrb[117].mxu1  ;;  %v4054_v2 = vsel %vm2374_vm3, %v9890_v25, -inf }
 0x5d8   : > { %4055 = vmax.xlane.f32.xlu0 %v4054_v2  ;;  %v3501_v7 = vpop.f32.mrb[118].mxu1 }
 0x5d9   : > { %v7754_v11 = vpop.f32.mrb[119].mxu1  ;;  %v4057_v8 = vsel %vm2374_vm3, %v9892_v33, -inf }
 0x5da   : > { %4058 = vmax.xlane.f32.xlu1 %v4057_v8 }
 0x5dc   : > { %v3542_v13 = vpop.f32.mrb[120].mxu0 }
 0x5dd   : > { %v9898_v57 = vmul.f32 0.25, %v3542_v13  ;;  %v7759_v34 = vpop.f32.mrb[121].mxu0 }
 0x5de   : > { %v3545_v35 = vpop.f32.mrb[122].mxu0  ;;  %v3586_v60 = vpop.f32.mrb[120].mxu1 }
 0x5df   : > { %v9900_v46 = vmul.f32 0.25, %v3586_v60  ;;  %v7760_v58 = vpop.f32.mrb[123].mxu0  ;;  %v7765_v54 = vpop.f32.mrb[121].mxu1  ;;  %v4060_v29 = vsel %vm2374_vm3, %v9898_v57, -inf }
 0x5e0   : > { %4061 = vmax.xlane.f32.xlu0 %v4060_v29  ;;  %v3589_v43 = vpop.f32.mrb[122].mxu1 }
 0x5e1   : > { %v7766_v51 = vpop.f32.mrb[123].mxu1  ;;  %v4063_v23 = vsel %vm2374_vm3, %v9900_v46, -inf }
 0x5e2   : > { %4064 = vmax.xlane.f32.xlu1 %v4063_v23 }
 0x5e4   : > { %v3630_v21 = vpop.f32.mrb[124].mxu0 }
 0x5e5   : > { %v9906_v6 = vmul.f32 0.25, %v3630_v21  ;;  %v7771_v59 = vpop.f32.mrb[125].mxu0 }
 0x5e6   : > { %v3633_v38 = vpop.f32.mrb[126].mxu0  ;;  %v3674_v28 = vpop.f32.mrb[124].mxu1 }
 0x5e7   : > { %v9908_v61 = vmul.f32 0.25, %v3674_v28  ;;  %v7772_v15 = vpop.f32.mrb[127].mxu0  ;;  %v7777_v14 = vpop.f32.mrb[125].mxu1  ;;  %v4066_v48 = vsel %vm2374_vm3, %v9906_v6, -inf }
 0x5e8   : > { %4067 = vmax.xlane.f32.xlu0 %v4066_v48  ;;  %v3677_v16 = vpop.f32.mrb[126].mxu1 }
 0x5e9   : > { %v7778_v10 = vpop.f32.mrb[127].mxu1  ;;  %v4069_v50 = vsel %vm2374_vm3, %v9908_v61, -inf }
 0x5ea   : > { %4070 = vmax.xlane.f32.xlu1 %v4069_v50 }
 0x5ec   : > { %v3718_v45 = vpop.f32.mrb[128].mxu0 }
 0x5ed   : > { %v9914_v4 = vmul.f32 0.25, %v3718_v45  ;;  %v7783_v30 = vpop.f32.mrb[129].mxu0 }
 0x5ee   : > { %v3721_v37 = vpop.f32.mrb[130].mxu0  ;;  %v3762_v40 = vpop.f32.mrb[128].mxu1 }
 0x5ef   : > { %v9916_v39 = vmul.f32 0.25, %v3762_v40  ;;  %v7784_v20 = vpop.f32.mrb[131].mxu0  ;;  %v7789_v2 = vpop.f32.mrb[129].mxu1  ;;  %v4072_v7 = vsel %vm2374_vm3, %v9914_v4, -inf }
 0x5f0   : > { %4073 = vmax.xlane.f32.xlu0 %v4072_v7  ;;  %v3765_v11 = vpop.f32.mrb[130].mxu1 }
 0x5f1   : > { %v7790_v8 = vpop.f32.mrb[131].mxu1  ;;  %v4075_v13 = vsel %vm2374_vm3, %v9916_v39, -inf }
 0x5f2   : > { %4076 = vmax.xlane.f32.xlu1 %v4075_v13 }
 0x5f4   : > { %v3806_v34 = vpop.f32.mrb[132].mxu0 }
 0x5f5   : > { %v9922_v35 = vmul.f32 0.25, %v3806_v34  ;;  %v7795_v60 = vpop.f32.mrb[133].mxu0 }
 0x5f6   : > { %v3809_v58 = vpop.f32.mrb[134].mxu0  ;;  %v3850_v54 = vpop.f32.mrb[132].mxu1 }
 0x5f7   : > { %v9924_v29 = vmul.f32 0.25, %v3850_v54  ;;  %v7796_v43 = vpop.f32.mrb[135].mxu0  ;;  %v7801_v51 = vpop.f32.mrb[133].mxu1  ;;  %v4078_v23 = vsel %vm2374_vm3, %v9922_v35, -inf }
 0x5f8   : > { %4079 = vmax.xlane.f32.xlu0 %v4078_v23  ;;  %v3853_v21 = vpop.f32.mrb[134].mxu1 }
 0x5f9   : > { %v7802_v59 = vpop.f32.mrb[135].mxu1  ;;  %v4081_v38 = vsel %vm2374_vm3, %v9924_v29, -inf }
 0x5fa   : > { %4082 = vmax.xlane.f32.xlu1 %v4081_v38 }
 0x5fc   : > { %v3894_v28 = vpop.f32.mrb[136].mxu0 }
 0x5fd   : > { %v9930_v15 = vmul.f32 0.25, %v3894_v28  ;;  %v7807_v14 = vpop.f32.mrb[137].mxu0 }
 0x5fe   : > { %v3897_v48 = vpop.f32.mrb[138].mxu0  ;;  %v3938_v16 = vpop.f32.mrb[136].mxu1 }
 0x5ff   : > { %v9932_v10 = vmul.f32 0.25, %v3938_v16  ;;  %v7808_v50 = vpop.f32.mrb[139].mxu0  ;;  %v7813_v45 = vpop.f32.mrb[137].mxu1  ;;  %v4084_v30 = vsel %vm2374_vm3, %v9930_v15, -inf }
 0x600   : > { %4085 = vmax.xlane.f32.xlu0 %v4084_v30  ;;  %v3941_v37 = vpop.f32.mrb[138].mxu1 }
 0x601   : > { %v7814_v40 = vpop.f32.mrb[139].mxu1  ;;  %v4087_v20 = vsel %vm2374_vm3, %v9932_v10, -inf }
 0x602   : > { %4088 = vmax.xlane.f32.xlu1 %v4087_v20 }
 0x604   : > { %v3982_v2 = vpop.f32.mrb[140].mxu0 }
 0x605   : > { %v9938_v7 = vmul.f32 0.25, %v3982_v2  ;;  %v7819_v11 = vpop.f32.mrb[141].mxu0 }
 0x606   : > { %v3985_v8 = vpop.f32.mrb[142].mxu0  ;;  %v4026_v13 = vpop.f32.mrb[140].mxu1 }
 0x607   : > { %v9940_v34 = vmul.f32 0.25, %v4026_v13  ;;  %v7820_v60 = vpop.f32.mrb[143].mxu0  ;;  %v7825_v58 = vpop.f32.mrb[141].mxu1  ;;  %v4090_v54 = vsel %vm2374_vm3, %v9938_v7, -inf }
 0x608   : > { %4091 = vmax.xlane.f32.xlu0 %v4090_v54  ;;  %v4029_v43 = vpop.f32.mrb[142].mxu1 }
 0x609   : > { %v7826_v51 = vpop.f32.mrb[143].mxu1  ;;  %v4093_v23 = vsel %vm2374_vm3, %v9940_v34, -inf }
 0x60a   : > { %4094 = vmax.xlane.f32.xlu1 %v4093_v23 }
 0x65d   : > { %v4050_v21 = vpop.xlane.xlu0 %4049 }
 0x65e   : > { %v4096_v59 = vsub.f32 %v9882_v9, %v4050_v21 }
 0x65f   : > { %v4053_v38 = vpop.xlane.xlu1 %4052 }
 0x660   : > { %v4112_v28 = vmul.f32 1.442695, %v4096_v59  ;;  %v4097_v14 = vsub.f32 %v9884_v12, %v4053_v38 }
 0x662   : > { %8286 = vpow2.f32 %v4112_v28  ;;  %v4114_v48 = vmul.f32 1.442695, %v4097_v14 }
 0x664   : > { %8288 = vpow2.f32 %v4114_v48 }
 0x665   : > { %v4056_v16 = vpop.xlane.xlu0 %4055 }
 0x666   : > { %v4098_v50 = vsub.f32 %v9890_v25, %v4056_v16 }
 0x667   : > { %v4059_v45 = vpop.xlane.xlu1 %4058 }
 0x668   : > { %v4116_v30 = vmul.f32 1.442695, %v4098_v50  ;;  %v4099_v37 = vsub.f32 %v9892_v33, %v4059_v45 }
 0x66a   : > { %8290 = vpow2.f32 %v4116_v30  ;;  %v4118_v40 = vmul.f32 1.442695, %v4099_v37 }
 0x66c   : > { %v9950_v20 = vpop.eup %8286  ;;  %8292 = vpow2.f32 %v4118_v40 }
 0x66d   : > { %v4062_v9 = vpop.xlane.xlu0 %4061  ;;  %v4144_v2 = vsel %vm2374_vm3, %v9950_v20, 0.0 }
 0x66e   : > { %v9954_v12 = vpop.eup %8288  ;;  %v4100_v11 = vsub.f32 %v9898_v57, %v4062_v9  ;;  %4145 = vadd.xlane.f32.xlu0 %v4144_v2 }
 0x66f   : > { %v4065_v8 = vpop.xlane.xlu1 %4064  ;;  %v4147_v25 = vsel %vm2374_vm3, %v9954_v12, 0.0 }
 0x670   : > { %v4120_v13 = vmul.f32 1.442695, %v4100_v11  ;;  %v4101_v33 = vsub.f32 %v9900_v46, %v4065_v8  ;;  %4148 = vadd.xlane.f32.xlu1 %v4147_v25 }
 0x672   : > { %8294 = vpow2.f32 %v4120_v13  ;;  %v4122_v60 = vmul.f32 1.442695, %v4101_v33 }
 0x674   : > { %v9960_v58 = vpop.eup %8290  ;;  %8296 = vpow2.f32 %v4122_v60 }
 0x675   : > { %v4068_v54 = vpop.xlane.xlu0 %4067  ;;  %v4150_v43 = vsel %vm2374_vm3, %v9960_v58, 0.0 }
 0x676   : > { %v9964_v51 = vpop.eup %8292  ;;  %v4102_v57 = vsub.f32 %v9906_v6, %v4068_v54  ;;  %4151 = vadd.xlane.f32.xlu0 %v4150_v43 }
 0x677   : > { %v4071_v23 = vpop.xlane.xlu1 %4070  ;;  %v4153_v21 = vsel %vm2374_vm3, %v9964_v51, 0.0 }
 0x678   : > { %v4124_v46 = vmul.f32 1.442695, %v4102_v57  ;;  %v4103_v59 = vsub.f32 %v9908_v61, %v4071_v23  ;;  %4154 = vadd.xlane.f32.xlu1 %v4153_v21 }
 0x67a   : > { %8298 = vpow2.f32 %v4124_v46  ;;  %v4126_v38 = vmul.f32 1.442695, %v4103_v59 }
 0x67c   : > { %v9970_v28 = vpop.eup %8294  ;;  %8300 = vpow2.f32 %v4126_v38 }
 0x67d   : > { %v4074_v14 = vpop.xlane.xlu0 %4073  ;;  %v4156_v48 = vsel %vm2374_vm3, %v9970_v28, 0.0 }
 0x67e   : > { %v9974_v16 = vpop.eup %8296  ;;  %v4104_v6 = vsub.f32 %v9914_v4, %v4074_v14  ;;  %4157 = vadd.xlane.f32.xlu0 %v4156_v48 }
 0x67f   : > { %v4077_v50 = vpop.xlane.xlu1 %4076  ;;  %v4159_v45 = vsel %vm2374_vm3, %v9974_v16, 0.0 }
 0x680   : > { %v4128_v61 = vmul.f32 1.442695, %v4104_v6  ;;  %v4105_v30 = vsub.f32 %v9916_v39, %v4077_v50  ;;  %4160 = vadd.xlane.f32.xlu1 %v4159_v45 }
 0x682   : > { %8302 = vpow2.f32 %v4128_v61  ;;  %v4130_v37 = vmul.f32 1.442695, %v4105_v30 }
 0x684   : > { %v9980_v40 = vpop.eup %8298  ;;  %8304 = vpow2.f32 %v4130_v37 }
 0x685   : > { %v4080_v9 = vpop.xlane.xlu0 %4079  ;;  %v4162_v2 = vsel %vm2374_vm3, %v9980_v40, 0.0 }
 0x686   : > { %v9984_v11 = vpop.eup %8300  ;;  %v4106_v4 = vsub.f32 %v9922_v35, %v4080_v9  ;;  %4163 = vadd.xlane.f32.xlu0 %v4162_v2 }
 0x687   : > { %v4083_v8 = vpop.xlane.xlu1 %4082  ;;  %v4165_v25 = vsel %vm2374_vm3, %v9984_v11, 0.0 }
 0x688   : > { %v4132_v39 = vmul.f32 1.442695, %v4106_v4  ;;  %v4107_v13 = vsub.f32 %v9924_v29, %v4083_v8  ;;  %4166 = vadd.xlane.f32.xlu1 %v4165_v25 }
 0x68a   : > { %8306 = vpow2.f32 %v4132_v39  ;;  %v4134_v33 = vmul.f32 1.442695, %v4107_v13 }
 0x68c   : > { %v9990_v60 = vpop.eup %8302  ;;  %8308 = vpow2.f32 %v4134_v33 }
 0x68d   : > { %v4086_v54 = vpop.xlane.xlu0 %4085  ;;  %v4168_v43 = vsel %vm2374_vm3, %v9990_v60, 0.0 }
 0x68e   : > { %v9994_v57 = vpop.eup %8304  ;;  %v4108_v35 = vsub.f32 %v9930_v15, %v4086_v54  ;;  %4169 = vadd.xlane.f32.xlu0 %v4168_v43 }
 0x68f   : > { %v4089_v23 = vpop.xlane.xlu1 %4088  ;;  %v4171_v21 = vsel %vm2374_vm3, %v9994_v57, 0.0 }
 0x690   : > { %v4136_v29 = vmul.f32 1.442695, %v4108_v35  ;;  %v4109_v46 = vsub.f32 %v9932_v10, %v4089_v23  ;;  %4172 = vadd.xlane.f32.xlu1 %v4171_v21 }
 0x692   : > { %8310 = vpow2.f32 %v4136_v29  ;;  %v4138_v59 = vmul.f32 1.442695, %v4109_v46 }
 0x694   : > { %v10000_v38 = vpop.eup %8306  ;;  %8312 = vpow2.f32 %v4138_v59 }
 0x695   : > { %v4092_v14 = vpop.xlane.xlu0 %4091  ;;  %v4174_v48 = vsel %vm2374_vm3, %v10000_v38, 0.0 }
 0x696   : > { %v10004_v6 = vpop.eup %8308  ;;  %v4110_v15 = vsub.f32 %v9938_v7, %v4092_v14  ;;  %4175 = vadd.xlane.f32.xlu0 %v4174_v48  ;;  %v11385_v14 = vld [vmem:[#allocation55_spill] sm:$0xff] }
 0x697   : > { %v4095_v50 = vpop.xlane.xlu1 %4094  ;;  %v4177_v45 = vsel %vm2374_vm3, %v10004_v6, 0.0 }
 0x698   : > { %v4140_v10 = vmul.f32 1.442695, %v4110_v15  ;;  %v4111_v61 = vsub.f32 %v9940_v34, %v4095_v50  ;;  %4178 = vadd.xlane.f32.xlu1 %v4177_v45  ;;  %v11386_v15 = vld [vmem:[#allocation56_spill] sm:$0xff] }
 0x69a   : > { %8314 = vpow2.f32 %v4140_v10  ;;  %v4142_v30 = vmul.f32 1.442695, %v4111_v61 }
 0x69c   : > { %v10010_v37 = vpop.eup %8310  ;;  %8316 = vpow2.f32 %v4142_v30 }
 0x69d   : > { %v4180_v9 = vsel %vm2374_vm3, %v10010_v37, 0.0 }
 0x69e   : > { %v10014_v2 = vpop.eup %8312  ;;  %4181 = vadd.xlane.f32.xlu0 %v4180_v9  ;;  %v11387_v9 = vld [vmem:[#allocation57_spill] sm:$0xff] }
 0x69f   : > { %v4183_v7 = vsel %vm2374_vm3, %v10014_v2, 0.0 }
 0x6a0   : > { %4184 = vadd.xlane.f32.xlu1 %v4183_v7 }
 0x6a4   : > { %v10018_v4 = vpop.eup %8314 }
 0x6a5   : > { %v4186_v34 = vsel %vm2374_vm3, %v10018_v4, 0.0 }
 0x6a6   : > { %v10022_v8 = vpop.eup %8316  ;;  %4187 = vadd.xlane.f32.xlu0 %v4186_v34  ;;  %v11388_v34 = vld [vmem:[#allocation58_spill] sm:$0xff] }
 0x6a7   : > { %v4189_v25 = vsel %vm2374_vm3, %v10022_v8, 0.0 }
 0x6a8   : > { %4190 = vadd.xlane.f32.xlu1 %v4189_v25 }
 0x6fb   : > { %v4146_v39 = vpop.xlane.xlu0 %4145 }
 0x6fc   : > { %8318 = vrcp.f32 %v4146_v39 }
 0x6fd   : > { %v4149_v13 = vpop.xlane.xlu1 %4148 }
 0x6fe   : > { %8320 = vrcp.f32 %v4149_v13 }
 0x703   : > { %v4152_v33 = vpop.xlane.xlu0 %4151 }
 0x704   : > { %8322 = vrcp.f32 %v4152_v33 }
 0x705   : > { %v4155_v54 = vpop.xlane.xlu1 %4154 }
 0x706   : > { %v8319_v43 = vpop.eup %8318  ;;  %8324 = vrcp.f32 %v4155_v54 }
 0x707   : > { %v4208_v35 = vmul.f32 %v8319_v43, %v9950_v20  ;;  %v11389_v43 = vld [vmem:[#allocation59_spill] sm:$0xff] }
 0x708   : > { %v8321_v23 = vpop.eup %8320 }
 0x709   : > { %v4209_v21 = vmul.f32 %v8321_v23, %v9954_v12  ;;  %v4224_v29 = vpack.c.bf16 %v4208_v35, %v4208_v35  ;;  %v11390_v23 = vld [vmem:[#allocation60_spill] sm:$0xff] }
 0x70b   : > { %7830 = vmatmul.mubr.msk.bf16.vlgmr.msra.gmra.mrb[144].mxu0 %vm2374_vm3, %v4224_v29  ;;  %v4158_v46 = vpop.xlane.xlu0 %4157  ;;  %v4225_v59 = vpack.c.bf16 %v4209_v21, %v4209_v21 }
 0x70c   : > { %7840 = vmatpush3.bf16.msra.mxu0 %v11385_v14  ;;  %8326 = vrcp.f32 %v4158_v46  ;;  %7841 = vmatprep.mubr.msk.bf16.mxu0 %vm8546_vm1, %v11371_v55 }
 0x70d   : > { %7836 = vmatmul.mubr.msk.bf16.vlgmr.msra.gmra.mrb[144].mxu1 %vm2374_vm3, %v4225_v59  ;;  %v4161_v48 = vpop.xlane.xlu1 %4160  ;;  %7851 = vmatprep.subr.bf16.mxu0 %v11371_v55 }
 0x70e   : > { %v8323_v20 = vpop.eup %8322  ;;  %7846 = vmatpush3.bf16.msra.mxu1 %v11386_v15  ;;  %8328 = vrcp.f32 %v4161_v48  ;;  %7847 = vmatprep.mubr.msk.bf16.mxu1 %vm8546_vm1, %v11371_v55  ;;  %v11391_v48 = vld [vmem:[#allocation61_spill] sm:$0xff]  ;;  %v11392_v15 = vld [vmem:[#allocation62_spill] sm:$0xff] }
 0x70f   : > { %v4210_v12 = vmul.f32 %v8323_v20, %v9960_v58  ;;  %7857 = vmatprep.subr.bf16.mxu1 %v11371_v55 }
 0x710   : > { %v8325_v50 = vpop.eup %8324 }
 0x711   : > { %v4211_v45 = vmul.f32 %v8325_v50, %v9964_v51  ;;  %v4226_v10 = vpack.c.bf16 %v4210_v12, %v4210_v12 }
 0x713   : > { %7842 = vmatmul.mubr.msk.bf16.vlgmr.msra.gmra.mrb[148].mxu0 %vm2374_vm3, %v4226_v10  ;;  %v4164_v61 = vpop.xlane.xlu0 %4163  ;;  %v4227_v30 = vpack.c.bf16 %v4211_v45, %v4211_v45 }
 0x714   : > { %7852 = vmatpush3.bf16.msra.mxu0 %v11387_v9  ;;  %8330 = vrcp.f32 %v4164_v61  ;;  %7853 = vmatprep.mubr.msk.bf16.mxu0 %vm8546_vm1, %v11371_v55 }
 0x715   : > { %7848 = vmatmul.mubr.msk.bf16.vlgmr.msra.gmra.mrb[148].mxu1 %vm2374_vm3, %v4227_v30  ;;  %v4167_v7 = vpop.xlane.xlu1 %4166  ;;  %7863 = vmatprep.subr.bf16.mxu0 %v11371_v55  ;;  %v11393_v30 = vld [vmem:[#allocation63_spill] sm:$0xff] }
 0x716   : > { %v8327_v58 = vpop.eup %8326  ;;  %7858 = vmatpush3.bf16.msra.mxu1 %v11388_v34  ;;  %8332 = vrcp.f32 %v4167_v7  ;;  %7859 = vmatprep.mubr.msk.bf16.mxu1 %vm8546_vm1, %v11371_v55  ;;  %v11394_v7 = vld [vmem:[#allocation64_spill] sm:$0xff] }
 0x717   : > { %v4212_v51 = vmul.f32 %v8327_v58, %v9970_v28  ;;  %7869 = vmatprep.subr.bf16.mxu1 %v11371_v55 }
 0x718   : > { %v8329_v25 = vpop.eup %8328 }
 0x719   : > { %v4213_v39 = vmul.f32 %v8329_v25, %v9974_v16  ;;  %v4228_v13 = vpack.c.bf16 %v4212_v51, %v4212_v51 }
 0x71b   : > { %7854 = vmatmul.mubr.msk.bf16.vlgmr.msra.gmra.mrb[152].mxu0 %vm2374_vm3, %v4228_v13  ;;  %v4170_v33 = vpop.xlane.xlu0 %4169  ;;  %v4229_v54 = vpack.c.bf16 %v4213_v39, %v4213_v39  ;;  %v11395_v13 = vld [vmem:[#allocation65_spill] sm:$0xff] }
 0x71c   : > { %7864 = vmatpush3.bf16.msra.mxu0 %v11389_v43  ;;  %8334 = vrcp.f32 %v4170_v33  ;;  %7865 = vmatprep.mubr.msk.bf16.mxu0 %vm8546_vm1, %v11371_v55 }
 0x71d   : > { %7860 = vmatmul.mubr.msk.bf16.vlgmr.msra.gmra.mrb[152].mxu1 %vm2374_vm3, %v4229_v54  ;;  %v4173_v35 = vpop.xlane.xlu1 %4172  ;;  %7875 = vmatprep.subr.bf16.mxu0 %v11371_v55  ;;  %v11396_v54 = vld [vmem:[#allocation66_spill] sm:$0xff] }
 0x71e   : > { %v8331_v28 = vpop.eup %8330  ;;  %7870 = vmatpush3.bf16.msra.mxu1 %v11390_v23  ;;  %8336 = vrcp.f32 %v4173_v35  ;;  %7871 = vmatprep.mubr.msk.bf16.mxu1 %vm8546_vm1, %v11371_v55  ;;  %v8154_v23 = vld [vmem:[%s11200_s6 + $0x40] sm:$0xff]  }
 0x71f   : > { %v4214_v16 = vmul.f32 %v8331_v28, %v9980_v40  ;;  %7881 = vmatprep.subr.bf16.mxu1 %v11371_v55 }
 0x720   : > { %v8333_v21 = vpop.eup %8332 }
 0x721   : > { %v4215_v29 = vmul.f32 %v8333_v21, %v9984_v11  ;;  %v4230_v46 = vpack.c.bf16 %v4214_v16, %v4214_v16  ;;  %v11397_v21 = vld [vmem:[#allocation67_spill] sm:$0xff] }
 0x723   : > { %7866 = vmatmul.mubr.msk.bf16.vlgmr.msra.gmra.mrb[156].mxu0 %vm2374_vm3, %v4230_v46  ;;  %v4176_v59 = vpop.xlane.xlu0 %4175  ;;  %v4231_v14 = vpack.c.bf16 %v4215_v29, %v4215_v29  ;;  %v11398_v29 = vld [vmem:[#allocation68_spill] sm:$0xff] }
 0x724   : > { %7876 = vmatpush3.bf16.msra.mxu0 %v11391_v48  ;;  %8338 = vrcp.f32 %v4176_v59  ;;  %7877 = vmatprep.mubr.msk.bf16.mxu0 %vm8546_vm1, %v11371_v55  ;;  %v8155_v48 = vld [vmem:[%s11200_s6 + $0x48] sm:$0xff]  }
 0x725   : > { %7872 = vmatmul.mubr.msk.bf16.vlgmr.msra.gmra.mrb[156].mxu1 %vm2374_vm3, %v4231_v14  ;;  %v4179_v20 = vpop.xlane.xlu1 %4178  ;;  %7887 = vmatprep.subr.bf16.mxu0 %v11371_v55 }
 0x726   : > { %v8335_v40 = vpop.eup %8334  ;;  %7882 = vmatpush3.bf16.msra.mxu1 %v11392_v15  ;;  %8340 = vrcp.f32 %v4179_v20  ;;  %7883 = vmatprep.mubr.msk.bf16.mxu1 %vm8546_vm1, %v11371_v55  ;;  %v8160_v15 = vld [vmem:[%s11200_s6 + $0x70] sm:$0xff]  }
 0x727   : > { %v4216_v11 = vmul.f32 %v8335_v40, %v9990_v60  ;;  %7893 = vmatprep.subr.bf16.mxu1 %v11371_v55  ;;  %v8159_v40 = vld [vmem:[%s11200_s6 + $0x68] sm:$0xff]  }
 0x728   : > { %v8337_v12 = vpop.eup %8336 }
 0x729   : > { %v4217_v50 = vmul.f32 %v8337_v12, %v9994_v57  ;;  %v4232_v45 = vpack.c.bf16 %v4216_v11, %v4216_v11  ;;  %v8161_v11 = vld [vmem:[%s11200_s6 + $0x78] sm:$0xff]   ;;  %v8162_v12 = vld [vmem:[%s11200_s6] sm:$0xff]  }
 0x72b   : > { %7878 = vmatmul.mubr.msk.bf16.vlgmr.msra.gmra.mrb[160].mxu0 %vm2374_vm3, %v4232_v45  ;;  %v4182_v10 = vpop.xlane.xlu0 %4181  ;;  %v4233_v61 = vpack.c.bf16 %v4217_v50, %v4217_v50 }
 0x72c   : > { %7888 = vmatpush3.bf16.msra.mxu0 %v11393_v30  ;;  %8342 = vrcp.f32 %v4182_v10  ;;  %7889 = vmatprep.mubr.msk.bf16.mxu0 %vm8546_vm1, %v11371_v55 }
 0x72d   : > { %7884 = vmatmul.mubr.msk.bf16.vlgmr.msra.gmra.mrb[160].mxu1 %vm2374_vm3, %v4233_v61  ;;  %v4185_v9 = vpop.xlane.xlu1 %4184  ;;  %7899 = vmatprep.subr.bf16.mxu0 %v11371_v55 }
 0x72e   : > { %v8339_v60 = vpop.eup %8338  ;;  %7894 = vmatpush3.bf16.msra.mxu1 %v11394_v7  ;;  %8344 = vrcp.f32 %v4185_v9  ;;  %7895 = vmatprep.mubr.msk.bf16.mxu1 %vm8546_vm1, %v11371_v55 }
 0x72f   : > { %v4218_v57 = vmul.f32 %v8339_v60, %v10000_v38  ;;  %7905 = vmatprep.subr.bf16.mxu1 %v11371_v55 }
 0x730   : > { %v8341_v58 = vpop.eup %8340 }
 0x731   : > { %v4219_v34 = vmul.f32 %v8341_v58, %v10004_v6  ;;  %v4234_v51 = vpack.c.bf16 %v4218_v57, %v4218_v57 }
 0x733   : > { %7890 = vmatmul.mubr.msk.bf16.vlgmr.msra.gmra.mrb[164].mxu0 %vm2374_vm3, %v4234_v51  ;;  %v4188_v25 = vpop.xlane.xlu0 %4187  ;;  %v4235_v39 = vpack.c.bf16 %v4219_v34, %v4219_v34 }
 0x734   : > { %7900 = vmatpush3.bf16.msra.mxu0 %v11395_v13  ;;  %8346 = vrcp.f32 %v4188_v25  ;;  %7901 = vmatprep.mubr.msk.bf16.mxu0 %vm8546_vm1, %v11371_v55 }
 0x735   : > { %7896 = vmatmul.mubr.msk.bf16.vlgmr.msra.gmra.mrb[164].mxu1 %vm2374_vm3, %v4235_v39  ;;  %v4191_v33 = vpop.xlane.xlu1 %4190  ;;  %7911 = vmatprep.subr.bf16.mxu0 %v11371_v55 }
 0x736   : > { %v8343_v38 = vpop.eup %8342  ;;  %7906 = vmatpush3.bf16.msra.mxu1 %v11396_v54  ;;  %8348 = vrcp.f32 %v4191_v33  ;;  %7907 = vmatprep.mubr.msk.bf16.mxu1 %vm8546_vm1, %v11371_v55 }
 0x737   : > { %v4220_v6 = vmul.f32 %v8343_v38, %v10010_v37  ;;  %7917 = vmatprep.subr.bf16.mxu1 %v11371_v55  ;;  %v8163_v38 = vld [vmem:[%s11200_s6 + $0x8] sm:$0xff]  }
 0x738   : > { %v8345_v43 = vpop.eup %8344 }
 0x739   : > { %v4221_v35 = vmul.f32 %v8345_v43, %v10014_v2  ;;  %v4236_v28 = vpack.c.bf16 %v4220_v6, %v4220_v6  ;;  %v8164_v43 = vld [vmem:[%s11200_s6 + $0x10] sm:$0xff]  }
 0x73b   : > { %7902 = vmatmul.mubr.msk.bf16.vlgmr.msra.gmra.mrb[168].mxu0 %vm2374_vm3, %v4236_v28  ;;  %v4237_v16 = vpack.c.bf16 %v4221_v35, %v4221_v35 }
 0x73c   : > { %7912 = vmatpush3.bf16.msra.mxu0 %v11397_v21  ;;  %7913 = vmatprep.mubr.msk.bf16.mxu0 %vm8546_vm1, %v11371_v55 }
 0x73d   : > { %7908 = vmatmul.mubr.msk.bf16.vlgmr.msra.gmra.mrb[168].mxu1 %vm2374_vm3, %v4237_v16  ;;  %7923 = vmatprep.subr.bf16.mxu0 %v8154_v23 }
 0x73e   : > { %v8347_v37 = vpop.eup %8346  ;;  %7918 = vmatpush3.bf16.msra.mxu1 %v11398_v29  ;;  %7919 = vmatprep.mubr.msk.bf16.mxu1 %vm8546_vm1, %v11371_v55  ;;  %v8156_v55 = vld [vmem:[%s11200_s6 + $0x50] sm:$0xff]  }
 0x73f   : > { %v4222_v2 = vmul.f32 %v8347_v37, %v10018_v4  ;;  %v8157_v4 = vld [vmem:[%s11200_s6 + $0x58] sm:$0xff]  }
 0x740   : > { %v8349_v46 = vpop.eup %8348 }
 0x741   : > { %v4223_v59 = vmul.f32 %v8349_v46, %v10022_v8  ;;  %v4238_v14 = vpack.c.bf16 %v4222_v2, %v4222_v2  ;;  %v8158_v8 = vld [vmem:[%s11200_s6 + $0x60] sm:$0xff]   ;;  %v8165_v2 = vld [vmem:[%s11200_s6 + $0x18] sm:$0xff]  }
 0x743   : > { %7914 = vmatmul.mubr.msk.bf16.vlgmr.msra.gmra.mrb[172].mxu0 %vm2374_vm3, %v4238_v14  ;;  %v4239_v20 = vpack.c.bf16 %v4223_v59, %v4223_v59  ;;  %v8166_v14 = vld [vmem:[%s11200_s6 + $0x20] sm:$0xff]  }
 0x744   : > { %7924 = vmatpush3.bf16.msra.mxu0 %v8154_v23 }
 0x745   : > { %7920 = vmatmul.mubr.msk.bf16.vlgmr.msra.gmra.mrb[172].mxu1 %vm2374_vm3, %v4239_v20  ;;  %7925 = vmatprep.subr.bf16.mxu0 %v8155_v48 }
 0x748   : > { %7926 = vmatpush3.bf16.msra.mxu0 %v8155_v48 }
 0x749   : > { %7927 = vmatprep.subr.bf16.mxu0 %v8156_v55 }
 0x74c   : > { %7928 = vmatpush3.bf16.msra.mxu0 %v8156_v55 }
 0x74d   : > { %7929 = vmatprep.subr.bf16.mxu0 %v8157_v4 }
 0x750   : > { %7930 = vmatpush3.bf16.msra.mxu0 %v8157_v4 }
 0x751   : > { %7931 = vmatprep.subr.bf16.mxu0 %v8158_v8 }
 0x754   : > { %7932 = vmatpush3.bf16.msra.mxu0 %v8158_v8 }
 0x755   : > { %7933 = vmatprep.subr.bf16.mxu0 %v8159_v40 }
 0x758   : > { %7934 = vmatpush3.bf16.msra.mxu0 %v8159_v40 }
 0x759   : > { %7935 = vmatprep.subr.bf16.mxu0 %v8160_v15 }
 0x75c   : > { %7936 = vmatpush3.bf16.msra.mxu0 %v8160_v15 }
 0x75d   : > { %7937 = vmatprep.subr.bf16.mxu0 %v8161_v11 }
 0x760   : > { %7938 = vmatpush3.bf16.msra.mxu0 %v8161_v11  ;;  %v8167_v11 = vld [vmem:[%s11200_s6 + $0x28] sm:$0xff]  }
 0x761   : > { %7955 = vmatprep.subr.bf16.mxu0 %v8162_v12 }
 0x7de   : > { %v4281_v50 = vpop.f32.mrb[144].mxu0 }
 0x7df   : > { %v7831_v45 = vpop.f32.mrb[145].mxu0 }
 0x7e0   : > { %v4284_v10 = vpop.f32.mrb[146].mxu0  ;;  %v4328_v61 = vpop.f32.mrb[144].mxu1  ;;  %v8168_v45 = vld [vmem:[%s11200_s6 + $0x30] sm:$0xff]  }
 0x7e1   : > { %v4992_v30 = vpack.c.bf16 %v4328_v61, %v4281_v50  ;;  %v7832_v9 = vpop.f32.mrb[147].mxu0  ;;  %v7837_v60 = vpop.f32.mrb[145].mxu1 }
 0x7e2   : > { %v4331_v7 = vpop.f32.mrb[146].mxu1 }
 0x7e3   : > { %v7838_v57 = vpop.f32.mrb[147].mxu1  ;;  %7939 = vmatprep.mubr.bf16.mxu0 %v4992_v30 }
 0x7e6   : > { %v4375_v58 = vpop.f32.mrb[148].mxu0 }
 0x7e7   : > { %v7843_v34 = vpop.f32.mrb[149].mxu0 }
 0x7e8   : > { %v4378_v51 = vpop.f32.mrb[150].mxu0  ;;  %v4422_v25 = vpop.f32.mrb[148].mxu1 }
 0x7e9   : > { %v4993_v39 = vpack.c.bf16 %v4422_v25, %v4375_v58  ;;  %v7844_v13 = vpop.f32.mrb[151].mxu0  ;;  %v7849_v33 = vpop.f32.mrb[149].mxu1  ;;  %v8169_v58 = vld [vmem:[%s11200_s6 + $0x38] sm:$0xff]  }
 0x7ea   : > { %v4425_v54 = vpop.f32.mrb[150].mxu1 }
 0x7eb   : > { %v7850_v6 = vpop.f32.mrb[151].mxu1  ;;  %7940 = vmatmul.mubr.bf16.vlgmr.msra.gmra.mrb[176].mxu0 %v4993_v39 }
 0x7ec   : > { %7956 = vmatpush3.bf16.msra.mxu0 %v8162_v12 }
 0x7ed   : > { %7957 = vmatprep.subr.bf16.mxu0 %v8163_v38 }
 0x7ee   : > { %v4469_v35 = vpop.f32.mrb[152].mxu0 }
 0x7ef   : > { %v7855_v28 = vpop.f32.mrb[153].mxu0 }
 0x7f0   : > { %v4472_v23 = vpop.f32.mrb[154].mxu0  ;;  %v4516_v16 = vpop.f32.mrb[152].mxu1  ;;  %7958 = vmatpush3.bf16.msra.mxu0 %v8163_v38 }
 0x7f1   : > { %v4994_v21 = vpack.c.bf16 %v4516_v16, %v4469_v35  ;;  %v7856_v37 = vpop.f32.mrb[155].mxu0  ;;  %v7861_v29 = vpop.f32.mrb[153].mxu1  ;;  %7959 = vmatprep.subr.bf16.mxu0 %v8164_v43 }
 0x7f2   : > { %v4519_v46 = vpop.f32.mrb[154].mxu1 }
 0x7f3   : > { %v7862_v59 = vpop.f32.mrb[155].mxu1  ;;  %7943 = vmatprep.mubr.bf16.mxu0 %v4994_v21 }
 0x7f4   : > { %7960 = vmatpush3.bf16.msra.mxu0 %v8164_v43 }
 0x7f5   : > { %7961 = vmatprep.subr.bf16.mxu0 %v8165_v2 }
 0x7f6   : > { %v4563_v48 = vpop.f32.mrb[156].mxu0 }
 0x7f7   : > { %v7867_v20 = vpop.f32.mrb[157].mxu0 }
 0x7f8   : > { %v4566_v55 = vpop.f32.mrb[158].mxu0  ;;  %v4610_v4 = vpop.f32.mrb[156].mxu1  ;;  %7962 = vmatpush3.bf16.msra.mxu0 %v8165_v2 }
 0x7f9   : > { %v4995_v8 = vpack.c.bf16 %v4610_v4, %v4563_v48  ;;  %v7868_v40 = vpop.f32.mrb[159].mxu0  ;;  %v7873_v15 = vpop.f32.mrb[157].mxu1  ;;  %7963 = vmatprep.subr.bf16.mxu0 %v8166_v14 }
 0x7fa   : > { %v4613_v12 = vpop.f32.mrb[158].mxu1 }
 0x7fb   : > { %v7874_v50 = vpop.f32.mrb[159].mxu1  ;;  %7944 = vmatmul.mubr.bf16.gmra.mrb[180].mxu0 %v4995_v8 }
 0x7fc   : > { %7964 = vmatpush3.bf16.msra.mxu0 %v8166_v14 }
 0x7fd   : > { %7965 = vmatprep.subr.bf16.mxu0 %v8167_v11 }
 0x7fe   : > { %v4657_v10 = vpop.f32.mrb[160].mxu0 }
 0x7ff   : > { %v7879_v61 = vpop.f32.mrb[161].mxu0 }
 0x800   : > { %v4660_v30 = vpop.f32.mrb[162].mxu0  ;;  %v4704_v9 = vpop.f32.mrb[160].mxu1  ;;  %7966 = vmatpush3.bf16.msra.mxu0 %v8167_v11 }
 0x801   : > { %v4996_v60 = vpack.c.bf16 %v4704_v9, %v4657_v10  ;;  %v7880_v7 = vpop.f32.mrb[163].mxu0  ;;  %v7885_v57 = vpop.f32.mrb[161].mxu1  ;;  %7967 = vmatprep.subr.bf16.mxu0 %v8168_v45  ;;  %v8449_v30 = vld [vmem:[%s8680_s24 + $0x18] sm:$0xff] }
 0x802   : > { %v4707_v34 = vpop.f32.mrb[162].mxu1  ;;  %v8450_v57 = vld [vmem:[%s8680_s24 + $0x8] sm:$0xff] }
 0x803   : > { %v7886_v51 = vpop.f32.mrb[163].mxu1  ;;  %7947 = vmatprep.mubr.bf16.mxu0 %v4996_v60  ;;  %v11404_v60 = vld [vmem:[#allocation23_spill] sm:$0xff] }
 0x804   : > { %7968 = vmatpush3.bf16.msra.mxu0 %v8168_v45  ;;  %v8448_v45 = vld [vmem:[%s8680_s24] sm:$0xff] }
 0x805   : > { %7969 = vmatprep.subr.bf16.mxu0 %v8169_v58 }
 0x806   : > { %v4751_v25 = vpop.f32.mrb[164].mxu0 }
 0x807   : > { %v7891_v39 = vpop.f32.mrb[165].mxu0 }
 0x808   : > { %v4754_v13 = vpop.f32.mrb[166].mxu0  ;;  %v4798_v33 = vpop.f32.mrb[164].mxu1  ;;  %7970 = vmatpush3.bf16.msra.mxu0 %v8169_v58 }
 0x809   : > { %v4997_v38 = vpack.c.bf16 %v4798_v33, %v4751_v25  ;;  %v7892_v54 = vpop.f32.mrb[167].mxu0  ;;  %v7897_v6 = vpop.f32.mrb[165].mxu1  ;;  %v11405_v25 = vld [vmem:[#allocation17_spill] sm:$0xff] }
 0x80a   : > { %v4801_v43 = vpop.f32.mrb[166].mxu1 }
 0x80b   : > { %v7898_v35 = vpop.f32.mrb[167].mxu1  ;;  %7948 = vmatmul.mubr.bf16.gmra.mrb[184].mxu0 %v4997_v38  ;;  %v11406_v38 = vld [vmem:[#allocation22_spill] sm:$0xff] }
 0x80e   : > { %v4845_v28 = vpop.f32.mrb[168].mxu0 }
 0x80f   : > { %v7903_v23 = vpop.f32.mrb[169].mxu0 }
 0x810   : > { %v4848_v16 = vpop.f32.mrb[170].mxu0  ;;  %v4892_v21 = vpop.f32.mrb[168].mxu1 }
 0x811   : > { %v4998_v37 = vpack.c.bf16 %v4892_v21, %v4845_v28  ;;  %v7904_v29 = vpop.f32.mrb[171].mxu0  ;;  %v7909_v2 = vpop.f32.mrb[169].mxu1  ;;  %v11407_v28 = vld [vmem:[#allocation19_spill] sm:$0xff] }
 0x812   : > { %v4895_v46 = vpop.f32.mrb[170].mxu1 }
 0x813   : > { %v7910_v59 = vpop.f32.mrb[171].mxu1  ;;  %7951 = vmatprep.mubr.bf16.mxu0 %v4998_v37 }
 0x814   : > { %v8451_v59 = vld [vmem:[%s8680_s24 + $0x30] sm:$0xff] }
 0x816   : > { %v4939_v14 = vpop.f32.mrb[172].mxu0 }
 0x817   : > { %v7915_v48 = vpop.f32.mrb[173].mxu0 }
 0x818   : > { %v4942_v20 = vpop.f32.mrb[174].mxu0  ;;  %v4986_v55 = vpop.f32.mrb[172].mxu1 }
 0x819   : > { %v4999_v4 = vpack.c.bf16 %v4986_v55, %v4939_v14  ;;  %v7916_v8 = vpop.f32.mrb[175].mxu0  ;;  %v7921_v40 = vpop.f32.mrb[173].mxu1  ;;  %v8452_v20 = vld [vmem:[%s8680_s24 + $0x20] sm:$0xff] }
 0x81a   : > { %v4989_v15 = vpop.f32.mrb[174].mxu1  ;;  %v8453_v40 = vld [vmem:[%s8680_s24 + $0x38] sm:$0xff] }
 0x81b   : > { %v7922_v11 = vpop.f32.mrb[175].mxu1  ;;  %7952 = vmatmul.mubr.bf16.gmra.mrb[188].mxu0 %v4999_v4 }
 0x81c   : > { %7971 = vmatprep.mubr.bf16.mxu0 %v3304_v53  ;;  %v10188_v53 = vsub.s32 2, %v11399_v47  ;;  %v11408_v11 = vld [vmem:[#allocation31_spill] sm:$0xff] }
 0x81e   : > { %v5334_v52 = vrot.slane %v11403_v19, %v10188_v53  ;;  %v5354_v7 = vrot.slane %v11404_v60, %v10188_v53  ;;  %v5346_v39 = vrot.slane %v11405_v25, %v10188_v53  ;;  %v5358_v54 = vrot.slane %v11406_v38, %v10188_v53 }
 0x81f   : > { %v5350_v23 = vrot.slane %v11407_v28, %v10188_v53 }
 0x823   : > { %7972 = vmatmul.mubr.bf16.vlgmr.msra.gmra.mrb[176].mxu0 %v3305_v1  ;;  %v11400_v1 = vld [vmem:[#allocation14_spill] sm:$0xff] }
 0x824   : > { %7975 = vmatprep.mubr.bf16.mxu0 %v3306_v41  ;;  %v5338_v24 = vrot.slane %v11400_v1, %v10188_v53  ;;  %v11401_v41 = vld [vmem:[#allocation10_spill] sm:$0xff] }
 0x825   : > { %v5330_v31 = vrot.slane %v11401_v41, %v10188_v53 }
 0x82b   : > { %7976 = vmatmul.mubr.bf16.gmra.mrb[180].mxu0 %v3307_v56  ;;  %v11402_v56 = vld [vmem:[#allocation15_spill] sm:$0xff] }
 0x82c   : > { %7979 = vmatprep.mubr.bf16.mxu0 %v3308_v44  ;;  %v5342_v3 = vrot.slane %v11402_v56, %v10188_v53 }
 0x833   : > { %7980 = vmatmul.mubr.bf16.gmra.mrb[184].mxu0 %v3309_v0 }
 0x834   : > { %7983 = vmatprep.mubr.bf16.mxu0 %v3310_v49 }
 0x83b   : > { %7984 = vmatmul.mubr.bf16.gmra.mrb[188].mxu0 %v3311_v22  ;;  %v8447_v22 = vld [vmem:[%s8680_s24 + $0x10] sm:$0xff] }
 0x8f6   : > { %v7973_v62 = vpop.f32.mrb[176].mxu0 }
 0x8f7   : > { %v5313_v36 = vadd.f32 %v7973_v62, %v10197_v17  ;;  %v5244_v63 = vpop.f32.mrb[177].mxu0  ;;  %v8454_v62 = vld [vmem:[%s8680_s24 + $0x28] sm:$0xff] }
 0x8f8   : > { %v5311_v27 = vadd.f32 %v10197_v17, %v5244_v63  ;;  %v7974_v44 = vpop.f32.mrb[178].mxu0 }
 0x8f9   : > { %v5393_v0 = vmul.f32 %v5338_v24, %v5313_v36  ;;  %v5314_v26 = vadd.f32 %v7974_v44, %v10197_v17  ;;  %v5247_v49 = vpop.f32.mrb[179].mxu0  ;;  %v5370_v24 = vrot.slane %v11408_v11, %v10188_v53 }
 0x8fa   : > { %v5391_v18 = vmul.f32 %v5330_v31, %v5311_v27  ;;  %v5312_v32 = vadd.f32 %v10197_v17, %v5247_v49 }
 0x8fb   : > { %v10212_v12 = vadd.f32 %v8447_v22, %v5393_v0  ;;  %v5394_v50 = vmul.f32 %v5342_v3, %v5314_v26  ;;  %v11409_v3 = vld [vmem:[#allocation27_spill] sm:$0xff]  ;;  %v11410_v0 = vld [vmem:[#allocation30_spill] sm:$0xff] }
 0x8fc   : > { %v10215_v10 = vadd.f32 %v8448_v45, %v5391_v18  ;;  %v5392_v61 = vmul.f32 %v5334_v52, %v5312_v32  ;;  %v5362_v27 = vrot.slane %v11409_v3, %v10188_v53  ;;  %v5374_v26 = vrot.slane %v11410_v0, %v10188_v53  ;;  %v11411_v22 = vld [vmem:[#allocation26_spill] sm:$0xff] }
 0x8fd   : > { %5425 = vst.msk [vmem:[#allocation2 + $0x10] sm:$0xff] %vm577_vm0, %v10212_v12  ;;  %v10220_v9 = vadd.f32 %v8449_v30, %v5394_v50  ;;  %v5445_v46 = vsel %vm577_vm0, %v10212_v12, 0.0  ;;  %v5366_v50 = vrot.slane %v11411_v22, %v10188_v53 }
 0x8fe   : > { %5423 = vst.msk [vmem:[#allocation2] sm:$0xff] %vm577_vm0, %v10215_v10  ;;  %v10227_v58 = vadd.f32 %v8450_v57, %v5392_v61  ;;  %v7977_v34 = vpop.f32.mrb[180].mxu0  ;;  %v5439_v51 = vsel %vm577_vm0, %v10215_v10, 0.0 }
 0x8ff   : > { %5426 = vst.msk [vmem:[#allocation2 + $0x18] sm:$0xff] %vm577_vm0, %v10220_v9  ;;  %v5317_v13 = vadd.f32 %v7977_v34, %v10197_v17  ;;  %5440 = vadd.xlane.f32.xlu0 %v5439_v51  ;;  %v5260_v33 = vpop.f32.mrb[181].mxu0  ;;  %v5448_v8 = vsel %vm577_vm0, %v10220_v9, 0.0  ;;  %v8455_v51 = vld [vmem:[%s8680_s24 + $0x50] sm:$0xff] }
 0x900   : > { %5424 = vst.msk [vmem:[#allocation2 + $0x8] sm:$0xff] %vm577_vm0, %v10227_v58  ;;  %v5315_v6 = vadd.f32 %v10197_v17, %v5260_v33  ;;  %v7978_v43 = vpop.f32.mrb[182].mxu0  ;;  %v5442_v35 = vsel %vm577_vm0, %v10227_v58, 0.0  ;;  %v8456_v33 = vld [vmem:[%s8680_s24 + $0x40] sm:$0xff] }
 0x901   : > { %v5397_v16 = vmul.f32 %v5354_v7, %v5317_v13  ;;  %v5318_v21 = vadd.f32 %v7978_v43, %v10197_v17  ;;  %5443 = vadd.xlane.f32.xlu1 %v5442_v35  ;;  %v5263_v37 = vpop.f32.mrb[183].mxu0  ;;  %v8457_v35 = vld [vmem:[%s8680_s24 + $0x58] sm:$0xff] }
 0x902   : > { %v5395_v29 = vmul.f32 %v5346_v39, %v5315_v6  ;;  %v5316_v2 = vadd.f32 %v10197_v17, %v5263_v37  ;;  %v8458_v37 = vld [vmem:[%s8680_s24 + $0x48] sm:$0xff] }
 0x903   : > { %v10250_v14 = vadd.f32 %v8451_v59, %v5397_v16  ;;  %v5398_v48 = vmul.f32 %v5358_v54, %v5318_v21  ;;  %5446 = vadd.xlane.f32.xlu0 %v5445_v46  ;;  %v11412_v16 = vld [vmem:[#allocation38_spill] sm:$0xff]  ;;  %v11413_v59 = vld [vmem:[#allocation35_spill] sm:$0xff] }
 0x904   : > { %v10253_v55 = vadd.f32 %v8452_v20, %v5395_v29  ;;  %v5396_v4 = vmul.f32 %v5350_v23, %v5316_v2  ;;  %v5386_v21 = vrot.slane %v11412_v16, %v10188_v53 }
 0x905   : > { %5429 = vst.msk [vmem:[#allocation2 + $0x30] sm:$0xff] %vm577_vm0, %v10250_v14  ;;  %v10260_v15 = vadd.f32 %v8453_v40, %v5398_v48  ;;  %5449 = vadd.xlane.f32.xlu1 %v5448_v8  ;;  %v5457_v34 = vsel %vm577_vm0, %v10250_v14, 0.0  ;;  %v5378_v48 = vrot.slane %v11413_v59, %v10188_v53  ;;  %v11414_v8 = vld [vmem:[#allocation39_spill] sm:$0xff] }
 0x906   : > { %5427 = vst.msk [vmem:[#allocation2 + $0x20] sm:$0xff] %vm577_vm0, %v10253_v55  ;;  %v10267_v31 = vadd.f32 %v8454_v62, %v5396_v4  ;;  %v7981_v36 = vpop.f32.mrb[184].mxu0  ;;  %v5451_v63 = vsel %vm577_vm0, %v10253_v55, 0.0  ;;  %v5390_v40 = vrot.slane %v11414_v8, %v10188_v53 }
 0x907   : > { %5430 = vst.msk [vmem:[#allocation2 + $0x38] sm:$0xff] %vm577_vm0, %v10260_v15  ;;  %v5321_v44 = vadd.f32 %v7981_v36, %v10197_v17  ;;  %5452 = vadd.xlane.f32.xlu0 %v5451_v63  ;;  %v5276_v52 = vpop.f32.mrb[185].mxu0  ;;  %v5460_v43 = vsel %vm577_vm0, %v10260_v15, 0.0  ;;  %v11415_v63 = vld [vmem:[#allocation34_spill] sm:$0xff] }
 0x908   : > { %5428 = vst.msk [vmem:[#allocation2 + $0x28] sm:$0xff] %vm577_vm0, %v10267_v31  ;;  %v5319_v49 = vadd.f32 %v10197_v17, %v5276_v52  ;;  %v7982_v18 = vpop.f32.mrb[186].mxu0  ;;  %v5454_v32 = vsel %vm577_vm0, %v10267_v31, 0.0 }
 0x909   : > { %v5401_v45 = vmul.f32 %v5370_v24, %v5321_v44  ;;  %v5322_v61 = vadd.f32 %v7982_v18, %v10197_v17  ;;  %5455 = vadd.xlane.f32.xlu1 %v5454_v32  ;;  %v5279_v30 = vpop.f32.mrb[187].mxu0 }
 0x90a   : > { %v5399_v7 = vmul.f32 %v5362_v27, %v5319_v49  ;;  %v5320_v57 = vadd.f32 %v10197_v17, %v5279_v30  ;;  %v5382_v27 = vrot.slane %v11415_v63, %v10188_v53  ;;  %v8460_v30 = vld [vmem:[%s8680_s24 + $0x60] sm:$0xff] }
 0x90b   : > { %v10290_v39 = vadd.f32 %v8455_v51, %v5401_v45  ;;  %v5402_v13 = vmul.f32 %v5374_v26, %v5322_v61  ;;  %5458 = vadd.xlane.f32.xlu0 %v5457_v34  ;;  %v8461_v51 = vld [vmem:[%s8680_s24 + $0x78] sm:$0xff] }
 0x90c   : > { %v10293_v54 = vadd.f32 %v8456_v33, %v5399_v7  ;;  %v5400_v6 = vmul.f32 %v5366_v50, %v5320_v57  ;;  %v8459_v50 = vld [vmem:[%s8680_s24 + $0x70] sm:$0xff] }
 0x90d   : > { %5433 = vst.msk [vmem:[#allocation2 + $0x50] sm:$0xff] %vm577_vm0, %v10290_v39  ;;  %v10300_v23 = vadd.f32 %v8457_v35, %v5402_v13  ;;  %5461 = vadd.xlane.f32.xlu1 %v5460_v43  ;;  %v5469_v32 = vsel %vm577_vm0, %v10290_v39, 0.0  ;;  %v8462_v13 = vld [vmem:[%s8680_s24 + $0x68] sm:$0xff] }
 0x90e   : > { %5431 = vst.msk [vmem:[#allocation2 + $0x40] sm:$0xff] %vm577_vm0, %v10293_v54  ;;  %v10307_v29 = vadd.f32 %v8458_v37, %v5400_v6  ;;  %v7985_v2 = vpop.f32.mrb[188].mxu0  ;;  %v5463_v46 = vsel %vm577_vm0, %v10293_v54, 0.0 }
 0x90f   : > { %5434 = vst.msk [vmem:[#allocation2 + $0x58] sm:$0xff] %vm577_vm0, %v10300_v23  ;;  %v5325_v20 = vadd.f32 %v7985_v2, %v10197_v17  ;;  %5464 = vadd.xlane.f32.xlu0 %v5463_v46  ;;  %v5292_v4 = vpop.f32.mrb[189].mxu0  ;;  %v5472_v34 = vsel %vm577_vm0, %v10300_v23, 0.0 }
 0x910   : > { %5432 = vst.msk [vmem:[#allocation2 + $0x48] sm:$0xff] %vm577_vm0, %v10307_v29  ;;  %v5323_v24 = vadd.f32 %v10197_v17, %v5292_v4  ;;  %v7986_v62 = vpop.f32.mrb[190].mxu0  ;;  %v5466_v36 = vsel %vm577_vm0, %v10307_v29, 0.0 }
 0x911   : > { %v5405_v44 = vmul.f32 %v5386_v21, %v5325_v20  ;;  %v5326_v52 = vadd.f32 %v7986_v62, %v10197_v17  ;;  %5467 = vadd.xlane.f32.xlu1 %v5466_v36  ;;  %v5295_v26 = vpop.f32.mrb[191].mxu0 }
 0x912   : > { %v5403_v49 = vmul.f32 %v5378_v48, %v5323_v24  ;;  %v5324_v18 = vadd.f32 %v10197_v17, %v5295_v26 }
 0x913   : > { %v10330_v45 = vadd.f32 %v8459_v50, %v5405_v44  ;;  %v5406_v61 = vmul.f32 %v5390_v40, %v5326_v52  ;;  %5470 = vadd.xlane.f32.xlu0 %v5469_v32 }
 0x914   : > { %v10333_v7 = vadd.f32 %v8460_v30, %v5403_v49  ;;  %v5404_v57 = vmul.f32 %v5382_v27, %v5324_v18 }
 0x915   : > { %5437 = vst.msk [vmem:[#allocation2 + $0x70] sm:$0xff] %vm577_vm0, %v10330_v45  ;;  %v10340_v17 = vadd.f32 %v8461_v51, %v5406_v61  ;;  %5473 = vadd.xlane.f32.xlu1 %v5472_v34  ;;  %v5481_v35 = vsel %vm577_vm0, %v10330_v45, 0.0 }
 0x916   : > { %5435 = vst.msk [vmem:[#allocation2 + $0x60] sm:$0xff] %vm577_vm0, %v10333_v7  ;;  %v10345_v33 = vadd.f32 %v8462_v13, %v5404_v57  ;;  %v5475_v6 = vsel %vm577_vm0, %v10333_v7, 0.0 }
 0x917   : > { %5438 = vst.msk [vmem:[#allocation2 + $0x78] sm:$0xff] %vm577_vm0, %v10340_v17  ;;  %5476 = vadd.xlane.f32.xlu0 %v5475_v6  ;;  %v5484_v21 = vsel %vm577_vm0, %v10340_v17, 0.0 }
 0x918   : > { %5436 = vst.msk [vmem:[#allocation2 + $0x68] sm:$0xff] %vm577_vm0, %v10345_v33  ;;  %v5478_v43 = vsel %vm577_vm0, %v10345_v33, 0.0 }
 0x919   : > { %5479 = vadd.xlane.f32.xlu1 %v5478_v43 }
 0x91b   : > { %5482 = vadd.xlane.f32.xlu0 %v5481_v35 }
 0x91d   : > { %5485 = vadd.xlane.f32.xlu1 %v5484_v21 }
 0x98c   : > { %v5441_v37 = vpop.xlane.xlu0 %5440 }
 0x98d   : > { %v5487_v2 = vmul.f32 0.03125, %v5441_v37 }
 0x98e   : > { %v5444_v46 = vpop.xlane.xlu1 %5443 }
 0x98f   : > { %v10360_v48 = vsub.f32 %v10215_v10, %v5487_v2  ;;  %v5488_v20 = vmul.f32 0.03125, %v5444_v46 }
 0x990   : > { %v5447_v4 = vpop.xlane.xlu0 %5446 }
 0x991   : > { %v10363_v40 = vsub.f32 %v10227_v58, %v5488_v20  ;;  %v5489_v24 = vmul.f32 0.03125, %v5447_v4  ;;  %v5519_v62 = vmul.f32 %v10360_v48, %v10360_v48 }
 0x992   : > { %v5450_v36 = vpop.xlane.xlu1 %5449 }
 0x993   : > { %v10368_v27 = vsub.f32 %v10212_v12, %v5489_v24  ;;  %v5490_v44 = vmul.f32 0.03125, %v5450_v36  ;;  %v5535_v52 = vsel %vm577_vm0, %v5519_v62, 0.0  ;;  %v5520_v10 = vmul.f32 %v10363_v40, %v10363_v40 }
 0x994   : > { %v5453_v26 = vpop.xlane.xlu0 %5452  ;;  %5536 = vadd.xlane.f32.xlu0 %v5535_v52 }
 0x995   : > { %v10374_v49 = vsub.f32 %v10220_v9, %v5490_v44  ;;  %v5491_v58 = vmul.f32 0.03125, %v5453_v26  ;;  %v5538_v18 = vsel %vm577_vm0, %v5520_v10, 0.0  ;;  %v5521_v32 = vmul.f32 %v10368_v27, %v10368_v27 }
 0x996   : > { %v5456_v50 = vpop.xlane.xlu1 %5455  ;;  %5539 = vadd.xlane.f32.xlu1 %v5538_v18 }
 0x997   : > { %v10380_v12 = vsub.f32 %v10253_v55, %v5491_v58  ;;  %v5492_v61 = vmul.f32 0.03125, %v5456_v50  ;;  %v5541_v30 = vsel %vm577_vm0, %v5521_v32, 0.0  ;;  %v5522_v57 = vmul.f32 %v10374_v49, %v10374_v49 }
 0x998   : > { %v5459_v34 = vpop.xlane.xlu0 %5458  ;;  %5542 = vadd.xlane.f32.xlu0 %v5541_v30 }
 0x999   : > { %v10386_v9 = vsub.f32 %v10267_v31, %v5492_v61  ;;  %v5493_v51 = vmul.f32 0.03125, %v5459_v34  ;;  %v5544_v13 = vsel %vm577_vm0, %v5522_v57, 0.0  ;;  %v5523_v6 = vmul.f32 %v10380_v12, %v10380_v12 }
 0x99a   : > { %v5462_v43 = vpop.xlane.xlu1 %5461  ;;  %5545 = vadd.xlane.f32.xlu1 %v5544_v13 }
 0x99b   : > { %v10392_v55 = vsub.f32 %v10250_v14, %v5493_v51  ;;  %v5494_v35 = vmul.f32 0.03125, %v5462_v43  ;;  %v5547_v21 = vsel %vm577_vm0, %v5523_v6, 0.0  ;;  %v5524_v37 = vmul.f32 %v10386_v9, %v10386_v9 }
 0x99c   : > { %v5465_v2 = vpop.xlane.xlu0 %5464  ;;  %5548 = vadd.xlane.f32.xlu0 %v5547_v21 }
 0x99d   : > { %v10398_v31 = vsub.f32 %v10260_v15, %v5494_v35  ;;  %v5495_v46 = vmul.f32 0.03125, %v5465_v2  ;;  %v5550_v20 = vsel %vm577_vm0, %v5524_v37, 0.0  ;;  %v5525_v4 = vmul.f32 %v10392_v55, %v10392_v55 }
 0x99e   : > { %v5468_v24 = vpop.xlane.xlu1 %5467  ;;  %5551 = vadd.xlane.f32.xlu1 %v5550_v20 }
 0x99f   : > { %v10404_v14 = vsub.f32 %v10293_v54, %v5495_v46  ;;  %v5496_v62 = vmul.f32 0.03125, %v5468_v24  ;;  %v5553_v36 = vsel %vm577_vm0, %v5525_v4, 0.0  ;;  %v5526_v44 = vmul.f32 %v10398_v31, %v10398_v31 }
 0x9a0   : > { %v5471_v52 = vpop.xlane.xlu0 %5470  ;;  %5554 = vadd.xlane.f32.xlu0 %v5553_v36 }
 0x9a1   : > { %v10410_v15 = vsub.f32 %v10307_v29, %v5496_v62  ;;  %v5497_v10 = vmul.f32 0.03125, %v5471_v52  ;;  %v5556_v26 = vsel %vm577_vm0, %v5526_v44, 0.0  ;;  %v5527_v58 = vmul.f32 %v10404_v14, %v10404_v14 }
 0x9a2   : > { %v5474_v18 = vpop.xlane.xlu1 %5473  ;;  %5557 = vadd.xlane.f32.xlu1 %v5556_v26  ;;  %v8171_v26 = vld [vmem:[%s11201_s7 + $0x8] sm:$0xff]  }
 0x9a3   : > { %v10416_v54 = vsub.f32 %v10290_v39, %v5497_v10  ;;  %v5498_v32 = vmul.f32 0.03125, %v5474_v18  ;;  %v5559_v50 = vsel %vm577_vm0, %v5527_v58, 0.0  ;;  %v5528_v61 = vmul.f32 %v10410_v15, %v10410_v15  ;;  %v10464_v58 = vld [vmem:[%s11202_s8] sm:$0xff]  }
 0x9a4   : > { %5560 = vadd.xlane.f32.xlu0 %v5559_v50  ;;  %v5477_v29 = vpop.xlane.xlu0 %5476 }
 0x9a5   : > { %v10422_v30 = vsub.f32 %v10300_v23, %v5498_v32  ;;  %v5499_v57 = vmul.f32 0.03125, %v5477_v29  ;;  %v5562_v34 = vsel %vm577_vm0, %v5528_v61, 0.0  ;;  %v5529_v51 = vmul.f32 %v10416_v54, %v10416_v54 }
 0x9a6   : > { %5563 = vadd.xlane.f32.xlu1 %v5562_v34  ;;  %v5480_v39 = vpop.xlane.xlu1 %5479 }
 0x9a7   : > { %v10428_v13 = vsub.f32 %v10333_v7, %v5499_v57  ;;  %v5500_v6 = vmul.f32 0.03125, %v5480_v39  ;;  %v5565_v43 = vsel %vm577_vm0, %v5529_v51, 0.0  ;;  %v5530_v35 = vmul.f32 %v10422_v30, %v10422_v30 }
 0x9a8   : > { %5566 = vadd.xlane.f32.xlu0 %v5565_v43  ;;  %v5483_v23 = vpop.xlane.xlu0 %5482 }
 0x9a9   : > { %v10434_v21 = vsub.f32 %v10345_v33, %v5500_v6  ;;  %v5501_v37 = vmul.f32 0.03125, %v5483_v23  ;;  %v5568_v2 = vsel %vm577_vm0, %v5530_v35, 0.0  ;;  %v5531_v46 = vmul.f32 %v10428_v13, %v10428_v13 }
 0x9aa   : > { %5569 = vadd.xlane.f32.xlu1 %v5568_v2  ;;  %v5486_v7 = vpop.xlane.xlu1 %5485  ;;  %v11416_v2 = vld [vmem:[#allocation12_spill] sm:$0xff] }
 0x9ab   : > { %v10440_v20 = vsub.f32 %v10330_v45, %v5501_v37  ;;  %v5502_v4 = vmul.f32 0.03125, %v5486_v7  ;;  %v5571_v24 = vsel %vm577_vm0, %v5531_v46, 0.0  ;;  %v5532_v62 = vmul.f32 %v10434_v21, %v10434_v21 }
 0x9ac   : > { %5572 = vadd.xlane.f32.xlu0 %v5571_v24  ;;  %v5690_v46 = vrot.slane %v11416_v2, %v10185_v42 }
 0x9ad   : > { %v10446_v33 = vsub.f32 %v10340_v17, %v5502_v4  ;;  %v5574_v36 = vsel %vm577_vm0, %v5532_v62, 0.0  ;;  %v5533_v44 = vmul.f32 %v10440_v20, %v10440_v20  ;;  %v8170_v17 = vld [vmem:[%s11201_s7] sm:$0xff]  }
 0x9ae   : > { %5575 = vadd.xlane.f32.xlu1 %v5574_v36  ;;  %7987 = vmatprep.subr.bf16.mxu1 %v8170_v17  ;;  %v11417_v4 = vld [vmem:[#allocation13_spill] sm:$0xff] }
 0x9af   : > { %v5577_v52 = vsel %vm577_vm0, %v5533_v44, 0.0  ;;  %v5534_v45 = vmul.f32 %v10446_v33, %v10446_v33  ;;  %7988 = vmatpush3.bf16.msra.mxu1 %v8170_v17  ;;  %v11418_v44 = vld [vmem:[#allocation16_spill] sm:$0xff] }
 0x9b0   : > { %5578 = vadd.xlane.f32.xlu0 %v5577_v52  ;;  %7989 = vmatprep.subr.bf16.mxu1 %v8171_v26  ;;  %v11420_v17 = vld [vmem:[#allocation20_spill] sm:$0xff] }
 0x9b1   : > { %v5580_v10 = vsel %vm577_vm0, %v5534_v45, 0.0  ;;  %v11419_v45 = vld [vmem:[#allocation18_spill] sm:$0xff] }
 0x9b2   : > { %5581 = vadd.xlane.f32.xlu1 %v5580_v10 }
 0x9b3   : > { %7990 = vmatpush3.bf16.msra.mxu1 %v8171_v26 }
 0x9b4   : > { %8007 = vmatprep.subr.bf16.mxu1 %v10464_v58 }
 0xa21   : > { %v5537_v18 = vpop.xlane.xlu0 %5536 }
 0xa22   : > { %v5583_v32 = vmul.f32 0.03125, %v5537_v18  ;;  %v10478_v18 = vsub.s32 3, %v11399_v47 }
 0xa23   : > { %v5540_v50 = vpop.xlane.xlu1 %5539 }
 0xa24   : > { %v5599_v61 = vadd.f32 1e-05, %v5583_v32  ;;  %v5584_v29 = vmul.f32 0.03125, %v5540_v50  ;;  %v11421_v50 = vld [vmem:[#allocation21_spill] sm:$0xff]  ;;  %v5782_v10 = vrot.slane %v11402_v56, %v10478_v18 }
 0xa25   : > { %v5543_v57 = vpop.xlane.xlu0 %5542 }
 0xa26   : > { %8350 = vrsqrt.f32 %v5599_v61  ;;  %v5600_v34 = vadd.f32 1e-05, %v5584_v29  ;;  %v5585_v51 = vmul.f32 0.03125, %v5543_v57 }
 0xa27   : > { %v5546_v39 = vpop.xlane.xlu1 %5545 }
 0xa28   : > { %8352 = vrsqrt.f32 %v5600_v34  ;;  %v5601_v6 = vadd.f32 1e-05, %v5585_v51  ;;  %v5586_v43 = vmul.f32 0.03125, %v5546_v39  ;;  %v11422_v34 = vld [vmem:[#allocation25_spill] sm:$0xff]  ;;  %v11423_v39 = vld [vmem:[#allocation24_spill] sm:$0xff]  ;;  %v10496_v51 = vrot.slane %v10193_v5, %v10478_v18 }
 0xa29   : > { %v5549_v35 = vpop.xlane.xlu0 %5548 }
 0xa2a   : > { %8354 = vrsqrt.f32 %v5601_v6  ;;  %v5602_v23 = vadd.f32 1e-05, %v5586_v43  ;;  %v5587_v37 = vmul.f32 0.03125, %v5549_v35  ;;  %v11424_v43 = vld [vmem:[#allocation29_spill] sm:$0xff]  ;;  %v5770_v6 = vrot.slane %v11401_v41, %v10478_v18 }
 0xa2b   : > { %v5552_v7 = vpop.xlane.xlu1 %5551 }
 0xa2c   : > { %8356 = vrsqrt.f32 %v5602_v23  ;;  %v5603_v62 = vadd.f32 1e-05, %v5587_v37  ;;  %v5588_v36 = vmul.f32 0.03125, %v5552_v7  ;;  %v10490_v23 = vrot.slane %v10193_v5, %v10188_v53  ;;  %v11425_v7 = vld [vmem:[#allocation28_spill] sm:$0xff] }
 0xa2d   : > { %v5555_v32 = vpop.xlane.xlu0 %5554  ;;  %v5774_v53 = vrot.slane %v11403_v19, %v10478_v18 }
 0xa2e   : > { %8358 = vrsqrt.f32 %v5603_v62  ;;  %v5604_v29 = vadd.f32 1e-05, %v5588_v36  ;;  %v5589_v57 = vmul.f32 0.03125, %v5555_v32 }
 0xa2f   : > { %v5558_v37 = vpop.xlane.xlu1 %5557 }
 0xa30   : > { %v8351_v2 = vpop.eup %8350  ;;  %8360 = vrsqrt.f32 %v5604_v29  ;;  %v5605_v36 = vadd.f32 1e-05, %v5589_v57  ;;  %v5590_v32 = vmul.f32 0.03125, %v5558_v37  ;;  %v5778_v29 = vrot.slane %v11400_v1, %v10478_v18 }
 0xa31   : > { %v5631_v35 = vmul.f32 %v8351_v2, %v10360_v48  ;;  %v5561_v61 = vpop.xlane.xlu0 %5560  ;;  %v5798_v48 = vrot.slane %v11406_v38, %v10478_v18 }
 0xa32   : > { %v8353_v26 = vpop.eup %8352  ;;  %8362 = vrsqrt.f32 %v5605_v36  ;;  %v5606_v57 = vadd.f32 1e-05, %v5590_v32  ;;  %v5591_v37 = vmul.f32 0.03125, %v5561_v61 }
 0xa33   : > { %v5651_v5 = vmul.f32 %v10490_v23, %v5631_v35  ;;  %v5632_v62 = vmul.f32 %v8353_v26, %v10363_v40  ;;  %v5564_v2 = vpop.xlane.xlu1 %5563 }
 0xa34   : > { %v8355_v52 = vpop.eup %8354  ;;  %8364 = vrsqrt.f32 %v5606_v57  ;;  %v5607_v19 = vadd.f32 1e-05, %v5591_v37  ;;  %v5592_v36 = vmul.f32 0.03125, %v5564_v2 }
 0xa35   : > { %v5671_v61 = vadd.f32 %v10496_v51, %v5651_v5  ;;  %v5652_v35 = vmul.f32 %v10490_v23, %v5632_v62  ;;  %v5633_v40 = vmul.f32 %v8355_v52, %v10368_v27  ;;  %v5567_v32 = vpop.xlane.xlu0 %5566 }
 0xa36   : > { %v8357_v56 = vpop.eup %8356  ;;  %8366 = vrsqrt.f32 %v5607_v19  ;;  %v5608_v41 = vadd.f32 1e-05, %v5592_v36  ;;  %v5593_v24 = vmul.f32 0.03125, %v5567_v32  ;;  %v11426_v19 = vrot.slane %v11417_v4, %v10185_v42 }
 0xa37   : > { %v5751_v57 = vmul.f32 %v5690_v46, %v5671_v61  ;;  %v5672_v37 = vadd.f32 %v10496_v51, %v5652_v35  ;;  %v5653_v5 = vmul.f32 %v10490_v23, %v5633_v40  ;;  %v5634_v62 = vmul.f32 %v8357_v56, %v10374_v49  ;;  %v5570_v2 = vpop.xlane.xlu1 %5569 }
 0xa38   : > { %v8359_v27 = vpop.eup %8358  ;;  %8368 = vrsqrt.f32 %v5608_v41  ;;  %v5609_v26 = vadd.f32 1e-05, %v5593_v24  ;;  %v5594_v1 = vmul.f32 0.03125, %v5570_v2  ;;  %v11427_v24 = vrot.slane %v11418_v44, %v10185_v42 }
 0xa39   : > { %v5831_v47 = vadd.f32 %v5770_v6, %v5751_v57  ;;  %v5752_v36 = vmul.f32 %v11426_v19, %v5672_v37  ;;  %v5673_v46 = vadd.f32 %v10496_v51, %v5653_v5  ;;  %v5654_v61 = vmul.f32 %v10490_v23, %v5634_v62  ;;  %v5573_v35 = vpop.xlane.xlu0 %5572 }
 0xa3a   : > { %v8361_v40 = vpop.eup %8360  ;;  %v5635_v56 = vmul.f32 %v8359_v27, %v10380_v12  ;;  %8370 = vrsqrt.f32 %v5609_v26  ;;  %v5610_v49 = vadd.f32 1e-05, %v5594_v1  ;;  %v5595_v32 = vmul.f32 0.03125, %v5573_v35 }
 0xa3b   : > { %v5847_v52 = vpack.c.bf16 %v5831_v47, %v5831_v47  ;;  %v5832_v41 = vadd.f32 %v5774_v53, %v5752_v36  ;;  %v5753_v6 = vmul.f32 %v11427_v24, %v5673_v46  ;;  %v5674_v4 = vadd.f32 %v10496_v51, %v5654_v61  ;;  %v5576_v57 = vpop.xlane.xlu1 %5575 }
 0xa3c   : > { %v8363_v37 = vpop.eup %8362  ;;  %v5655_v5 = vmul.f32 %v10490_v23, %v5635_v56  ;;  %v5636_v62 = vmul.f32 %v8361_v40, %v10386_v9  ;;  %8372 = vrsqrt.f32 %v5610_v49  ;;  %v5611_v2 = vadd.f32 1e-05, %v5595_v32 }
 0xa3d   : > { %5864 = vst.msk [vmem:[#allocation3] sm:$0xf] %vm5863_vm4, %v5847_v52  ;;  %v5848_v1 = vpack.c.bf16 %v5832_v41, %v5832_v41  ;;  %v5833_v12 = vadd.f32 %v5778_v29, %v5753_v6  ;;  %v11428_v47 = vrot.slane %v11419_v45, %v10185_v42  ;;  %v5637_v44 = vmul.f32 %v8363_v37, %v10392_v55  ;;  %v5579_v26 = vpop.xlane.xlu0 %5578 }
 0xa3e   : > { %v8365_v27 = vpop.eup %8364  ;;  %v5675_v19 = vadd.f32 %v10496_v51, %v5655_v5  ;;  %v5656_v36 = vmul.f32 %v10490_v23, %v5636_v62  ;;  %8374 = vrsqrt.f32 %v5611_v2  ;;  %v5596_v9 = vmul.f32 0.03125, %v5576_v57 }
 0xa3f   : > { %v5754_v53 = vmul.f32 %v11428_v47, %v5674_v4  ;;  %5865 = vst.msk [vmem:[#allocation3 + $0x4] sm:$0xf] %vm5863_vm4, %v5848_v1  ;;  %v5849_v46 = vpack.c.bf16 %v5833_v12, %v5833_v12  ;;  %v5657_v29 = vmul.f32 %v10490_v23, %v5637_v44  ;;  %v5638_v61 = vmul.f32 %v8365_v27, %v10398_v31  ;;  %v5582_v6 = vpop.xlane.xlu1 %5581 }
 0xa40   : > { %v8367_v45 = vpop.eup %8366  ;;  %v11429_v55 = vrot.slane %v11420_v17, %v10185_v42  ;;  %v5676_v40 = vadd.f32 %v10496_v51, %v5656_v36  ;;  %v5612_v56 = vadd.f32 1e-05, %v5596_v9  ;;  %v5597_v49 = vmul.f32 0.03125, %v5579_v26 }
 0xa41   : > { %v5834_v52 = vadd.f32 %v5782_v10, %v5754_v53  ;;  %5866 = vst.msk [vmem:[#allocation3 + $0x8] sm:$0xf] %vm5863_vm4, %v5849_v46  ;;  %v5677_v41 = vadd.f32 %v10496_v51, %v5657_v29  ;;  %v5658_v10 = vmul.f32 %v10490_v23, %v5638_v61  ;;  %v5639_v24 = vmul.f32 %v8367_v45, %v10404_v14 }
 0xa42   : > { %v5755_v35 = vmul.f32 %v11429_v55, %v5675_v19  ;;  %v8369_v31 = vpop.eup %8368  ;;  %v11430_v4 = vrot.slane %v11405_v25, %v10478_v18  ;;  %v11431_v57 = vrot.slane %v11421_v50, %v10185_v42  ;;  %8376 = vrsqrt.f32 %v5612_v56 }
 0xa43   : > { %v5850_v32 = vpack.c.bf16 %v5834_v52, %v5834_v52  ;;  %v5613_v5 = vadd.f32 1e-05, %v5597_v49  ;;  %v11432_v62 = vrot.slane %v11422_v34, %v10185_v42  ;;  %v5678_v14 = vadd.f32 %v10496_v51, %v5658_v10 }
 0xa44   : > { %v5835_v17 = vadd.f32 %v11430_v4, %v5755_v35  ;;  %v5756_v37 = vmul.f32 %v11431_v57, %v5676_v40  ;;  %v5659_v1 = vmul.f32 %v10490_v23, %v5639_v24  ;;  %v5640_v12 = vmul.f32 %v8369_v31, %v10410_v15  ;;  %v8371_v47 = vpop.eup %8370  ;;  %v11440_v57 = vld [vmem:[#allocation32_spill] sm:$0xff] }
 0xa45   : > { %5867 = vst.msk [vmem:[#allocation3 + $0xc] sm:$0xf] %vm5863_vm4, %v5850_v32  ;;  %v5757_v2 = vmul.f32 %v11432_v62, %v5677_v41  ;;  %v11433_v50 = vrot.slane %v11407_v28, %v10478_v18  ;;  %8378 = vrsqrt.f32 %v5613_v5  ;;  %v5598_v26 = vmul.f32 0.03125, %v5582_v6  ;;  %v11437_v41 = vld [vmem:[#allocation33_spill] sm:$0xff] }
 0xa46   : > { %v5851_v53 = vpack.c.bf16 %v5835_v17, %v5835_v17  ;;  %v11434_v27 = vrot.slane %v11404_v60, %v10478_v18  ;;  %v11435_v34 = vrot.slane %v11423_v39, %v10185_v42  ;;  %v5679_v9 = vadd.f32 %v10496_v51, %v5659_v1  ;;  %v8373_v46 = vpop.eup %8372  ;;  %v10583_v55 = vld [vmem:[#allocation3] sm:$0xff]  }
 0xa47   : > { %v5836_v44 = vadd.f32 %v11433_v50, %v5756_v37  ;;  %v5660_v15 = vmul.f32 %v10490_v23, %v5640_v12  ;;  %v5806_v29 = vrot.slane %v11411_v22, %v10478_v18  ;;  %v5641_v61 = vmul.f32 %v8371_v47, %v10416_v54  ;;  %7991 = vmatprep.mubr.msk.bf16.mxu1 %vm577_vm0, %v10583_v55 }
 0xa48   : > { %v5837_v19 = vadd.f32 %v11434_v27, %v5757_v2  ;;  %v5758_v36 = vmul.f32 %v11435_v34, %v5678_v14  ;;  %5868 = vst.msk [vmem:[#allocation3 + $0x10] sm:$0xf] %vm5863_vm4, %v5851_v53  ;;  %v5614_v45 = vadd.f32 1e-05, %v5598_v26  ;;  %v11436_v40 = vrot.slane %v11424_v43, %v10185_v42  ;;  %v8375_v32 = vpop.eup %8374  ;;  %v8179_v14 = vld [vmem:[%s11202_s8 + $0x8] sm:$0xff]  }
 0xa49   : > { %v5852_v52 = vpack.c.bf16 %v5836_v44, %v5836_v44  ;;  %v5680_v49 = vadd.f32 %v10496_v51, %v5660_v15  ;;  %v5730_v10 = vrot.slane %v11437_v41, %v10185_v42  ;;  %v5661_v54 = vmul.f32 %v10490_v23, %v5641_v61 }
 0xa4a   : > { %v5853_v35 = vpack.c.bf16 %v5837_v19, %v5837_v19  ;;  %v5838_v39 = vadd.f32 %v5798_v48, %v5758_v36  ;;  %v5759_v56 = vmul.f32 %v11436_v40, %v5679_v9  ;;  %v5642_v24 = vmul.f32 %v8373_v46, %v10422_v30  ;;  %v11443_v40 = vld [vmem:[#allocation40_spill] sm:$0xff] }
 0xa4b   : > { %5869 = vst.msk [vmem:[#allocation3 + $0x14] sm:$0xf] %vm5863_vm4, %v5852_v52  ;;  %8380 = vrsqrt.f32 %v5614_v45  ;;  %v11438_v48 = vrot.slane %v11409_v3, %v10478_v18  ;;  %v11439_v31 = vrot.slane %v11425_v7, %v10185_v42  ;;  %v5643_v17 = vmul.f32 %v8375_v32, %v10428_v13  ;;  %v11441_v7 = vld [vmem:[#allocation37_spill] sm:$0xff]  ;;  %v11442_v52 = vld [vmem:[#allocation36_spill] sm:$0xff] }
 0xa4c   : > { %5870 = vst.msk [vmem:[#allocation3 + $0x18] sm:$0xf] %vm5863_vm4, %v5853_v35  ;;  %v5854_v43 = vpack.c.bf16 %v5838_v39, %v5838_v39  ;;  %v5734_v30 = vrot.slane %v11440_v57, %v10185_v42  ;;  %v5810_v37 = vrot.slane %v11408_v11, %v10478_v18  ;;  %v5681_v5 = vadd.f32 %v10496_v51, %v5661_v54  ;;  %v10613_v2 = vld [vmem:[#allocation3 + $0x8] sm:$0xff]   ;;  %v8377_v53 = vpop.eup %8376 }
 0xa4d   : > { %v5839_v6 = vadd.f32 %v11438_v48, %v5759_v56  ;;  %v5760_v4 = vmul.f32 %v11439_v31, %v5680_v49  ;;  %v5662_v62 = vmul.f32 %v10490_v23, %v5642_v24  ;;  %v5738_v1 = vrot.slane %v11441_v7, %v10185_v42  ;;  %7992 = vmatmul.mubr.msk.bf16.vlgmr.msra.gmra.mrb[176].mxu1 %vm577_vm0, %v10613_v2 }
 0xa4e   : > { %5871 = vst.msk [vmem:[#allocation3 + $0x1c] sm:$0xf] %vm5863_vm4, %v5854_v43  ;;  %v5663_v47 = vmul.f32 %v10490_v23, %v5643_v17  ;;  %v5761_v50 = vmul.f32 %v5730_v10, %v5681_v5  ;;  %v5814_v44 = vrot.slane %v11410_v0, %v10478_v18  ;;  %v5818_v19 = vrot.slane %v11413_v59, %v10478_v18  ;;  %v11444_v17 = vld [vmem:[#allocation41_spill] sm:$0xff] }
 0xa4f   : > { %v5855_v13 = vpack.c.bf16 %v5839_v6, %v5839_v6  ;;  %v5840_v12 = vadd.f32 %v5806_v29, %v5760_v4  ;;  %v5682_v26 = vadd.f32 %v10496_v51, %v5662_v62  ;;  %v5644_v36 = vmul.f32 %v8377_v53, %v10434_v21  ;;  %8008 = vmatpush3.bf16.msra.mxu1 %v10464_v58  ;;  %v8379_v9 = vpop.eup %8378 }
 0xa50   : > { %v5683_v34 = vadd.f32 %v10496_v51, %v5663_v47  ;;  %v5841_v15 = vadd.f32 %v5810_v37, %v5761_v50  ;;  %8009 = vmatprep.subr.bf16.mxu1 %v8179_v14  ;;  %v5742_v29 = vrot.slane %v11442_v52, %v10185_v42  ;;  %v5645_v35 = vmul.f32 %v8379_v9, %v10440_v20  ;;  %v8185_v50 = vld [vmem:[%s11204_s10 + $0x18] sm:$0xff]  }
 0xa51   : > { %5872 = vst.msk [vmem:[#allocation3 + $0x20] sm:$0xf] %vm5863_vm4, %v5855_v13  ;;  %v5856_v27 = vpack.c.bf16 %v5840_v12, %v5840_v12  ;;  %v5762_v46 = vmul.f32 %v5734_v30, %v5682_v26  ;;  %v5664_v45 = vmul.f32 %v10490_v23, %v5644_v36  ;;  %v5746_v21 = vrot.slane %v11443_v40, %v10185_v42  ;;  %v8187_v26 = vld [vmem:[%s11204_s10 + $0x28] sm:$0xff]  }
 0xa52   : > { %v5763_v61 = vmul.f32 %v5738_v1, %v5683_v34  ;;  %v8175_v39 = vld [vmem:[#allocation3 + $0x10] sm:$0xff]   ;;  %v5857_v56 = vpack.c.bf16 %v5841_v15, %v5841_v15  ;;  %v5822_v49 = vrot.slane %v11415_v63, %v10478_v18  ;;  %v5665_v10 = vmul.f32 %v10490_v23, %v5645_v35  ;;  %v8189_v15 = vld [vmem:[%s11204_s10 + $0x38] sm:$0xff]  }
 0xa53   : > { %5873 = vst.msk [vmem:[#allocation3 + $0x24] sm:$0xf] %vm5863_vm4, %v5856_v27  ;;  %v5842_v58 = vadd.f32 %v5814_v44, %v5762_v46  ;;  %v5684_v41 = vadd.f32 %v10496_v51, %v5664_v45  ;;  %7995 = vmatprep.mubr.msk.bf16.mxu1 %vm577_vm0, %v8175_v39  ;;  %8010 = vmatpush3.bf16.msra.mxu1 %v8179_v14  ;;  %v8186_v44 = vld [vmem:[%s11204_s10 + $0x20] sm:$0xff]   ;;  %v8188_v34 = vld [vmem:[%s11204_s10 + $0x30] sm:$0xff]  }
 0xa54   : > { %v5843_v32 = vadd.f32 %v5818_v19, %v5763_v61  ;;  %5874 = vst.msk [vmem:[#allocation3 + $0x28] sm:$0xf] %vm5863_vm4, %v5857_v56  ;;  %v5826_v24 = vrot.slane %v11412_v16, %v10478_v18  ;;  %v5685_v31 = vadd.f32 %v10496_v51, %v5665_v10  ;;  %v5750_v57 = vrot.slane %v11444_v17, %v10185_v42 }
 0xa55   : > { %v8381_v54 = vpop.eup %8380  ;;  %v5858_v20 = vpack.c.bf16 %v5842_v58, %v5842_v58  ;;  %v8176_v43 = vld [vmem:[#allocation3 + $0x18] sm:$0xff]   ;;  %v5764_v6 = vmul.f32 %v5742_v29, %v5684_v41  ;;  %v5830_v1 = vrot.slane %v11414_v8, %v10478_v18  ;;  %v10733_v41 = vld [vmem:[%s11203_s9 + $0x1] ss:$0 sm:$0xff] }
 0xa56   : > { %v5859_v48 = vpack.c.bf16 %v5843_v32, %v5843_v32  ;;  %v5646_v4 = vmul.f32 %v8381_v54, %v10446_v33  ;;  %7996 = vmatmul.mubr.msk.bf16.gmra.mrb[180].mxu1 %vm577_vm0, %v8176_v43  ;;  %v5765_v37 = vmul.f32 %v5746_v21, %v5685_v31 }
 0xa57   : > { %5875 = vst.msk [vmem:[#allocation3 + $0x2c] sm:$0xf] %vm5863_vm4, %v5858_v20  ;;  %v5844_v30 = vadd.f32 %v5822_v49, %v5764_v6 }
 0xa58   : > { %5876 = vst.msk [vmem:[#allocation3 + $0x30] sm:$0xf] %vm5863_vm4, %v5859_v48  ;;  %v5666_v5 = vmul.f32 %v10490_v23, %v5646_v4  ;;  %v5845_v7 = vadd.f32 %v5826_v24, %v5765_v37 }
 0xa59   : > { %v5860_v14 = vpack.c.bf16 %v5844_v30, %v5844_v30 }
 0xa5a   : > { %v8177_v62 = vld [vmem:[#allocation3 + $0x20] sm:$0xff]   ;;  %v5686_v33 = vadd.f32 %v10496_v51, %v5666_v5  ;;  %v5861_v13 = vpack.c.bf16 %v5845_v7, %v5845_v7 }
 0xa5b   : > { %7999 = vmatprep.mubr.msk.bf16.mxu1 %vm577_vm0, %v8177_v62  ;;  %5877 = vst.msk [vmem:[#allocation3 + $0x34] sm:$0xf] %vm5863_vm4, %v5860_v14  ;;  %v8182_v51 = vld [vmem:[%s11204_s10] sm:$0xff]  }
 0xa5c   : > { %v5766_v42 = vmul.f32 %v5750_v57, %v5686_v33  ;;  %5878 = vst.msk [vmem:[#allocation3 + $0x38] sm:$0xf] %vm5863_vm4, %v5861_v13  ;;  %8027 = vmatprep.subr.bf16.mxu1 %v8182_v51 }
 0xa5e   : > { %v5846_v12 = vadd.f32 %v5830_v1, %v5766_v42  ;;  %v8178_v47 = vld [vmem:[#allocation3 + $0x28] sm:$0xff]  }
 0xa5f   : > { %8000 = vmatmul.mubr.msk.bf16.gmra.mrb[184].mxu1 %vm577_vm0, %v8178_v47 }
 0xa60   : > { %v5862_v53 = vpack.c.bf16 %v5846_v12, %v5846_v12 }
 0xa62   : > { %5879 = vst.msk [vmem:[#allocation3 + $0x3c] sm:$0xf] %vm5863_vm4, %v5862_v53  ;;  %v8180_v23 = vld [vmem:[#allocation3 + $0x30] sm:$0xff]  }
 0xa63   : > { %8003 = vmatprep.mubr.msk.bf16.mxu1 %vm577_vm0, %v8180_v23 }
 0xa69   : > { %v8181_v18 = vld [vmem:[#allocation3 + $0x38] sm:$0xff]  }
 0xa6a   : > { %8004 = vmatmul.mubr.msk.bf16.gmra.mrb[188].mxu1 %vm577_vm0, %v8181_v18 }
 0xa6b   : > { %8011 = vmatprep.mubr.msk.bf16.mxu1 %vm577_vm0, %v10583_v55  ;;  %v8183_v55 = vld [vmem:[%s11204_s10 + $0x8] sm:$0xff]  }
 0xa72   : > { %8012 = vmatmul.mubr.msk.bf16.vlgmr.msra.gmra.mrb[192].mxu1 %vm577_vm0, %v10613_v2  ;;  %v8184_v2 = vld [vmem:[%s11204_s10 + $0x10] sm:$0xff]  }
 0xa73   : > { %8015 = vmatprep.mubr.msk.bf16.mxu1 %vm577_vm0, %v8175_v39  ;;  %8028 = vmatpush3.bf16.msra.mxu1 %v8182_v51 }
 0xa74   : > { %8029 = vmatprep.subr.bf16.mxu1 %v8183_v55 }
 0xa77   : > { %8030 = vmatpush3.bf16.msra.mxu1 %v8183_v55 }
 0xa78   : > { %8031 = vmatprep.subr.bf16.mxu1 %v8184_v2 }
 0xa7a   : > { %8016 = vmatmul.mubr.msk.bf16.gmra.mrb[196].mxu1 %vm577_vm0, %v8176_v43 }
 0xa7b   : > { %8019 = vmatprep.mubr.msk.bf16.mxu1 %vm577_vm0, %v8177_v62  ;;  %8032 = vmatpush3.bf16.msra.mxu1 %v8184_v2 }
 0xa7c   : > { %8033 = vmatprep.subr.bf16.mxu1 %v8185_v50 }
 0xa7f   : > { %8034 = vmatpush3.bf16.msra.mxu1 %v8185_v50 }
 0xa80   : > { %8035 = vmatprep.subr.bf16.mxu1 %v8186_v44 }
 0xa82   : > { %8020 = vmatmul.mubr.msk.bf16.gmra.mrb[200].mxu1 %vm577_vm0, %v8178_v47 }
 0xa83   : > { %8023 = vmatprep.mubr.msk.bf16.mxu1 %vm577_vm0, %v8180_v23  ;;  %8036 = vmatpush3.bf16.msra.mxu1 %v8186_v44 }
 0xa84   : > { %8037 = vmatprep.subr.bf16.mxu1 %v8187_v26 }
 0xa87   : > { %8038 = vmatpush3.bf16.msra.mxu1 %v8187_v26 }
 0xa88   : > { %8039 = vmatprep.subr.bf16.mxu1 %v8188_v34 }
 0xa8a   : > { %8024 = vmatmul.mubr.msk.bf16.gmra.mrb[204].mxu1 %vm577_vm0, %v8181_v18  ;;  %v10754_v18 = vld [vmem:[%s11203_s9] ss:$0 sm:$0xff] }
 0xa8b   : > { %8040 = vmatpush3.bf16.msra.mxu1 %v8188_v34 }
 0xa8c   : > { %8041 = vmatprep.subr.bf16.mxu1 %v8189_v15 }
 0xa8f   : > { %8042 = vmatpush3.bf16.msra.mxu1 %v8189_v15 }
 0xb20   : > { %v7993_v27 = vpop.f32.mrb[176].mxu1 }
 0xb21   : > { %v10694_v19 = vpop.f32.mrb[177].mxu1 }
 0xb22   : > { %v10699_v36 = vpop.f32.mrb[178].mxu1 }
 0xb23   : > { %v10701_v9 = vpop.f32.mrb[179].mxu1 }
 0xb29   : > { %v10706_v46 = vpop.f32.mrb[180].mxu1 }
 0xb2a   : > { %v10708_v52 = vpop.f32.mrb[181].mxu1 }
 0xb2b   : > { %v10710_v29 = vpop.f32.mrb[182].mxu1 }
 0xb2c   : > { %v10712_v61 = vpop.f32.mrb[183].mxu1 }
 0xb32   : > { %v10714_v45 = vpop.f32.mrb[184].mxu1 }
 0xb33   : > { %v10716_v35 = vpop.f32.mrb[185].mxu1 }
 0xb34   : > { %v10718_v39 = vpop.f32.mrb[186].mxu1 }
 0xb35   : > { %v10720_v40 = vpop.f32.mrb[187].mxu1 }
 0xb3d   : > { %v10722_v21 = vpop.f32.mrb[188].mxu1 }
 0xb3e   : > { %v10724_v56 = vpop.f32.mrb[189].mxu1 }
 0xb3f   : > { %v10726_v58 = vpop.f32.mrb[190].mxu1 }
 0xb40   : > { %v10728_v49 = vpop.f32.mrb[191].mxu1 }
 0xb45   : > { %v8013_v32 = vpop.f32.mrb[192].mxu1 }
 0xb46   : > { %v6150_v10 = vpop.f32.mrb[193].mxu1  ;;  %v6159_v20 = vadd.f32 %v8013_v32, %v10733_v41 }
 0xb47   : > { %v8014_v54 = vpop.f32.mrb[194].mxu1  ;;  %v6151_v48 = vadd.f32 %v10733_v41, %v6150_v10 }
 0xb48   : > { %v6162_v24 = vadd.f32 %v8014_v54, %v10733_v41  ;;  %v6153_v43 = vpop.f32.mrb[195].mxu1  ;;  %v10760_v54 = vadd.f32 %v7993_v27, %v10754_v18  ;;  %v10770_v27 = vadd.f32 %v10699_v36, %v10754_v18 }
 0xb49   : > { %v6154_v6 = vadd.f32 %v10733_v41, %v6153_v43 }
 0xb4a   : > { %v10739_v31 = vpack.c.bf16 %v6162_v24, %v6159_v20 }
 0xb4b   : > { %v10741_v4 = vpack.c.bf16 %v6154_v6, %v6151_v48 }
 0xb4c   : > { %v11288_v17 = vmul.bf16 1060454197, %v10739_v31  ;;  %v11445_v63 = vmul.bf16 1060454197, %v10739_v31 }
 0xb4d   : > { %v11287_v57 = vmul.bf16 1060454197, %v10741_v4  ;;  %v8017_v30 = vpop.f32.mrb[196].mxu1 }
 0xb4e   : > { %v6254_v37 = vand.u32 2147450879, %v11288_v17  ;;  %v6166_v5 = vpop.f32.mrb[197].mxu1  ;;  %v6175_v13 = vadd.f32 %v8017_v30, %v10733_v41  ;;  %vm10815_vm5 = vcmp.ge.bf16.partialorder %v11445_v63, 0 }
 0xb4f   : > { %v6253_v62 = vand.u32 2147450879, %v11287_v57  ;;  %v8018_v14 = vpop.f32.mrb[198].mxu1  ;;  %v6167_v24 = vadd.f32 %v10733_v41, %v6166_v5  ;;  %v10774_v5 = vadd.f32 %v10754_v18, %v10701_v9 }
 0xb50   : > { %v6262_v7 = vmul.bf16 1051213480, %v6254_v37  ;;  %v6391_v1 = vunpack.c.l.bf16 %v6254_v37  ;;  %v6392_v33 = vunpack.c.h.bf16 %v6254_v37  ;;  %v6169_v42 = vpop.f32.mrb[199].mxu1  ;;  %v6178_v23 = vadd.f32 %v8018_v14, %v10733_v41 }
 0xb51   : > { %v6261_v12 = vmul.bf16 1051213480, %v6253_v62  ;;  %v6389_v47 = vunpack.c.l.bf16 %v6253_v62  ;;  %v6390_v53 = vunpack.c.h.bf16 %v6253_v62  ;;  %v6170_v10 = vadd.f32 %v10733_v41, %v6169_v42 }
 0xb52   : > { %v6270_v51 = vadd.bf16 1065369472, %v6262_v7  ;;  %v6407_v55 = vsub.f32 0.0, %v6391_v1  ;;  %v6408_v2 = vsub.f32 0.0, %v6392_v33  ;;  %v10756_v26 = vpack.c.bf16 %v6178_v23, %v6175_v13 }
 0xb53   : > { %v6269_v50 = vadd.bf16 1065369472, %v6261_v12  ;;  %v6405_v44 = vsub.f32 0.0, %v6389_v47  ;;  %v6406_v32 = vsub.f32 0.0, %v6390_v53  ;;  %v10765_v37 = vadd.f32 %v10754_v18, %v10694_v19 }
 0xb54   : > { %v6279_v34 = vunpack.c.l.bf16 %v6270_v51  ;;  %v6280_v15 = vunpack.c.h.bf16 %v6270_v51  ;;  %v6423_v20 = vmul.f32 %v6407_v55, %v6391_v1  ;;  %v6424_v48 = vmul.f32 %v6408_v2, %v6392_v33 }
 0xb55   : > { %v8021_v43 = vpop.f32.mrb[200].mxu1  ;;  %v6277_v6 = vunpack.c.l.bf16 %v6269_v50  ;;  %v6421_v30 = vmul.f32 %v6405_v44, %v6389_v47  ;;  %v6278_v62 = vunpack.c.h.bf16 %v6269_v50  ;;  %v11286_v14 = vmul.bf16 1060454197, %v10756_v26 }
 0xb56   : > { %8382 = vrcp.f32 %v6279_v34  ;;  %v6422_v7 = vmul.f32 %v6406_v32, %v6390_v53  ;;  %v10776_v1 = vpack.c.bf16 %v6170_v10, %v6167_v24  ;;  %v6182_v33 = vpop.f32.mrb[201].mxu1  ;;  %v10780_v19 = vadd.f32 %v10706_v46, %v10754_v18 }
 0xb57   : > { %8384 = vrcp.f32 %v6280_v15  ;;  %v10784_v13 = vadd.f32 %v10754_v18, %v10708_v52  ;;  %v6441_v42 = vmul.f32 1.442695, %v6423_v20  ;;  %v6256_v36 = vand.u32 2147450879, %v11286_v14  ;;  %v8022_v12 = vpop.f32.mrb[202].mxu1 }
 0xb58   : > { %v6443_v47 = vmul.f32 1.442695, %v6424_v48  ;;  %8386 = vrcp.f32 %v6277_v6  ;;  %v6437_v9 = vmul.f32 1.442695, %v6421_v30  ;;  %v11285_v53 = vmul.bf16 1060454197, %v10776_v1 }
 0xb59   : > { %8388 = vrcp.f32 %v6278_v62  ;;  %v6264_v23 = vmul.bf16 1051213480, %v6256_v36  ;;  %v6395_v51 = vunpack.c.l.bf16 %v6256_v36  ;;  %v6396_v55 = vunpack.c.h.bf16 %v6256_v36  ;;  %v6185_v46 = vpop.f32.mrb[203].mxu1 }
 0xb5a   : > { %v10791_v2 = vadd.f32 %v10710_v29, %v10754_v18  ;;  %v6439_v52 = vmul.f32 1.442695, %v6422_v7  ;;  %v6255_v50 = vand.u32 2147450879, %v11285_v53  ;;  %v6194_v44 = vadd.f32 %v8022_v12, %v10733_v41 }
 0xb5b   : > { %8390 = vpow2.f32 %v6441_v42  ;;  %v6272_v34 = vadd.bf16 1065369472, %v6264_v23  ;;  %v6411_v15 = vsub.f32 0.0, %v6395_v51  ;;  %v6191_v32 = vadd.f32 %v8021_v43, %v10733_v41 }
 0xb5c   : > { %8392 = vpow2.f32 %v6443_v47  ;;  %v6263_v20 = vmul.bf16 1051213480, %v6255_v50  ;;  %v6393_v24 = vunpack.c.l.bf16 %v6255_v50  ;;  %v6394_v48 = vunpack.c.h.bf16 %v6255_v50 }
 0xb5d   : > { %v10797_v10 = vpop.f32.mrb[204].mxu1  ;;  %8394 = vpow2.f32 %v6437_v9  ;;  %v6283_v29 = vunpack.c.l.bf16 %v6272_v34  ;;  %v6284_v30 = vunpack.c.h.bf16 %v6272_v34  ;;  %v6412_v62 = vsub.f32 0.0, %v6396_v55 }
 0xb5e   : > { %v10799_v6 = vpop.f32.mrb[205].mxu1  ;;  %8396 = vpow2.f32 %v6439_v52  ;;  %v6271_v42 = vadd.bf16 1065369472, %v6263_v20  ;;  %v6409_v12 = vsub.f32 0.0, %v6393_v24  ;;  %v10803_v23 = vpack.c.bf16 %v6194_v44, %v6191_v32 }
 0xb5f   : > { %v10801_v7 = vpop.f32.mrb[206].mxu1  ;;  %8398 = vrcp.f32 %v6283_v29  ;;  %v6427_v53 = vmul.f32 %v6411_v15, %v6395_v51  ;;  %v6410_v50 = vsub.f32 0.0, %v6394_v48  ;;  %v6186_v14 = vadd.f32 %v10733_v41, %v6185_v46 }
 0xb60   : > { %v8383_v36 = vpop.eup %8382  ;;  %v10805_v43 = vpop.f32.mrb[207].mxu1  ;;  %8400 = vrcp.f32 %v6284_v30  ;;  %v6281_v34 = vunpack.c.l.bf16 %v6271_v42  ;;  %v6282_v57 = vunpack.c.h.bf16 %v6271_v42  ;;  %v6428_v20 = vmul.f32 %v6412_v62, %v6396_v55 }
 0xb61   : > { %v8385_v47 = vpop.eup %8384  ;;  %v6183_v44 = vadd.f32 %v10733_v41, %v6182_v33  ;;  %v6425_v15 = vmul.f32 %v6409_v12, %v6393_v24  ;;  %v11290_v29 = vmul.bf16 1060454197, %v10803_v23  ;;  %v6449_v33 = vmul.f32 1.442695, %v6427_v53 }
 0xb62   : > { %v10808_v9 = vpack.c.bf16 %v8385_v47, %v8383_v36  ;;  %v8387_v32 = vpop.eup %8386  ;;  %v11448_v36 = vmul.bf16 1060454197, %v10741_v4  ;;  %8402 = vrcp.f32 %v6281_v34  ;;  %v6426_v47 = vmul.f32 %v6410_v50, %v6394_v48 }
 0xb63   : > { %v8389_v30 = vpop.eup %8388  ;;  %v10827_v55 = vpack.c.bf16 %v6186_v14, %v6183_v44  ;;  %8404 = vrcp.f32 %v6282_v57  ;;  %v10835_v24 = vadd.f32 %v10754_v18, %v10712_v61  ;;  %v11292_v12 = vmov 3212885888  }
 0xb64   : > { %v6318_v46 = vmul.bf16 1065893768, %v10808_v9  ;;  %vm10823_vm6 = vcmp.ge.bf16.partialorder %v11448_v36, 0  ;;  %v10829_v62 = vpack.c.bf16 %v8389_v30, %v8387_v32  ;;  %v10840_v36 = vsel %vm10815_vm5, 1065369472, %v11292_v12 }
 0xb65   : > { %v10831_v52 = vpop.eup %8390  ;;  %v6451_v53 = vmul.f32 1.442695, %v6428_v20  ;;  %v6258_v14 = vand.u32 2147450879, %v11290_v29  ;;  %v10850_v48 = vsel %vm10823_vm6, 1065369472, %v11292_v12  ;;  %8406 = vpow2.f32 %v6449_v33 }
 0xb66   : > { %v6326_v63 = vadd.bf16 3216687034, %v6318_v46  ;;  %v10844_v34 = vpop.eup %8392  ;;  %v6317_v61 = vmul.bf16 1065893768, %v10829_v62  ;;  %v6445_v50 = vmul.f32 1.442695, %v6425_v15 }
 0xb67   : > { %v10853_v44 = vpop.eup %8394  ;;  %v6266_v32 = vmul.bf16 1051213480, %v6258_v14  ;;  %v6399_v51 = vunpack.c.l.bf16 %v6258_v14  ;;  %v6400_v20 = vunpack.c.h.bf16 %v6258_v14  ;;  %v11299_v46 = vmul.bf16 1060454197, %v10827_v55 }
 0xb68   : > { %v6334_v57 = vmul.bf16 %v6326_v63, %v10808_v9  ;;  %v10856_v30 = vpop.eup %8396  ;;  %v6325_v17 = vadd.bf16 3216687034, %v6317_v61  ;;  %v6447_v63 = vmul.f32 1.442695, %v6426_v47  ;;  %v6470_v42 = vpack.c.bf16 %v10844_v34, %v10831_v52 }
 0xb69   : > { %v8399_v8 = vpop.eup %8398  ;;  %8408 = vpow2.f32 %v6451_v53  ;;  %v6274_v12 = vadd.bf16 1065369472, %v6266_v32  ;;  %v6415_v15 = vsub.f32 0.0, %v6399_v51  ;;  %v6257_v22 = vand.u32 2147450879, %v11299_v46 }
 0xb6a   : > { %v6342_v29 = vadd.bf16 1068908470, %v6334_v57  ;;  %v8401_v59 = vpop.eup %8400  ;;  %v6333_v14 = vmul.bf16 %v6325_v17, %v10829_v62  ;;  %8410 = vpow2.f32 %v6445_v50  ;;  %v6416_v61 = vsub.f32 0.0, %v6400_v20 }
 0xb6b   : > { %v10864_v57 = vpack.c.bf16 %v8401_v59, %v8399_v8  ;;  %v6287_v33 = vunpack.c.l.bf16 %v6274_v12  ;;  %v6288_v47 = vunpack.c.h.bf16 %v6274_v12  ;;  %8412 = vpow2.f32 %v6447_v63 }
 0xb6c   : > { %v6350_v16 = vmul.bf16 %v6342_v29, %v10808_v9  ;;  %v6341_v3 = vadd.bf16 1068908470, %v6333_v14  ;;  %v6265_v52 = vmul.bf16 1051213480, %v6257_v22  ;;  %v8403_v53 = vpop.eup %8402  ;;  %v6469_v34 = vpack.c.bf16 %v10856_v30, %v10853_v44 }
 0xb6d   : > { %v6320_v29 = vmul.bf16 1065893768, %v10864_v57  ;;  %8414 = vrcp.f32 %v6287_v33  ;;  %v6431_v17 = vmul.f32 %v6415_v15, %v6399_v51  ;;  %v8405_v50 = vpop.eup %8404  ;;  %v6199_v44 = vadd.f32 %v10733_v41, %v10799_v6 }
 0xb6e   : > { %v6358_v0 = vadd.bf16 3197288082, %v6350_v16  ;;  %v6349_v59 = vmul.bf16 %v6341_v3, %v10829_v62  ;;  %8416 = vrcp.f32 %v6288_v47  ;;  %v6207_v16 = vadd.f32 %v10797_v10, %v10733_v41 }
 0xb6f   : > { %v6328_v8 = vadd.bf16 3216687034, %v6320_v29  ;;  %v10873_v12 = vpack.c.bf16 %v8405_v50, %v8403_v53  ;;  %v6273_v63 = vadd.bf16 1065369472, %v6265_v52  ;;  %v6432_v33 = vmul.f32 %v6416_v61, %v6400_v20  ;;  %v8407_v52 = vpop.eup %8406 }
 0xb70   : > { %v6366_v32 = vmul.bf16 %v6358_v0, %v10808_v9  ;;  %v6357_v14 = vadd.bf16 3197288082, %v6349_v59  ;;  %v6397_v51 = vunpack.c.l.bf16 %v6257_v22  ;;  %v11451_v15 = vmul.bf16 1060454197, %v10756_v26 }
 0xb71   : > { %v6336_v3 = vmul.bf16 %v6328_v8, %v10864_v57  ;;  %v6319_v10 = vmul.bf16 1065893768, %v10873_v12  ;;  %v6457_v47 = vmul.f32 1.442695, %v6431_v17  ;;  %v6285_v53 = vunpack.c.l.bf16 %v6273_v63 }
 0xb72   : > { %v6374_v30 = vadd.bf16 1048723074, %v6366_v32  ;;  %vm10879_vm7 = vcmp.ge.bf16.partialorder %v11451_v15, 0  ;;  %v6365_v6 = vmul.bf16 %v6357_v14, %v10829_v62  ;;  %v6286_v50 = vunpack.c.h.bf16 %v6273_v63 }
 0xb73   : > { %v6398_v20 = vunpack.c.h.bf16 %v6257_v22  ;;  %v8409_v61 = vpop.eup %8408  ;;  %v6344_v32 = vadd.bf16 1068908470, %v6336_v3  ;;  %v6327_v59 = vadd.bf16 3216687034, %v6319_v10  ;;  %8418 = vrcp.f32 %v6285_v53 }
 0xb74   : > { %v6382_v29 = vmul.bf16 %v6374_v30, %v10808_v9  ;;  %v6413_v15 = vsub.f32 0.0, %v6397_v51  ;;  %v10887_v46 = vpop.eup %8410  ;;  %v6373_v8 = vadd.bf16 1048723074, %v6365_v6  ;;  %8420 = vrcp.f32 %v6286_v50 }
 0xb75   : > { %v6414_v28 = vsub.f32 0.0, %v6398_v20  ;;  %v6352_v17 = vmul.bf16 %v6344_v32, %v10864_v57  ;;  %v6335_v38 = vmul.bf16 %v6327_v59, %v10873_v12  ;;  %v6210_v63 = vadd.f32 %v10801_v7, %v10733_v41  ;;  %v8413_v22 = vpop.eup %8412 }
 0xb76   : > { %v6478_v11 = vmul.bf16 %v6470_v42, %v6382_v29  ;;  %v6429_v9 = vmul.f32 %v6413_v15, %v6397_v51  ;;  %v6381_v14 = vmul.bf16 %v6373_v8, %v10829_v62  ;;  %v6202_v10 = vadd.f32 %v10733_v41, %v10805_v43 }
 0xb77   : > { %v6430_v3 = vmul.f32 %v6414_v28, %v6398_v20  ;;  %v8415_v42 = vpop.eup %8414  ;;  %v6360_v53 = vadd.bf16 3197288082, %v6352_v17  ;;  %v6343_v29 = vadd.bf16 1068908470, %v6335_v38  ;;  %v6459_v6 = vmul.f32 1.442695, %v6432_v33 }
 0xb78   : > { %v6486_v30 = vsub.bf16 1065369472, %v6478_v11  ;;  %v10896_v50 = vpack.c.bf16 %v6210_v63, %v6207_v16  ;;  %v8417_v32 = vpop.eup %8416  ;;  %v6477_v59 = vmul.bf16 %v6469_v34, %v6381_v14  ;;  %v6453_v15 = vmul.f32 1.442695, %v6429_v9 }
 0xb79   : > { %v10899_v7 = vpack.c.bf16 %v6202_v10, %v6199_v44  ;;  %v6368_v11 = vmul.bf16 %v6360_v53, %v10864_v57  ;;  %v6351_v28 = vmul.bf16 %v6343_v29, %v10873_v12  ;;  %v10903_v62 = vpack.c.bf16 %v8417_v32, %v8415_v42 }
 0xb7a   : > { %v6494_v51 = vmul.bf16 %v6486_v30, %v10840_v36  ;;  %v6455_v41 = vmul.f32 1.442695, %v6430_v3  ;;  %v6485_v20 = vsub.bf16 1065369472, %v6477_v59  ;;  %v6224_v38 = vmul.bf16 1056980736, %v10756_v26 }
 0xb7b   : > { %8422 = vpow2.f32 %v6457_v47  ;;  %v6376_v16 = vadd.bf16 1048723074, %v6368_v11  ;;  %v6359_v33 = vadd.bf16 3197288082, %v6351_v28  ;;  %v6322_v36 = vmul.bf16 1065893768, %v10903_v62 }
 0xb7c   : > { %v6502_v43 = vadd.bf16 1065369472, %v6494_v51  ;;  %8424 = vpow2.f32 %v6459_v6  ;;  %v11454_v34 = vmul.bf16 1056980736, %v10739_v31  ;;  %v11455_v8 = vmov 3212885888  }
 0xb7d   : > { %v6248_v17 = vsel %vm10879_vm7, 1065369472, %v11455_v8  ;;  %v6472_v9 = vpack.c.bf16 %v8409_v61, %v8407_v52  ;;  %8426 = vpow2.f32 %v6453_v15  ;;  %v8419_v63 = vpop.eup %8418  ;;  %v6384_v30 = vmul.bf16 %v6376_v16, %v10864_v57 }
 0xb7e   : > { %v6510_v44 = vmul.bf16 %v6502_v43, %v11454_v34  ;;  %v6367_v14 = vmul.bf16 %v6359_v33, %v10873_v12  ;;  %v6330_v47 = vadd.bf16 3216687034, %v6322_v36  ;;  %8428 = vpow2.f32 %v6455_v41  ;;  %v8421_v3 = vpop.eup %8420 }
 0xb7f   : > { %v6493_v53 = vmul.bf16 %v6485_v20, %v10850_v48  ;;  %v6236_v31 = vmul.bf16 1060454197, %v10896_v50  ;;  %v6480_v29 = vmul.bf16 %v6472_v9, %v6384_v30  ;;  %v10917_v52 = vpack.c.bf16 %v8421_v3, %v8419_v63 }
 0xb80   : > { %v6519_v10 = vunpack.c.l.bf16 %v6510_v44  ;;  %v6520_v42 = vunpack.c.h.bf16 %v6510_v44  ;;  %v6375_v6 = vadd.bf16 1048723074, %v6367_v14  ;;  %v6338_v0 = vmul.bf16 %v6330_v47, %v10903_v62 }
 0xb81   : > { %v11456_v32 = vmul.bf16 1060454197, %v10776_v1  ;;  %v6471_v48 = vpack.c.bf16 %v8413_v22, %v10887_v46  ;;  %v6321_v11 = vmul.bf16 1065893768, %v10917_v52  ;;  %v6235_v28 = vmul.bf16 1060454197, %v10899_v7 }
 0xb82   : > { %v10920_v61 = vmul.f32 %v6519_v10, %v10760_v54  ;;  %v10923_v57 = vmul.f32 %v6520_v42, %v10770_v27  ;;  %v6383_v59 = vmul.bf16 %v6375_v6, %v10873_v12  ;;  %v6346_v15 = vadd.bf16 1068908470, %v6338_v0 }
 0xb83   : > { %vm10927_vm8 = vcmp.ge.bf16.partialorder %v11456_v32, 0  ;;  %v10937_v54 = vadd.f32 %v10714_v45, %v10754_v18  ;;  %v6488_v27 = vsub.bf16 1065369472, %v6480_v29  ;;  %v11459_v41 = vmul.bf16 1060454197, %v10803_v23 }
 0xb84   : > { %v10947_v46 = vand.u32 2147450879, %v6236_v31  ;;  %v6501_v12 = vadd.bf16 1065369472, %v6493_v53  ;;  %v6479_v22 = vmul.bf16 %v6471_v48, %v6383_v59  ;;  %v6354_v20 = vmul.bf16 %v6346_v15, %v10903_v62 }
 0xb85   : > { %vm10941_vm9 = vcmp.ge.bf16.partialorder %v11459_v41, 0  ;;  %v6329_v16 = vadd.bf16 3216687034, %v6321_v11  ;;  %v8423_v33 = vpop.eup %8422  ;;  %v10952_v45 = vadd.f32 %v10718_v39, %v10754_v18  ;;  %v6223_v36 = vmul.bf16 1056980736, %v10776_v1 }
 0xb86   : > { %v6247_v34 = vsel %vm10927_vm8, 1065369472, %v11455_v8  ;;  %v6268_v44 = vmul.bf16 1051213480, %v10947_v46  ;;  %v8425_v9 = vpop.eup %8424  ;;  %v6487_v63 = vsub.bf16 1065369472, %v6479_v22  ;;  %v6496_v39 = vmul.bf16 %v6488_v27, %v6248_v17 }
 0xb87   : > { %v6362_v30 = vadd.bf16 3197288082, %v6354_v20  ;;  %v6337_v14 = vmul.bf16 %v6329_v16, %v10917_v52  ;;  %v10962_v47 = vand.u32 2147450879, %v6235_v28  ;;  %v8427_v3 = vpop.eup %8426  ;;  %v6226_v10 = vmul.bf16 1056980736, %v10803_v23 }
 0xb88   : > { %v6250_v1 = vsel %vm10941_vm9, 1065369472, %v11455_v8  ;;  %v6276_v42 = vadd.bf16 1065369472, %v6268_v44  ;;  %v8429_v53 = vpop.eup %8428  ;;  %v11462_v29 = vmul.bf16 1056980736, %v10741_v4  ;;  %v6495_v0 = vmul.bf16 %v6487_v63, %v6247_v34 }
 0xb89   : > { %v6370_v32 = vmul.bf16 %v6362_v30, %v10903_v62  ;;  %v6345_v51 = vadd.bf16 1068908470, %v6337_v14  ;;  %v11463_v48 = vmul.bf16 1060454197, %v10827_v55  ;;  %v6403_v11 = vunpack.c.l.bf16 %v10947_v46 }
 0xb8a   : > { %v6509_v6 = vmul.bf16 %v6501_v12, %v11462_v29  ;;  %v6291_v17 = vunpack.c.l.bf16 %v6276_v42  ;;  %v6292_v15 = vunpack.c.h.bf16 %v6276_v42  ;;  %v6404_v4 = vunpack.c.h.bf16 %v10947_v46 }
 0xb8b   : > { %vm10973_vm10 = vcmp.ge.bf16.partialorder %v11463_v48, 0  ;;  %v6378_v27 = vadd.bf16 1048723074, %v6370_v32  ;;  %v6353_v41 = vmul.bf16 %v6345_v51, %v10917_v52  ;;  %v6267_v43 = vmul.bf16 1051213480, %v10962_v47 }
 0xb8c   : > { %v6504_v12 = vadd.bf16 1065369472, %v6496_v39  ;;  %v6503_v22 = vadd.bf16 1065369472, %v6495_v0  ;;  %v6474_v20 = vpack.c.bf16 %v8425_v9, %v8423_v33  ;;  %8430 = vrcp.f32 %v6291_v17 }
 0xb8d   : > { %v6386_v16 = vmul.bf16 %v6378_v27, %v10903_v62  ;;  %v6361_v34 = vadd.bf16 3197288082, %v6353_v41  ;;  %8432 = vrcp.f32 %v6292_v15  ;;  %v6517_v44 = vunpack.c.l.bf16 %v6509_v6 }
 0xb8e   : > { %v6249_v63 = vsel %vm10973_vm10, 1065369472, %v11455_v8  ;;  %v6473_v30 = vpack.c.bf16 %v8429_v53, %v8427_v3  ;;  %v6419_v14 = vsub.f32 0.0, %v6403_v11  ;;  %v6275_v42 = vadd.bf16 1065369472, %v6267_v43 }
 0xb8f   : > { %v6482_v29 = vmul.bf16 %v6474_v20, %v6386_v16  ;;  %v6369_v46 = vmul.bf16 %v6361_v34, %v10917_v52  ;;  %v6420_v32 = vsub.f32 0.0, %v6404_v4  ;;  %v6518_v39 = vunpack.c.h.bf16 %v6509_v6 }
 0xb90   : > { %v6512_v33 = vmul.bf16 %v6504_v12, %v6224_v38  ;;  %v6511_v9 = vmul.bf16 %v6503_v22, %v6223_v36  ;;  %v6289_v62 = vunpack.c.l.bf16 %v6275_v42  ;;  %v6290_v0 = vunpack.c.h.bf16 %v6275_v42 }
 0xb91   : > { %v6490_v51 = vsub.bf16 1065369472, %v6482_v29  ;;  %v6377_v48 = vadd.bf16 1048723074, %v6369_v46  ;;  %v6533_v17 = vmul.f32 %v6517_v44, %v10765_v37  ;;  %v6534_v59 = vmul.f32 %v6518_v39, %v10774_v5 }
 0xb92   : > { %8434 = vrcp.f32 %v6289_v62  ;;  %v6401_v3 = vunpack.c.l.bf16 %v10962_v47  ;;  %v6402_v53 = vunpack.c.h.bf16 %v10962_v47  ;;  %v6550_v6 = vpack.c.bf16 %v10923_v57, %v10920_v61 }
 0xb93   : > { %v6498_v15 = vmul.bf16 %v6490_v51, %v6250_v1  ;;  %v6385_v26 = vmul.bf16 %v6377_v48, %v10917_v52  ;;  %8436 = vrcp.f32 %v6290_v0  ;;  %v6549_v38 = vpack.c.bf16 %v6534_v59, %v6533_v17 }
 0xb94   : > { %v6435_v36 = vmul.f32 %v6419_v14, %v6403_v11  ;;  %v6436_v27 = vmul.f32 %v6420_v32, %v6404_v4  ;;  %v6521_v41 = vunpack.c.l.bf16 %v6511_v9  ;;  %v6522_v43 = vunpack.c.h.bf16 %v6511_v9 }
 0xb95   : > { %v6506_v37 = vadd.bf16 1065369472, %v6498_v15  ;;  %v6481_v12 = vmul.bf16 %v6473_v30, %v6385_v26  ;;  %8043 = vmatprep.mubr.bf16.mxu1 %v6549_v38  ;;  %v6523_v5 = vunpack.c.l.bf16 %v6512_v33  ;;  %v6524_v22 = vunpack.c.h.bf16 %v6512_v33 }
 0xb96   : > { %v8431_v20 = vpop.eup %8430  ;;  %v6417_v16 = vsub.f32 0.0, %v6401_v3  ;;  %v6418_v47 = vsub.f32 0.0, %v6402_v53  ;;  %8044 = vmatmul.mubr.bf16.vlgmr.msra.gmra.mrb[208].mxu1 %v6550_v6  ;;  %v6537_v61 = vmul.f32 %v6521_v41, %v10784_v13  ;;  %v6538_v57 = vmul.f32 %v6522_v43, %v10835_v24 }
 0xb97   : > { %v8433_v52 = vpop.eup %8432  ;;  %v6514_v1 = vmul.bf16 %v6506_v37, %v6226_v10  ;;  %v6489_v11 = vsub.bf16 1065369472, %v6481_v12  ;;  %v6539_v4 = vmul.f32 %v6523_v5, %v10780_v19  ;;  %v6540_v34 = vmul.f32 %v6524_v22, %v10791_v2 }
 0xb98   : > { %v6316_v44 = vpack.c.bf16 %v8433_v52, %v8431_v20  ;;  %v6465_v30 = vmul.f32 1.442695, %v6435_v36  ;;  %v6467_v14 = vmul.f32 1.442695, %v6436_v27  ;;  %v6551_v42 = vpack.c.bf16 %v6538_v57, %v6537_v61 }
 0xb99   : > { %v6497_v29 = vmul.bf16 %v6489_v11, %v6249_v63  ;;  %v6552_v46 = vpack.c.bf16 %v6540_v34, %v6539_v4  ;;  %v6527_v32 = vunpack.c.l.bf16 %v6514_v1  ;;  %v6528_v39 = vunpack.c.h.bf16 %v6514_v1 }
 0xb9a   : > { %v6225_v13 = vmul.bf16 1056980736, %v10827_v55  ;;  %v6324_v24 = vmul.bf16 1065893768, %v6316_v44  ;;  %v6433_v33 = vmul.f32 %v6417_v16, %v6401_v3  ;;  %8047 = vmatprep.mubr.bf16.mxu1 %v6551_v42  ;;  %v6434_v10 = vmul.f32 %v6418_v47, %v6402_v53 }
 0xb9b   : > { %v6505_v23 = vadd.bf16 1065369472, %v6497_v29  ;;  %v6543_v9 = vmul.f32 %v6527_v32, %v10937_v54  ;;  %v6544_v19 = vmul.f32 %v6528_v39, %v10952_v45  ;;  %8438 = vpow2.f32 %v6465_v30 }
 0xb9c   : > { %v8435_v2 = vpop.eup %8434  ;;  %v6332_v62 = vadd.bf16 3216687034, %v6324_v24  ;;  %8440 = vpow2.f32 %v6467_v14  ;;  %v6065_v48 = vadd.f32 %v10754_v18, %v10716_v35  ;;  %v6461_v59 = vmul.f32 1.442695, %v6433_v33 }
 0xb9d   : > { %v8437_v0 = vpop.eup %8436  ;;  %v6513_v51 = vmul.bf16 %v6505_v23, %v6225_v13  ;;  %v6554_v63 = vpack.c.bf16 %v6544_v19, %v6543_v9  ;;  %v6068_v3 = vadd.f32 %v10754_v18, %v10720_v40  ;;  %v6463_v54 = vmul.f32 1.442695, %v6434_v10 }
 0xb9e   : > { %v6340_v55 = vmul.bf16 %v6332_v62, %v6316_v44  ;;  %v6315_v17 = vpack.c.bf16 %v8437_v0, %v8435_v2  ;;  %8048 = vmatmul.mubr.bf16.gmra.mrb[212].mxu1 %v6552_v46  ;;  %8442 = vpow2.f32 %v6461_v59  ;;  %vm6244_vm11 = vcmp.ge.bf16.partialorder %v6236_v31, 0 }
 0xb9f   : > { %v6525_v53 = vunpack.c.l.bf16 %v6513_v51  ;;  %v6526_v45 = vunpack.c.h.bf16 %v6513_v51  ;;  %8444 = vpow2.f32 %v6463_v54  ;;  %v6252_v30 = vsel %vm6244_vm11, 1065369472, %v11455_v8 }
 0xba0   : > { %v6348_v6 = vadd.bf16 1068908470, %v6340_v55  ;;  %v6323_v15 = vmul.bf16 1065893768, %v6315_v17  ;;  %v6228_v46 = vmul.bf16 1056980736, %v10896_v50  ;;  %v6089_v31 = vadd.f32 %v10722_v21, %v10754_v18 }
 0xba1   : > { %v6541_v26 = vmul.f32 %v6525_v53, %v6065_v48  ;;  %v6542_v38 = vmul.f32 %v6526_v45, %v6068_v3  ;;  %vm6243_vm12 = vcmp.ge.bf16.partialorder %v6235_v28, 0  ;;  %v6092_v33 = vadd.f32 %v10726_v58, %v10754_v18  ;;  %v6560_v3 = vld [vmem:[#allocation4 + $0x18] sm:$0xff]  ;;  %v6558_v45 = vld [vmem:[#allocation4 + $0x8] sm:$0xff] }
 0xba2   : > { %v6356_v36 = vmul.bf16 %v6348_v6, %v6316_v44  ;;  %v6331_v27 = vadd.bf16 3216687034, %v6323_v15  ;;  %v6251_v24 = vsel %vm6243_vm12, 1065369472, %v11455_v8  ;;  %v6227_v50 = vmul.bf16 1056980736, %v10899_v7 }
 0xba3   : > { %v6553_v41 = vpack.c.bf16 %v6542_v38, %v6541_v26  ;;  %v6081_v51 = vadd.f32 %v10754_v18, %v10724_v56  ;;  %v6084_v21 = vadd.f32 %v10754_v18, %v10728_v49  ;;  %v6557_v7 = vld [vmem:[#allocation4] sm:$0xff] }
 0xba4   : > { %v6364_v35 = vadd.bf16 3197288082, %v6356_v36  ;;  %v6339_v43 = vmul.bf16 %v6331_v27, %v6315_v17  ;;  %v11466_v15 = vld [vmem:[#allocation9_spill] sm:$0xff]  ;;  %v6563_v36 = vld [vmem:[#allocation4 + $0x30] sm:$0xff] }
 0xba5   : > { %8051 = vmatprep.mubr.bf16.mxu1 %v6553_v41  ;;  %v8439_v37 = vpop.eup %8438  ;;  %v11025_v26 = vsub.s32 5, %v11466_v15  ;;  %v8463_v27 = vld [vmem:[%s11198_s4] sm:$0xff] }
 0xba6   : > { %v6372_v12 = vmul.bf16 %v6364_v35, %v6316_v44  ;;  %v6347_v5 = vadd.bf16 1068908470, %v6339_v43  ;;  %8052 = vmatmul.mubr.bf16.gmra.mrb[216].mxu1 %v6554_v63  ;;  %v8441_v40 = vpop.eup %8440  ;;  %v6561_v35 = vld [vmem:[#allocation4 + $0x20] sm:$0xff] }
 0xba7   : > { %v6476_v47 = vpack.c.bf16 %v8441_v40, %v8439_v37  ;;  %v11035_v41 = vrot.slane %v8463_v27, %v11025_v26  ;;  %v6564_v37 = vld [vmem:[#allocation4 + $0x38] sm:$0xff] }
 0xba8   : > { %v6380_v22 = vadd.bf16 1048723074, %v6372_v12  ;;  %v6355_v20 = vmul.bf16 %v6347_v5, %v6315_v17  ;;  %v8443_v57 = vpop.eup %8442  ;;  %v11467_v12 = vld [vmem:[#allocation14_spill] sm:$0xff] }
 0xba9   : > { %v8445_v11 = vpop.eup %8444  ;;  %v6832_v5 = vrot.slane %v11467_v12, %v11025_v26  ;;  %v6811_v12 = vld [vmem:[#allocation2 + $0x30] sm:$0xff] }
 0xbaa   : > { %v6388_v16 = vmul.bf16 %v6380_v22, %v6316_v44  ;;  %v6363_v61 = vadd.bf16 3197288082, %v6355_v20  ;;  %v6475_v29 = vpack.c.bf16 %v8445_v11, %v8443_v57  ;;  %v6562_v20 = vld [vmem:[#allocation4 + $0x28] sm:$0xff] }
 0xbac   : > { %v6484_v52 = vmul.bf16 %v6476_v47, %v6388_v16  ;;  %v6371_v1 = vmul.bf16 %v6363_v61, %v6315_v17  ;;  %v11468_v16 = vld [vmem:[#allocation10_spill] sm:$0xff] }
 0xbad   : > { %v6824_v47 = vrot.slane %v11468_v16, %v11025_v26 }
 0xbae   : > { %v6492_v4 = vsub.bf16 1065369472, %v6484_v52  ;;  %v6379_v34 = vadd.bf16 1048723074, %v6371_v1  ;;  %v11469_v1 = vld [vmem:[#allocation15_spill] sm:$0xff] }
 0xbaf   : > { %v6836_v11 = vrot.slane %v11469_v1, %v11025_v26 }
 0xbb0   : > { %v6500_v14 = vmul.bf16 %v6492_v4, %v6252_v30  ;;  %v6387_v42 = vmul.bf16 %v6379_v34, %v6315_v17  ;;  %v6559_v17 = vld [vmem:[#allocation4 + $0x10] sm:$0xff] }
 0xbb2   : > { %v6508_v32 = vadd.bf16 1065369472, %v6500_v14  ;;  %v6483_v44 = vmul.bf16 %v6475_v29, %v6387_v42  ;;  %v11470_v42 = vld [vmem:[#allocation11_spill] sm:$0xff] }
 0xbb3   : > { %v6828_v29 = vrot.slane %v11470_v42, %v11025_v26 }
 0xbb4   : > { %v6516_v39 = vmul.bf16 %v6508_v32, %v6228_v46  ;;  %v6491_v13 = vsub.bf16 1065369472, %v6483_v44 }
 0xbb6   : > { %v6499_v23 = vmul.bf16 %v6491_v13, %v6251_v24  ;;  %v6531_v10 = vunpack.c.l.bf16 %v6516_v39  ;;  %v6532_v9 = vunpack.c.h.bf16 %v6516_v39  ;;  %v6807_v24 = vld [vmem:[#allocation2 + $0x10] sm:$0xff] }
 0xbb8   : > { %v6507_v19 = vadd.bf16 1065369472, %v6499_v23  ;;  %v6547_v2 = vmul.f32 %v6531_v10, %v6089_v31  ;;  %v6548_v62 = vmul.f32 %v6532_v9, %v6092_v33  ;;  %v6567_v10 = vld [vmem:[#allocation4 + $0x50] sm:$0xff]  ;;  %v6805_v9 = vld [vmem:[#allocation2] sm:$0xff] }
 0xbba   : > { %v6515_v28 = vmul.bf16 %v6507_v19, %v6227_v50  ;;  %v6556_v0 = vpack.c.bf16 %v6548_v62, %v6547_v2  ;;  %v6565_v2 = vld [vmem:[#allocation4 + $0x40] sm:$0xff]  ;;  %v6808_v62 = vld [vmem:[#allocation2 + $0x18] sm:$0xff] }
 0xbbc   : > { %v6529_v8 = vunpack.c.l.bf16 %v6515_v28  ;;  %v6530_v63 = vunpack.c.h.bf16 %v6515_v28 }
 0xbbe   : > { %v6545_v48 = vmul.f32 %v6529_v8, %v6081_v51  ;;  %v6546_v58 = vmul.f32 %v6530_v63, %v6084_v21  ;;  %v6568_v21 = vld [vmem:[#allocation4 + $0x58] sm:$0xff]  ;;  %v6848_v8 = vrot.slane %v11404_v60, %v11025_v26  ;;  %v6806_v63 = vld [vmem:[#allocation2 + $0x8] sm:$0xff] }
 0xbc0   : > { %v6555_v55 = vpack.c.bf16 %v6546_v58, %v6545_v48 }
 0xbc2   : > { %8055 = vmatprep.mubr.bf16.mxu1 %v6555_v55 }
 0xbc3   : > { %8056 = vmatmul.mubr.bf16.gmra.mrb[220].mxu1 %v6556_v0 }
 0xc69   : > { %v8045_v59 = vpop.f32.mrb[208].mxu1 }
 0xc6a   : > { %v6736_v54 = vadd.f32 %v8045_v59, %v6559_v17  ;;  %v6671_v53 = vpop.f32.mrb[209].mxu1  ;;  %v6566_v17 = vld [vmem:[#allocation4 + $0x48] sm:$0xff] }
 0xc6b   : > { %v6734_v6 = vadd.f32 %v6671_v53, %v6557_v7  ;;  %v8046_v56 = vpop.f32.mrb[210].mxu1  ;;  %v6840_v7 = vrot.slane %v11405_v25, %v11025_v26  ;;  %v11471_v53 = vld [vmem:[#allocation22_spill] sm:$0xff]  ;;  %v11472_v25 = vld [vmem:[#allocation19_spill] sm:$0xff] }
 0xc6c   : > { %6752 = vst.msk [vmem:[#allocation4 + $0x10] sm:$0xff] %vm577_vm0, %v6736_v54  ;;  %v6737_v49 = vadd.f32 %v8046_v56, %v6560_v3  ;;  %v6674_v18 = vpop.f32.mrb[211].mxu1 }
 0xc6d   : > { %6750 = vst.msk [vmem:[#allocation4] sm:$0xff] %vm577_vm0, %v6734_v6  ;;  %v6735_v38 = vadd.f32 %v6674_v18, %v6558_v45  ;;  %v6852_v45 = vrot.slane %v11471_v53, %v11025_v26  ;;  %v6844_v18 = vrot.slane %v11472_v25, %v11025_v26  ;;  %v11478_v25 = vld [vmem:[#allocation35_spill] sm:$0xff] }
 0xc6e   : > { %6753 = vst.msk [vmem:[#allocation4 + $0x18] sm:$0xff] %vm577_vm0, %v6737_v49 }
 0xc6f   : > { %6751 = vst.msk [vmem:[#allocation4 + $0x8] sm:$0xff] %vm577_vm0, %v6735_v38 }
 0xc71   : > { %v8049_v43 = vpop.f32.mrb[212].mxu1 }
 0xc72   : > { %v6740_v40 = vadd.f32 %v8049_v43, %v6563_v36  ;;  %v6687_v22 = vpop.f32.mrb[213].mxu1 }
 0xc73   : > { %v6771_v61 = vld [vmem:[#allocation4 + $0x10] sm:$0xff]  ;;  %v6738_v57 = vadd.f32 %v6687_v22, %v6561_v35  ;;  %v8050_v52 = vpop.f32.mrb[214].mxu1  ;;  %v6809_v22 = vld [vmem:[#allocation2 + $0x20] sm:$0xff] }
 0xc74   : > { %v6791_v4 = vadd.f32 %v11035_v41, %v6771_v61  ;;  %v6769_v34 = vld [vmem:[#allocation4] sm:$0xff]  ;;  %6756 = vst.msk [vmem:[#allocation4 + $0x30] sm:$0xff] %vm577_vm0, %v6740_v40  ;;  %v6741_v30 = vadd.f32 %v8050_v52, %v6564_v37  ;;  %v6690_v14 = vpop.f32.mrb[215].mxu1  ;;  %v11473_v52 = vld [vmem:[#allocation31_spill] sm:$0xff] }
 0xc75   : > { %v6789_v46 = vadd.f32 %v11035_v41, %v6769_v34  ;;  %v6772_v32 = vld [vmem:[#allocation4 + $0x18] sm:$0xff]  ;;  %6754 = vst.msk [vmem:[#allocation4 + $0x20] sm:$0xff] %vm577_vm0, %v6738_v57  ;;  %v6739_v44 = vadd.f32 %v6690_v14, %v6562_v20  ;;  %v6864_v1 = vrot.slane %v11473_v52, %v11025_v26  ;;  %v11474_v34 = vld [vmem:[#allocation27_spill] sm:$0xff]  ;;  %v6817_v52 = vld [vmem:[#allocation2 + $0x60] sm:$0xff] }
 0xc76   : > { %v6887_v39 = vmul.f32 %v6832_v5, %v6791_v4  ;;  %v6792_v13 = vadd.f32 %v11035_v41, %v6772_v32  ;;  %v6770_v31 = vld [vmem:[#allocation4 + $0x8] sm:$0xff]  ;;  %6757 = vst.msk [vmem:[#allocation4 + $0x38] sm:$0xff] %vm577_vm0, %v6741_v30  ;;  %v6856_v30 = vrot.slane %v11474_v34, %v11025_v26 }
 0xc77   : > { %v6885_v33 = vmul.f32 %v6824_v47, %v6789_v46  ;;  %v6790_v23 = vadd.f32 %v11035_v41, %v6770_v31  ;;  %6755 = vst.msk [vmem:[#allocation4 + $0x28] sm:$0xff] %vm577_vm0, %v6739_v44  ;;  %v6812_v47 = vld [vmem:[#allocation2 + $0x38] sm:$0xff] }
 0xc78   : > { %v6903_v50 = vadd.f32 %v6887_v39, %v6807_v24  ;;  %v6888_v19 = vmul.f32 %v6836_v11, %v6792_v13  ;;  %v6810_v11 = vld [vmem:[#allocation2 + $0x28] sm:$0xff] }
 0xc79   : > { %v6901_v28 = vadd.f32 %v6885_v33, %v6805_v9  ;;  %v6886_v0 = vmul.f32 %v6828_v29, %v6790_v23  ;;  %v8053_v51 = vpop.f32.mrb[216].mxu1  ;;  %v11475_v29 = vld [vmem:[#allocation30_spill] sm:$0xff]  ;;  %v6815_v9 = vld [vmem:[#allocation2 + $0x50] sm:$0xff] }
 0xc7a   : > { %6919 = vst.msk [vmem:[%s11061_s25 + $0x10] sm:$0xff] %vm577_vm0, %v6903_v50  ;;  %v6904_v48 = vadd.f32 %v6888_v19, %v6808_v62  ;;  %v6744_v58 = vadd.f32 %v8053_v51, %v6567_v10  ;;  %v6703_v55 = vpop.f32.mrb[217].mxu1  ;;  %v6868_v46 = vrot.slane %v11475_v29, %v11025_v26  ;;  %v11476_v39 = vld [vmem:[#allocation26_spill] sm:$0xff] }
 0xc7b   : > { %6917 = vst.msk [vmem:[%s11061_s25] sm:$0xff] %vm577_vm0, %v6901_v28  ;;  %v6902_v59 = vadd.f32 %v6886_v0, %v6806_v63  ;;  %v6775_v60 = vld [vmem:[#allocation4 + $0x30] sm:$0xff]  ;;  %v6742_v3 = vadd.f32 %v6703_v55, %v6565_v2  ;;  %v8054_v54 = vpop.f32.mrb[218].mxu1  ;;  %v6860_v13 = vrot.slane %v11476_v39, %v11025_v26  ;;  %v6813_v2 = vld [vmem:[#allocation2 + $0x40] sm:$0xff]  ;;  %v6816_v0 = vld [vmem:[#allocation2 + $0x58] sm:$0xff] }
 0xc7c   : > { %6920 = vst.msk [vmem:[%s11061_s25 + $0x18] sm:$0xff] %vm577_vm0, %v6904_v48  ;;  %v6795_v6 = vadd.f32 %v11035_v41, %v6775_v60  ;;  %v6773_v56 = vld [vmem:[#allocation4 + $0x20] sm:$0xff]  ;;  %6760 = vst.msk [vmem:[#allocation4 + $0x50] sm:$0xff] %vm577_vm0, %v6744_v58  ;;  %v6745_v15 = vadd.f32 %v8054_v54, %v6568_v21  ;;  %v6706_v49 = vpop.f32.mrb[219].mxu1  ;;  %v6571_v58 = vld [vmem:[#allocation4 + $0x70] sm:$0xff] }
 0xc7d   : > { %6918 = vst.msk [vmem:[%s11061_s25 + $0x8] sm:$0xff] %vm577_vm0, %v6902_v59  ;;  %v6793_v38 = vadd.f32 %v11035_v41, %v6773_v56  ;;  %v6776_v36 = vld [vmem:[#allocation4 + $0x38] sm:$0xff]  ;;  %6758 = vst.msk [vmem:[#allocation4 + $0x40] sm:$0xff] %vm577_vm0, %v6742_v3  ;;  %v6743_v27 = vadd.f32 %v6706_v49, %v6566_v17  ;;  %v6569_v55 = vld [vmem:[#allocation4 + $0x60] sm:$0xff] }
 0xc7e   : > { %v6891_v35 = vmul.f32 %v6848_v8, %v6795_v6  ;;  %v6796_v43 = vadd.f32 %v11035_v41, %v6776_v36  ;;  %v6774_v37 = vld [vmem:[#allocation4 + $0x28] sm:$0xff]  ;;  %6761 = vst.msk [vmem:[#allocation4 + $0x58] sm:$0xff] %vm577_vm0, %v6745_v15  ;;  %v11479_v36 = vld [vmem:[#allocation39_spill] sm:$0xff] }
 0xc7f   : > { %v6889_v5 = vmul.f32 %v6840_v7, %v6793_v38  ;;  %v6794_v40 = vadd.f32 %v11035_v41, %v6774_v37  ;;  %6759 = vst.msk [vmem:[#allocation4 + $0x48] sm:$0xff] %vm577_vm0, %v6743_v27  ;;  %v6814_v8 = vld [vmem:[#allocation2 + $0x48] sm:$0xff]  ;;  %v6572_v7 = vld [vmem:[#allocation4 + $0x78] sm:$0xff]  ;;  %v6884_v27 = vrot.slane %v11479_v36, %v11025_v26 }
 0xc80   : > { %v6907_v20 = vadd.f32 %v6891_v35, %v6811_v12  ;;  %v6892_v16 = vmul.f32 %v6852_v45, %v6796_v43  ;;  %v6570_v3 = vld [vmem:[#allocation4 + $0x68] sm:$0xff] }
 0xc81   : > { %v6905_v61 = vadd.f32 %v6889_v5, %v6809_v22  ;;  %v6890_v57 = vmul.f32 %v6844_v18, %v6794_v40  ;;  %v11477_v15 = vld [vmem:[#allocation38_spill] sm:$0xff]  ;;  %v6872_v18 = vrot.slane %v11478_v25, %v11025_v26 }
 0xc82   : > { %6923 = vst.msk [vmem:[%s11061_s25 + $0x30] sm:$0xff] %vm577_vm0, %v6907_v20  ;;  %v6908_v4 = vadd.f32 %v6892_v16, %v6812_v47  ;;  %v6880_v49 = vrot.slane %v11477_v15, %v11025_v26  ;;  %v11480_v37 = vld [vmem:[#allocation34_spill] sm:$0xff]  ;;  %v6819_v47 = vld [vmem:[#allocation2 + $0x70] sm:$0xff] }
 0xc83   : > { %6921 = vst.msk [vmem:[%s11061_s25 + $0x20] sm:$0xff] %vm577_vm0, %v6905_v61  ;;  %v6906_v14 = vadd.f32 %v6890_v57, %v6810_v11  ;;  %v6779_v42 = vld [vmem:[#allocation4 + $0x50] sm:$0xff]  ;;  %v6876_v12 = vrot.slane %v11480_v37, %v11025_v26  ;;  %v6820_v11 = vld [vmem:[#allocation2 + $0x78] sm:$0xff] }
 0xc84   : > { %6924 = vst.msk [vmem:[%s11061_s25 + $0x38] sm:$0xff] %vm577_vm0, %v6908_v4  ;;  %v6799_v32 = vadd.f32 %v11035_v41, %v6779_v42  ;;  %v6777_v44 = vld [vmem:[#allocation4 + $0x40] sm:$0xff] }
 0xc85   : > { %6922 = vst.msk [vmem:[%s11061_s25 + $0x28] sm:$0xff] %vm577_vm0, %v6906_v14  ;;  %v6797_v31 = vadd.f32 %v11035_v41, %v6777_v44  ;;  %v6780_v24 = vld [vmem:[#allocation4 + $0x58] sm:$0xff] }
 0xc86   : > { %v6895_v33 = vmul.f32 %v6864_v1, %v6799_v32  ;;  %v6800_v23 = vadd.f32 %v11035_v41, %v6780_v24  ;;  %v6778_v10 = vld [vmem:[#allocation4 + $0x48] sm:$0xff] }
 0xc87   : > { %v6893_v50 = vmul.f32 %v6856_v30, %v6797_v31  ;;  %v6798_v19 = vadd.f32 %v11035_v41, %v6778_v10  ;;  %v6818_v30 = vld [vmem:[#allocation2 + $0x68] sm:$0xff] }
 0xc88   : > { %v6911_v62 = vadd.f32 %v6895_v33, %v6815_v9  ;;  %v6896_v28 = vmul.f32 %v6868_v46, %v6800_v23 }
 0xc89   : > { %v6909_v51 = vadd.f32 %v6893_v50, %v6813_v2  ;;  %v6894_v21 = vmul.f32 %v6860_v13, %v6798_v19 }
 0xc8a   : > { %6927 = vst.msk [vmem:[%s11061_s25 + $0x50] sm:$0xff] %vm577_vm0, %v6911_v62  ;;  %v6912_v63 = vadd.f32 %v6896_v28, %v6816_v0 }
 0xc8b   : > { %6925 = vst.msk [vmem:[%s11061_s25 + $0x40] sm:$0xff] %vm577_vm0, %v6909_v51  ;;  %v6910_v48 = vadd.f32 %v6894_v21, %v6814_v8 }
 0xc8c   : > { %6928 = vst.msk [vmem:[%s11061_s25 + $0x58] sm:$0xff] %vm577_vm0, %v6912_v63 }
 0xc8d   : > { %6926 = vst.msk [vmem:[%s11061_s25 + $0x48] sm:$0xff] %vm577_vm0, %v6910_v48 }
 0xc96   : > { %v8057_v17 = vpop.f32.mrb[220].mxu1 }
 0xc97   : > { %v6748_v59 = vadd.f32 %v8057_v17, %v6571_v58  ;;  %v6719_v60 = vpop.f32.mrb[221].mxu1 }
 0xc98   : > { %v6746_v54 = vadd.f32 %v6719_v60, %v6569_v55  ;;  %v8058_v53 = vpop.f32.mrb[222].mxu1 }
 0xc99   : > { %6764 = vst.msk [vmem:[#allocation4 + $0x70] sm:$0xff] %vm577_vm0, %v6748_v59  ;;  %v6749_v45 = vadd.f32 %v8058_v53, %v6572_v7  ;;  %v6722_v6 = vpop.f32.mrb[223].mxu1 }
 0xc9a   : > { %6762 = vst.msk [vmem:[#allocation4 + $0x60] sm:$0xff] %vm577_vm0, %v6746_v54  ;;  %v6747_v56 = vadd.f32 %v6722_v6, %v6570_v3 }
 0xc9b   : > { %6765 = vst.msk [vmem:[#allocation4 + $0x78] sm:$0xff] %vm577_vm0, %v6749_v45 }
 0xc9c   : > { %6763 = vst.msk [vmem:[#allocation4 + $0x68] sm:$0xff] %vm577_vm0, %v6747_v56 }
 0xca0   : > { %v6783_v38 = vld [vmem:[#allocation4 + $0x70] sm:$0xff] }
 0xca1   : > { %v6803_v35 = vadd.f32 %v11035_v41, %v6783_v38  ;;  %v6781_v43 = vld [vmem:[#allocation4 + $0x60] sm:$0xff] }
 0xca2   : > { %v6801_v5 = vadd.f32 %v11035_v41, %v6781_v43  ;;  %v6784_v40 = vld [vmem:[#allocation4 + $0x78] sm:$0xff] }
 0xca3   : > { %v6899_v22 = vmul.f32 %v6880_v49, %v6803_v35  ;;  %v6804_v20 = vadd.f32 %v11035_v41, %v6784_v40  ;;  %v6782_v16 = vld [vmem:[#allocation4 + $0x68] sm:$0xff] }
 0xca4   : > { %v6897_v61 = vmul.f32 %v6872_v18, %v6801_v5  ;;  %v6802_v57 = vadd.f32 %v11035_v41, %v6782_v16 }
 0xca5   : > { %v6915_v26 = vadd.f32 %v6899_v22, %v6819_v47  ;;  %v6900_v1 = vmul.f32 %v6884_v27, %v6804_v20 }
 0xca6   : > { %v6913_v4 = vadd.f32 %v6897_v61, %v6817_v52  ;;  %v6898_v34 = vmul.f32 %v6876_v12, %v6802_v57 }
 0xca7   : > { %6931 = vst.msk [vmem:[%s11061_s25 + $0x70] sm:$0xff] %vm577_vm0, %v6915_v26  ;;  %v6916_v14 = vadd.f32 %v6900_v1, %v6820_v11 }
 0xca8   : > { %6929 = vst.msk [vmem:[%s11061_s25 + $0x60] sm:$0xff] %vm577_vm0, %v6913_v4  ;;  %v6914_v41 = vadd.f32 %v6898_v34, %v6818_v30 }
 0xca9   : > { %6932 = vst.msk [vmem:[%s11061_s25 + $0x78] sm:$0xff] %vm577_vm0, %v6916_v14 }
 0xcaa   : > { %6930 = vst.msk [vmem:[%s11061_s25 + $0x68] sm:$0xff] %vm577_vm0, %v6914_v41 }
 0xcab   : > { %8477 = shalt.err (!%p8474_p5)
}
 0xcac   : > { %s8478_s0 = scalar_lea.hbm %s11136_s28, 2048  ;;  %s8482_s12 = scalar_lea.hbm %s11205_s11, 4096 }
 0xcad   : > { %p8479_p6 = scmp.ne.s32.totalorder %s11136_s28, %s8478_s0  ;;  %p8483_p10 = scmp.lt.u32.totalorder %s11136_s28, %s11205_s11 }
 0xcae   : > { %p8484_p11 = scmp.lt.u32.totalorder %s8482_s12, %s8478_s0  ;;  %p8486_p13 = scmp.lt.u32.totalorder %s8478_s0, %s11136_s28 }
 0xcaf   : > { %p8480_p7 = pnand %p8479_p6, %p8651_p4 }
 0xcb0   : > { %p8485_p12 = por %p8484_p11, %p8483_p10 }
 0xcb1   : > { %p8481_p9 = pneg %p8480_p7 }
 0xcb2   : > { %p8487_p0 = por %p8486_p13, %p8485_p12 }
 0xcb4   : > { %p8488_p1 = pnand %p8487_p0, %p8481_p9 }
 0xcb6   : > { %8491 = shalt.err (!%p8488_p1)
}
 0xcb7   : > { %s8549_s14 = smov 128   ;;  %s8550_s15 = smov 8  }
 0xcb8   : > { %8075 = dma.vmem_to_hbm [thread:$0]  (%p8651_p4), %s11138_s26, 2048, %s11136_s28, %s11148_s20, %s8549_s14, %s8549_s14, %s8550_s15  }
 0xcb9 PF: > { %p8081_p2 = scmp.ge.s32.totalorder %s8542_s22, 2  ;;  %s6962_s16 = sand.u32 1, %s8522_s17  }
 0xcba   : > { %s6963_s23 = scalar_lea.sflag [#allocation6], %s6962_s16 }
 0xcbb   : > { %p8078_p3 = pnand %p8081_p2, %p8658_p8 }
 0xcbd   : > { %8517 = dma.done.wait (!%p8078_p3), %s6963_s23, 2048  }
 0xcbe   : > { %8519 = vsyncadd (!%p8078_p3), %s6963_s23, 4294965248  ;;  %s24_s22 = sadd.s32 1, %s8542_s22   ;;  %s11481_s27 = sld [smem:[#allocation8_spill]] }
 0xcbf   : > { %p21_p5 = scmp.ge.s32.totalorder %s24_s22, 4   ;;  %s11482_s17 = smov %s8526_s18 }
 0xcc0   : > { %s11483_s18 = smov %s8530_s19  ;;  %s11484_s19 = smov %s8664_s30 }
 0xcc1   : > { %s11485_s20 = smov %s8538_s21  ;;  %23 = sbr.rel (!%p21_p5) target bundleno = 7 (0x7), region = 123 }
 0xcc4   : > { %s11486_s21 = smov %s11481_s27 }
 0xcc8   :  { %6968 = vsyncpa [#allocation6], 1 }
 0xcc9   :  { %6970 = vsyncpa [#allocation6 + $0x1], 1 }

</bundles_post_ra>
